<compile_context>
chip_gen: v7x
topology: tpu7x:2x2x1
jax: 0.10.0
libtpu: 0.0.40
codegen_flags: <defaults>
</compile_context>

<pallas_src>
import jax
import jax.numpy as jnp
from jax.experimental import pallas as pl
from jax.experimental.pallas import tpu as pltpu

LOG_STD_MIN = -10.0
LOG_STD_MAX = -0.5
BN_EPS = 1e-5


def _round_up(x, m):
    return ((x + m - 1) // m) * m


def _cdiv(a, b):
    return (a + b - 1) // b


# ---------------------------------------------------------------------------
# Pallas kernel 1: fused 3x3 conv (in-kernel im2col) + folded BatchNorm + ReLU
# Input per grid step: one padded, row-flattened image (R, Cin) resident in
# VMEM; output: (H*Wp, Cout) bf16 (junk right-edge columns sliced off outside).
# ---------------------------------------------------------------------------
def _make_conv_kernel(H, Wp, Cin, Cout):
    Mout = H * Wp

    def kernel(x_ref, w_ref, s_ref, b_ref, o_ref):
        acc = jnp.zeros((Mout, Cout), jnp.float32)
        for t in range(9):                       # unrolled 3x3 taps (dy, dx)
            dy, dx = divmod(t, 3)
            off = dy * Wp + dx                   # static shifted-row offset
            xs = x_ref[pl.ds(off, Mout), :]      # (Mout, Cin) f32
            if Cin == 1:
                # conv1: K=1 -> VPU broadcast multiply-add, not MXU work.
                acc = acc + xs * w_ref[t].astype(jnp.float32)
            else:
                acc = acc + jnp.dot(xs.astype(jnp.bfloat16), w_ref[t],
                                    preferred_element_type=jnp.float32)
        acc = acc * s_ref[...] + b_ref[...]      # folded BN affine (f32)
        o_ref[...] = jnp.maximum(acc, 0.0).astype(o_ref.dtype)

    return kernel


def conv3x3_bn_relu(x_nhwc, w9, conv_b, gamma, beta, mean, var):
    """3x3 conv (pad=1) + eval-mode BatchNorm + ReLU as one Pallas call.

    x_nhwc: (B, H, W, Cin); w9: (9, Cin, Cout) tap-major (dy, dx)
            (== torch weight (Cout,Cin,3,3).permute(2,3,1,0).reshape(9,Cin,Cout)).
    The im2col happens *inside* the kernel as 9 shifted-row taps on the padded
    flattened image, so only ~1.1x the input plus the bf16 output touch HBM.
    The x operand is kept f32 (tiny) so the unaligned sublane slices stay on
    the most robust layout path; MXU operands are cast to bf16 in-kernel.
    """
    B, H, W, Cin = x_nhwc.shape
    Cout = w9.shape[2]
    Wp = W + 2
    # pad: 1 top, 2 bottom (1 halo + 1 slack row so every shifted flat slice
    # stays in bounds), 1 left, 1 right.
    xp = jnp.pad(x_nhwc, ((0, 0), (1, 2), (1, 1), (0, 0))).astype(jnp.float32)
    R = (H + 3) * Wp
    xp = xp.reshape(B, R, Cin)
    Mout = H * Wp

    scale = (gamma * jax.lax.rsqrt(var + BN_EPS)).astype(jnp.float32)
    bias = (scale * (conv_b - mean) + beta).astype(jnp.float32)

    out = pl.pallas_call(
        _make_conv_kernel(H, Wp, Cin, Cout),
        out_shape=jax.ShapeDtypeStruct((B, Mout, Cout), jnp.bfloat16),
        grid=(B,),
        in_specs=[
            pl.BlockSpec((None, R, Cin), lambda b: (b, 0, 0)),   # padded image
            pl.BlockSpec((9, Cin, Cout), lambda b: (0, 0, 0)),   # taps, resident
            pl.BlockSpec((1, Cout), lambda b: (0, 0)),           # BN scale
            pl.BlockSpec((1, Cout), lambda b: (0, 0)),           # BN bias (+conv bias)
        ],
        out_specs=pl.BlockSpec((None, Mout, Cout), lambda b: (b, 0, 0)),
        compiler_params=pltpu.CompilerParams(
            dimension_semantics=("parallel",),       # batch across TCs (v7x)
            vmem_limit_bytes=32 * 1024 * 1024),
    )(xp, w9.astype(jnp.bfloat16), scale.reshape(1, Cout), bias.reshape(1, Cout))
    # rows index (i, j) over the padded width; drop junk right-edge columns.
    return out.reshape(B, H, Wp, Cout)[:, :, :W, :]


def maxpool2x2(x_nhwc):
    """2x2 max pool, stride 2, FLOOR on odd dims (matches nn.MaxPool2d(2))."""
    B, H, W, C = x_nhwc.shape
    Hf, Wf = (H // 2) * 2, (W // 2) * 2
    x = x_nhwc[:, :Hf, :Wf, :]
    return x.reshape(B, Hf // 2, 2, Wf // 2, 2, C).max(axis=(2, 4))


# ---------------------------------------------------------------------------
# Pallas kernel 2: fused FC tail with K-streamed fc1.
#   acc += x[:, k] @ w1[k]                       (reduction grid, f32 scratch)
#   on last step:  h = relu(acc + b1); h = relu(h @ w2 + b2)
#                  o = h @ [w_mean | w_log_std] + b;  cols 2:4 clamped
# ---------------------------------------------------------------------------
def _fc_tail_kernel(x_ref, w1_ref, b1_ref, w2_ref, b2_ref, wh_ref, bh_ref,
                    o_ref, acc_ref):
    k = pl.program_id(0)

    @pl.when(k == 0)
    def _():
        acc_ref[...] = jnp.zeros_like(acc_ref)

    acc_ref[...] += jnp.dot(x_ref[...], w1_ref[...],
                            preferred_element_type=jnp.float32)

    @pl.when(k == pl.num_programs(0) - 1)
    def _():
        h = jnp.maximum(acc_ref[...] + b1_ref[...], 0.0)
        h = jnp.dot(h.astype(jnp.bfloat16), w2_ref[...],
                    preferred_element_type=jnp.float32) + b2_ref[...]
        h = jnp.maximum(h, 0.0)
        o = jnp.dot(h.astype(jnp.bfloat16), wh_ref[...],
                    preferred_element_type=jnp.float32) + bh_ref[...]
        # Columns 0:2 -> mean (identity); columns 2:4 -> log_std (clamped).
        col = jax.lax.broadcasted_iota(jnp.int32, o.shape, 1)
        o = jnp.where(col >= 2, jnp.clip(o, LOG_STD_MIN, LOG_STD_MAX), o)
        o_ref[...] = o.astype(o_ref.dtype)


def fc_tail(x, w1, b1, w2, b2, wh, bh, tk=2048):
    B, K = x.shape
    N1, N2, NH = w1.shape[1], w2.shape[1], wh.shape[1]
    # K-stream fc1 (the only big weight): reduction grid so the w1 block DMA
    # double-buffers behind the dot; also bounds VMEM (v5e 16 MiB safe).
    Kp = _round_up(K, 128)
    n_k = _cdiv(Kp, tk)
    tk_eff = _round_up(_cdiv(Kp, n_k), 128)
    Kp = n_k * tk_eff
    if Kp != K:
        x = jnp.pad(x, ((0, 0), (0, Kp - K)))
        w1 = jnp.pad(w1, ((0, Kp - K), (0, 0)))

    return pl.pallas_call(
        _fc_tail_kernel,
        out_shape=jax.ShapeDtypeStruct((B, NH), jnp.float32),
        grid=(n_k,),
        in_specs=[
            pl.BlockSpec((B, tk_eff), lambda k: (0, k)),     # activation chunk
            pl.BlockSpec((tk_eff, N1), lambda k: (k, 0)),    # streamed fc1 chunk
            pl.BlockSpec((1, N1), lambda k: (0, 0)),
            pl.BlockSpec((N1, N2), lambda k: (0, 0)),        # fc2 resident
            pl.BlockSpec((1, N2), lambda k: (0, 0)),
            pl.BlockSpec((N2, NH), lambda k: (0, 0)),        # fused heads
            pl.BlockSpec((1, NH), lambda k: (0, 0)),
        ],
        out_specs=pl.BlockSpec((B, NH), lambda k: (0, 0)),
        scratch_shapes=[pltpu.VMEM((B, N1), jnp.float32)],
        compiler_params=pltpu.CompilerParams(
            dimension_semantics=("arbitrary",)),             # reduction axis
    )(x.astype(jnp.bfloat16),
      w1.astype(jnp.bfloat16), b1.reshape(1, N1).astype(jnp.float32),
      w2.astype(jnp.bfloat16), b2.reshape(1, N2).astype(jnp.float32),
      wh.astype(jnp.bfloat16), bh.reshape(1, NH).astype(jnp.float32))


# ---------------------------------------------------------------------------
# Parameters (deterministic, synthesized in-script)
# ---------------------------------------------------------------------------
def init_params(key, H, W):
    keys = jax.random.split(key, 24)
    nrm = lambda k, shape, std=0.05: jax.random.normal(k, shape, jnp.float32) * std
    params = {}
    ki = 0
    # conv weights: (9, Cin, Cout), taps in (dy, dx) row-major order.
    for li, (cin, cout) in enumerate([(1, 16), (16, 32), (32, 48)], start=1):
        params[f"conv{li}_w"] = nrm(keys[ki], (9, cin, cout)); ki += 1
        params[f"conv{li}_b"] = nrm(keys[ki], (cout,)); ki += 1
        params[f"bn{li}_gamma"] = 1.0 + nrm(keys[ki], (cout,)); ki += 1
        params[f"bn{li}_beta"] = nrm(keys[ki], (cout,)); ki += 1
        params[f"bn{li}_mean"] = jnp.zeros((cout,), jnp.float32)   # running stats
        params[f"bn{li}_var"] = jnp.ones((cout,), jnp.float32)
    H4, W4 = (H // 2) // 2, (W // 2) // 2
    conv_out = 48 * H4 * W4
    # fc1 weight (in, out): generated in torch's (C,H,W) flatten row order and
    # permuted ONCE to the kernel's (H,W,C) flatten order, so the forward pass
    # needs no feature-map transpose before the flatten.
    fc1_chw = nrm(keys[ki], (conv_out, 256)); ki += 1
    params["fc1_w"] = (fc1_chw.reshape(48, H4, W4, 256)
                       .transpose(1, 2, 0, 3).reshape(conv_out, 256))
    params["fc1_b"] = nrm(keys[ki], (256,)); ki += 1
    for name, fin, fout in [("fc2", 256, 128), ("mean_head", 128, 2),
                            ("log_std_head", 128, 2)]:
        params[f"{name}_w"] = nrm(keys[ki], (fin, fout)); ki += 1
        params[f"{name}_b"] = nrm(keys[ki], (fout,)); ki += 1
    return params


# ---------------------------------------------------------------------------
# Forward pass (== PolicyNetwork.forward, eval-mode BatchNorm)
# ---------------------------------------------------------------------------
def policy_forward(params, state_nchw):
    B = state_nchw.shape[0]
    x = jnp.transpose(state_nchw, (0, 2, 3, 1))  # NCHW -> NHWC (Cin=1: free)

    x = conv3x3_bn_relu(x, params["conv1_w"], params["conv1_b"],
                        params["bn1_gamma"], params["bn1_beta"],
                        params["bn1_mean"], params["bn1_var"])
    x = maxpool2x2(x)
    x = conv3x3_bn_relu(x, params["conv2_w"], params["conv2_b"],
                        params["bn2_gamma"], params["bn2_beta"],
                        params["bn2_mean"], params["bn2_var"])
    x = maxpool2x2(x)
    x = conv3x3_bn_relu(x, params["conv3_w"], params["conv3_b"],
                        params["bn3_gamma"], params["bn3_beta"],
                        params["bn3_mean"], params["bn3_var"])

    # Direct (H, W, C) flatten; fc1_w rows were pre-permuted to match, so the
    # NHWC->NCHW transpose of the feature map is not needed.
    x = x.reshape(B, -1)

    # Fuse the two (128, 2) heads into one (128, 4) GEMM; clamp fused in-kernel.
    wh = jnp.concatenate([params["mean_head_w"], params["log_std_head_w"]], axis=1)
    bh = jnp.concatenate([params["mean_head_b"], params["log_std_head_b"]], axis=0)
    out = fc_tail(x, params["fc1_w"], params["fc1_b"],
                  params["fc2_w"], params["fc2_b"], wh, bh)
    mean = out[:, 0:2]
    log_std = out[:, 2:4]
    return mean, log_std


if __name__ == "__main__":
    key = jax.random.PRNGKey(0)
    pkey, xkey = jax.random.split(key)

    B, H, W = 2, 16, 16                       # small shapes; module default is 70x70
    params = init_params(pkey, H, W)
    state = jax.random.normal(xkey, (B, 1, H, W), dtype=jnp.float32)  # NCHW like torch

    forward = jax.jit(policy_forward)
    mean, log_std = forward(params, state)
    jax.block_until_ready((mean, log_std))

    assert mean.shape == (B, 2) and log_std.shape == (B, 2)
    assert bool(jnp.all(log_std >= LOG_STD_MIN)) and bool(jnp.all(log_std <= LOG_STD_MAX))
    assert bool(jnp.all(jnp.isfinite(mean)))
    print("KERNEL_OK")
</pallas_src>

<mosaic_0001>
module attributes {stable_mosaic.version = 11 : i64} {
  func.func @kernel(%arg0: i32, %arg1: memref<1x342x1xf32, #tpu.memory_space<vmem>>, %arg2: memref<9x1x16xbf16, #tpu.memory_space<vmem>>, %arg3: memref<1x16xf32, #tpu.memory_space<vmem>>, %arg4: memref<1x16xf32, #tpu.memory_space<vmem>>, %arg5: memref<1x288x16xbf16, #tpu.memory_space<vmem>>) attributes {dimension_semantics = [#tpu.dimension_semantics<parallel>], iteration_bounds = array<i64: 2>, scalar_prefetch = 0 : i64, scratch_operands = 0 : i64, tpu.core_type = #tpu.core_type<tc>, window_params = [{transform_indices = @transform_0, window_bounds = array<i64: 1, 342, 1>}, {pipeline_mode = #tpu.pipeline_mode<synchronous>, transform_indices = @transform_1, window_bounds = array<i64: 9, 1, 16>}, {pipeline_mode = #tpu.pipeline_mode<synchronous>, transform_indices = @transform_2, window_bounds = array<i64: 1, 16>}, {pipeline_mode = #tpu.pipeline_mode<synchronous>, transform_indices = @transform_3, window_bounds = array<i64: 1, 16>}, {transform_indices = @transform_4, window_bounds = array<i64: 1, 288, 16>}]} {
    %cst = arith.constant 0.000000e+00 : f32
    %0 = vector.broadcast %cst : f32 to vector<288x16xf32>
    %c0 = arith.constant 0 : index
    %c0_0 = arith.constant 0 : index
    %c0_1 = arith.constant 0 : index
    %1 = vector.load %arg1[%c0, %c0_0, %c0_1] : memref<1x342x1xf32, #tpu.memory_space<vmem>>, vector<1x288x1xf32>
    %2 = vector.shape_cast %1 : vector<1x288x1xf32> to vector<288x1xf32>
    %c0_2 = arith.constant 0 : index
    %c0_3 = arith.constant 0 : index
    %c0_4 = arith.constant 0 : index
    %3 = vector.load %arg2[%c0_2, %c0_3, %c0_4] : memref<9x1x16xbf16, #tpu.memory_space<vmem>>, vector<1x1x16xbf16>
    %4 = vector.shape_cast %3 : vector<1x1x16xbf16> to vector<1x16xbf16>
    %5 = arith.extf %4 : vector<1x16xbf16> to vector<1x16xf32>
    %6 = vector.broadcast %2 : vector<288x1xf32> to vector<288x16xf32>
    %7 = vector.broadcast %5 : vector<1x16xf32> to vector<288x16xf32>
    %8 = arith.mulf %6, %7 : vector<288x16xf32>
    %9 = arith.addf %0, %8 : vector<288x16xf32>
    %c0_5 = arith.constant 0 : index
    %c1 = arith.constant 1 : index
    %c0_6 = arith.constant 0 : index
    %10 = vector.load %arg1[%c0_5, %c1, %c0_6] : memref<1x342x1xf32, #tpu.memory_space<vmem>>, vector<1x288x1xf32>
    %11 = vector.shape_cast %10 : vector<1x288x1xf32> to vector<288x1xf32>
    %c1_7 = arith.constant 1 : index
    %c0_8 = arith.constant 0 : index
    %c0_9 = arith.constant 0 : index
    %12 = vector.load %arg2[%c1_7, %c0_8, %c0_9] : memref<9x1x16xbf16, #tpu.memory_space<vmem>>, vector<1x1x16xbf16>
    %13 = vector.shape_cast %12 : vector<1x1x16xbf16> to vector<1x16xbf16>
    %14 = arith.extf %13 : vector<1x16xbf16> to vector<1x16xf32>
    %15 = vector.broadcast %11 : vector<288x1xf32> to vector<288x16xf32>
    %16 = vector.broadcast %14 : vector<1x16xf32> to vector<288x16xf32>
    %17 = arith.mulf %15, %16 : vector<288x16xf32>
    %18 = arith.addf %9, %17 : vector<288x16xf32>
    %c0_10 = arith.constant 0 : index
    %c2 = arith.constant 2 : index
    %c0_11 = arith.constant 0 : index
    %19 = vector.load %arg1[%c0_10, %c2, %c0_11] : memref<1x342x1xf32, #tpu.memory_space<vmem>>, vector<1x288x1xf32>
    %20 = vector.shape_cast %19 : vector<1x288x1xf32> to vector<288x1xf32>
    %c2_12 = arith.constant 2 : index
    %c0_13 = arith.constant 0 : index
    %c0_14 = arith.constant 0 : index
    %21 = vector.load %arg2[%c2_12, %c0_13, %c0_14] : memref<9x1x16xbf16, #tpu.memory_space<vmem>>, vector<1x1x16xbf16>
    %22 = vector.shape_cast %21 : vector<1x1x16xbf16> to vector<1x16xbf16>
    %23 = arith.extf %22 : vector<1x16xbf16> to vector<1x16xf32>
    %24 = vector.broadcast %20 : vector<288x1xf32> to vector<288x16xf32>
    %25 = vector.broadcast %23 : vector<1x16xf32> to vector<288x16xf32>
    %26 = arith.mulf %24, %25 : vector<288x16xf32>
    %27 = arith.addf %18, %26 : vector<288x16xf32>
    %c0_15 = arith.constant 0 : index
    %c18 = arith.constant 18 : index
    %c0_16 = arith.constant 0 : index
    %28 = vector.load %arg1[%c0_15, %c18, %c0_16] : memref<1x342x1xf32, #tpu.memory_space<vmem>>, vector<1x288x1xf32>
    %29 = vector.shape_cast %28 : vector<1x288x1xf32> to vector<288x1xf32>
    %c3 = arith.constant 3 : index
    %c0_17 = arith.constant 0 : index
    %c0_18 = arith.constant 0 : index
    %30 = vector.load %arg2[%c3, %c0_17, %c0_18] : memref<9x1x16xbf16, #tpu.memory_space<vmem>>, vector<1x1x16xbf16>
    %31 = vector.shape_cast %30 : vector<1x1x16xbf16> to vector<1x16xbf16>
    %32 = arith.extf %31 : vector<1x16xbf16> to vector<1x16xf32>
    %33 = vector.broadcast %29 : vector<288x1xf32> to vector<288x16xf32>
    %34 = vector.broadcast %32 : vector<1x16xf32> to vector<288x16xf32>
    %35 = arith.mulf %33, %34 : vector<288x16xf32>
    %36 = arith.addf %27, %35 : vector<288x16xf32>
    %c0_19 = arith.constant 0 : index
    %c19 = arith.constant 19 : index
    %c0_20 = arith.constant 0 : index
    %37 = vector.load %arg1[%c0_19, %c19, %c0_20] : memref<1x342x1xf32, #tpu.memory_space<vmem>>, vector<1x288x1xf32>
    %38 = vector.shape_cast %37 : vector<1x288x1xf32> to vector<288x1xf32>
    %c4 = arith.constant 4 : index
    %c0_21 = arith.constant 0 : index
    %c0_22 = arith.constant 0 : index
    %39 = vector.load %arg2[%c4, %c0_21, %c0_22] : memref<9x1x16xbf16, #tpu.memory_space<vmem>>, vector<1x1x16xbf16>
    %40 = vector.shape_cast %39 : vector<1x1x16xbf16> to vector<1x16xbf16>
    %41 = arith.extf %40 : vector<1x16xbf16> to vector<1x16xf32>
    %42 = vector.broadcast %38 : vector<288x1xf32> to vector<288x16xf32>
    %43 = vector.broadcast %41 : vector<1x16xf32> to vector<288x16xf32>
    %44 = arith.mulf %42, %43 : vector<288x16xf32>
    %45 = arith.addf %36, %44 : vector<288x16xf32>
    %c0_23 = arith.constant 0 : index
    %c20 = arith.constant 20 : index
    %c0_24 = arith.constant 0 : index
    %46 = vector.load %arg1[%c0_23, %c20, %c0_24] : memref<1x342x1xf32, #tpu.memory_space<vmem>>, vector<1x288x1xf32>
    %47 = vector.shape_cast %46 : vector<1x288x1xf32> to vector<288x1xf32>
    %c5 = arith.constant 5 : index
    %c0_25 = arith.constant 0 : index
    %c0_26 = arith.constant 0 : index
    %48 = vector.load %arg2[%c5, %c0_25, %c0_26] : memref<9x1x16xbf16, #tpu.memory_space<vmem>>, vector<1x1x16xbf16>
    %49 = vector.shape_cast %48 : vector<1x1x16xbf16> to vector<1x16xbf16>
    %50 = arith.extf %49 : vector<1x16xbf16> to vector<1x16xf32>
    %51 = vector.broadcast %47 : vector<288x1xf32> to vector<288x16xf32>
    %52 = vector.broadcast %50 : vector<1x16xf32> to vector<288x16xf32>
    %53 = arith.mulf %51, %52 : vector<288x16xf32>
    %54 = arith.addf %45, %53 : vector<288x16xf32>
    %c0_27 = arith.constant 0 : index
    %c36 = arith.constant 36 : index
    %c0_28 = arith.constant 0 : index
    %55 = vector.load %arg1[%c0_27, %c36, %c0_28] : memref<1x342x1xf32, #tpu.memory_space<vmem>>, vector<1x288x1xf32>
    %56 = vector.shape_cast %55 : vector<1x288x1xf32> to vector<288x1xf32>
    %c6 = arith.constant 6 : index
    %c0_29 = arith.constant 0 : index
    %c0_30 = arith.constant 0 : index
    %57 = vector.load %arg2[%c6, %c0_29, %c0_30] : memref<9x1x16xbf16, #tpu.memory_space<vmem>>, vector<1x1x16xbf16>
    %58 = vector.shape_cast %57 : vector<1x1x16xbf16> to vector<1x16xbf16>
    %59 = arith.extf %58 : vector<1x16xbf16> to vector<1x16xf32>
    %60 = vector.broadcast %56 : vector<288x1xf32> to vector<288x16xf32>
    %61 = vector.broadcast %59 : vector<1x16xf32> to vector<288x16xf32>
    %62 = arith.mulf %60, %61 : vector<288x16xf32>
    %63 = arith.addf %54, %62 : vector<288x16xf32>
    %c0_31 = arith.constant 0 : index
    %c37 = arith.constant 37 : index
    %c0_32 = arith.constant 0 : index
    %64 = vector.load %arg1[%c0_31, %c37, %c0_32] : memref<1x342x1xf32, #tpu.memory_space<vmem>>, vector<1x288x1xf32>
    %65 = vector.shape_cast %64 : vector<1x288x1xf32> to vector<288x1xf32>
    %c7 = arith.constant 7 : index
    %c0_33 = arith.constant 0 : index
    %c0_34 = arith.constant 0 : index
    %66 = vector.load %arg2[%c7, %c0_33, %c0_34] : memref<9x1x16xbf16, #tpu.memory_space<vmem>>, vector<1x1x16xbf16>
    %67 = vector.shape_cast %66 : vector<1x1x16xbf16> to vector<1x16xbf16>
    %68 = arith.extf %67 : vector<1x16xbf16> to vector<1x16xf32>
    %69 = vector.broadcast %65 : vector<288x1xf32> to vector<288x16xf32>
    %70 = vector.broadcast %68 : vector<1x16xf32> to vector<288x16xf32>
    %71 = arith.mulf %69, %70 : vector<288x16xf32>
    %72 = arith.addf %63, %71 : vector<288x16xf32>
    %c0_35 = arith.constant 0 : index
    %c38 = arith.constant 38 : index
    %c0_36 = arith.constant 0 : index
    %73 = vector.load %arg1[%c0_35, %c38, %c0_36] : memref<1x342x1xf32, #tpu.memory_space<vmem>>, vector<1x288x1xf32>
    %74 = vector.shape_cast %73 : vector<1x288x1xf32> to vector<288x1xf32>
    %c8 = arith.constant 8 : index
    %c0_37 = arith.constant 0 : index
    %c0_38 = arith.constant 0 : index
    %75 = vector.load %arg2[%c8, %c0_37, %c0_38] : memref<9x1x16xbf16, #tpu.memory_space<vmem>>, vector<1x1x16xbf16>
    %76 = vector.shape_cast %75 : vector<1x1x16xbf16> to vector<1x16xbf16>
    %77 = arith.extf %76 : vector<1x16xbf16> to vector<1x16xf32>
    %78 = vector.broadcast %74 : vector<288x1xf32> to vector<288x16xf32>
    %79 = vector.broadcast %77 : vector<1x16xf32> to vector<288x16xf32>
    %80 = arith.mulf %78, %79 : vector<288x16xf32>
    %81 = arith.addf %72, %80 : vector<288x16xf32>
    %c0_39 = arith.constant 0 : index
    %c0_40 = arith.constant 0 : index
    %82 = vector.load %arg3[%c0_39, %c0_40] : memref<1x16xf32, #tpu.memory_space<vmem>>, vector<1x16xf32>
    %83 = vector.broadcast %82 : vector<1x16xf32> to vector<288x16xf32>
    %84 = arith.mulf %81, %83 : vector<288x16xf32>
    %c0_41 = arith.constant 0 : index
    %c0_42 = arith.constant 0 : index
    %85 = vector.load %arg4[%c0_41, %c0_42] : memref<1x16xf32, #tpu.memory_space<vmem>>, vector<1x16xf32>
    %86 = vector.broadcast %85 : vector<1x16xf32> to vector<288x16xf32>
    %87 = arith.addf %84, %86 : vector<288x16xf32>
    %cst_43 = arith.constant 0.000000e+00 : f32
    %88 = vector.broadcast %cst_43 : f32 to vector<288x16xf32>
    %89 = arith.maximumf %87, %88 : vector<288x16xf32>
    %90 = arith.truncf %89 : vector<288x16xf32> to vector<288x16xbf16>
    %c0_44 = arith.constant 0 : index
    %c0_45 = arith.constant 0 : index
    %c0_46 = arith.constant 0 : index
    %91 = vector.load %arg5[%c0_44, %c0_45, %c0_46] : memref<1x288x16xbf16, #tpu.memory_space<vmem>>, vector<1x288x16xbf16>
    %92 = vector.shape_cast %91 : vector<1x288x16xbf16> to vector<288x16xbf16>
    %93 = vector.shape_cast %90 : vector<288x16xbf16> to vector<1x288x16xbf16>
    tpu.vector_store %arg5[%c0_44, %c0_45, %c0_46], %93 {strides = array<i32>} : memref<1x288x16xbf16, #tpu.memory_space<vmem>>, vector<1x288x16xbf16>,
    return
  }
  func.func @transform_0(%arg0: i32) -> (i32, i32, i32) {
    %c0_i32 = arith.constant 0 : i32
    %c0_i32_0 = arith.constant 0 : i32
    %c0_i32_1 = arith.constant 0 : i32
    return %arg0, %c0_i32, %c0_i32_0 : i32, i32, i32
  }
  func.func @transform_1(%arg0: i32) -> (i32, i32, i32) {
    %c0_i32 = arith.constant 0 : i32
    %c0_i32_0 = arith.constant 0 : i32
    %c0_i32_1 = arith.constant 0 : i32
    %c0_i32_2 = arith.constant 0 : i32
    return %c0_i32, %c0_i32_0, %c0_i32_1 : i32, i32, i32
  }
  func.func @transform_2(%arg0: i32) -> (i32, i32) {
    %c0_i32 = arith.constant 0 : i32
    %c0_i32_0 = arith.constant 0 : i32
    %c0_i32_1 = arith.constant 0 : i32
    return %c0_i32, %c0_i32_0 : i32, i32
  }
  func.func @transform_3(%arg0: i32) -> (i32, i32) {
    %c0_i32 = arith.constant 0 : i32
    %c0_i32_0 = arith.constant 0 : i32
    %c0_i32_1 = arith.constant 0 : i32
    return %c0_i32, %c0_i32_0 : i32, i32
  }
  func.func @transform_4(%arg0: i32) -> (i32, i32, i32) {
    %c0_i32 = arith.constant 0 : i32
    %c0_i32_0 = arith.constant 0 : i32
    %c0_i32_1 = arith.constant 0 : i32
    return %arg0, %c0_i32, %c0_i32_0 : i32, i32, i32
  }
}

module attributes {stable_mosaic.version = 11 : i64} {
  func.func @kernel(%arg0: i32, %arg1: memref<1x110x16xf32, #tpu.memory_space<vmem>>, %arg2: memref<9x16x32xbf16, #tpu.memory_space<vmem>>, %arg3: memref<1x32xf32, #tpu.memory_space<vmem>>, %arg4: memref<1x32xf32, #tpu.memory_space<vmem>>, %arg5: memref<1x80x32xbf16, #tpu.memory_space<vmem>>) attributes {dimension_semantics = [#tpu.dimension_semantics<parallel>], iteration_bounds = array<i64: 2>, scalar_prefetch = 0 : i64, scratch_operands = 0 : i64, tpu.core_type = #tpu.core_type<tc>, window_params = [{transform_indices = @transform_0, window_bounds = array<i64: 1, 110, 16>}, {pipeline_mode = #tpu.pipeline_mode<synchronous>, transform_indices = @transform_1, window_bounds = array<i64: 9, 16, 32>}, {pipeline_mode = #tpu.pipeline_mode<synchronous>, transform_indices = @transform_2, window_bounds = array<i64: 1, 32>}, {pipeline_mode = #tpu.pipeline_mode<synchronous>, transform_indices = @transform_3, window_bounds = array<i64: 1, 32>}, {transform_indices = @transform_4, window_bounds = array<i64: 1, 80, 32>}]} {
    %cst = arith.constant 0.000000e+00 : f32
    %0 = vector.broadcast %cst : f32 to vector<80x32xf32>
    %c0 = arith.constant 0 : index
    %c0_0 = arith.constant 0 : index
    %c0_1 = arith.constant 0 : index
    %1 = vector.load %arg1[%c0, %c0_0, %c0_1] : memref<1x110x16xf32, #tpu.memory_space<vmem>>, vector<1x80x16xf32>
    %2 = vector.shape_cast %1 : vector<1x80x16xf32> to vector<80x16xf32>
    %3 = arith.truncf %2 : vector<80x16xf32> to vector<80x16xbf16>
    %c0_2 = arith.constant 0 : index
    %c0_3 = arith.constant 0 : index
    %c0_4 = arith.constant 0 : index
    %4 = vector.load %arg2[%c0_2, %c0_3, %c0_4] : memref<9x16x32xbf16, #tpu.memory_space<vmem>>, vector<1x16x32xbf16>
    %5 = vector.shape_cast %4 : vector<1x16x32xbf16> to vector<16x32xbf16>
    %cst_5 = arith.constant dense<0.000000e+00> : vector<80x32xf32>
    %6 = tpu.matmul %3, %5, %cst_5 {dimension_numbers = #tpu.dot_dimension_numbers<[1], [0], [0], [1], [0, 0, 1, 1], [], []>} : vector<80x16xbf16>, vector<16x32xbf16>, vector<80x32xf32> -> vector<80x32xf32>
    %7 = arith.addf %0, %6 : vector<80x32xf32>
    %c0_6 = arith.constant 0 : index
    %c1 = arith.constant 1 : index
    %c0_7 = arith.constant 0 : index
    %8 = vector.load %arg1[%c0_6, %c1, %c0_7] : memref<1x110x16xf32, #tpu.memory_space<vmem>>, vector<1x80x16xf32>
    %9 = vector.shape_cast %8 : vector<1x80x16xf32> to vector<80x16xf32>
    %10 = arith.truncf %9 : vector<80x16xf32> to vector<80x16xbf16>
    %c1_8 = arith.constant 1 : index
    %c0_9 = arith.constant 0 : index
    %c0_10 = arith.constant 0 : index
    %11 = vector.load %arg2[%c1_8, %c0_9, %c0_10] : memref<9x16x32xbf16, #tpu.memory_space<vmem>>, vector<1x16x32xbf16>
    %12 = vector.shape_cast %11 : vector<1x16x32xbf16> to vector<16x32xbf16>
    %cst_11 = arith.constant dense<0.000000e+00> : vector<80x32xf32>
    %13 = tpu.matmul %10, %12, %cst_11 {dimension_numbers = #tpu.dot_dimension_numbers<[1], [0], [0], [1], [0, 0, 1, 1], [], []>} : vector<80x16xbf16>, vector<16x32xbf16>, vector<80x32xf32> -> vector<80x32xf32>
    %14 = arith.addf %7, %13 : vector<80x32xf32>
    %c0_12 = arith.constant 0 : index
    %c2 = arith.constant 2 : index
    %c0_13 = arith.constant 0 : index
    %15 = vector.load %arg1[%c0_12, %c2, %c0_13] : memref<1x110x16xf32, #tpu.memory_space<vmem>>, vector<1x80x16xf32>
    %16 = vector.shape_cast %15 : vector<1x80x16xf32> to vector<80x16xf32>
    %17 = arith.truncf %16 : vector<80x16xf32> to vector<80x16xbf16>
    %c2_14 = arith.constant 2 : index
    %c0_15 = arith.constant 0 : index
    %c0_16 = arith.constant 0 : index
    %18 = vector.load %arg2[%c2_14, %c0_15, %c0_16] : memref<9x16x32xbf16, #tpu.memory_space<vmem>>, vector<1x16x32xbf16>
    %19 = vector.shape_cast %18 : vector<1x16x32xbf16> to vector<16x32xbf16>
    %cst_17 = arith.constant dense<0.000000e+00> : vector<80x32xf32>
    %20 = tpu.matmul %17, %19, %cst_17 {dimension_numbers = #tpu.dot_dimension_numbers<[1], [0], [0], [1], [0, 0, 1, 1], [], []>} : vector<80x16xbf16>, vector<16x32xbf16>, vector<80x32xf32> -> vector<80x32xf32>
    %21 = arith.addf %14, %20 : vector<80x32xf32>
    %c0_18 = arith.constant 0 : index
    %c10 = arith.constant 10 : index
    %c0_19 = arith.constant 0 : index
    %22 = vector.load %arg1[%c0_18, %c10, %c0_19] : memref<1x110x16xf32, #tpu.memory_space<vmem>>, vector<1x80x16xf32>
    %23 = vector.shape_cast %22 : vector<1x80x16xf32> to vector<80x16xf32>
    %24 = arith.truncf %23 : vector<80x16xf32> to vector<80x16xbf16>
    %c3 = arith.constant 3 : index
    %c0_20 = arith.constant 0 : index
    %c0_21 = arith.constant 0 : index
    %25 = vector.load %arg2[%c3, %c0_20, %c0_21] : memref<9x16x32xbf16, #tpu.memory_space<vmem>>, vector<1x16x32xbf16>
    %26 = vector.shape_cast %25 : vector<1x16x32xbf16> to vector<16x32xbf16>
    %cst_22 = arith.constant dense<0.000000e+00> : vector<80x32xf32>
    %27 = tpu.matmul %24, %26, %cst_22 {dimension_numbers = #tpu.dot_dimension_numbers<[1], [0], [0], [1], [0, 0, 1, 1], [], []>} : vector<80x16xbf16>, vector<16x32xbf16>, vector<80x32xf32> -> vector<80x32xf32>
    %28 = arith.addf %21, %27 : vector<80x32xf32>
    %c0_23 = arith.constant 0 : index
    %c11 = arith.constant 11 : index
    %c0_24 = arith.constant 0 : index
    %29 = vector.load %arg1[%c0_23, %c11, %c0_24] : memref<1x110x16xf32, #tpu.memory_space<vmem>>, vector<1x80x16xf32>
    %30 = vector.shape_cast %29 : vector<1x80x16xf32> to vector<80x16xf32>
    %31 = arith.truncf %30 : vector<80x16xf32> to vector<80x16xbf16>
    %c4 = arith.constant 4 : index
    %c0_25 = arith.constant 0 : index
    %c0_26 = arith.constant 0 : index
    %32 = vector.load %arg2[%c4, %c0_25, %c0_26] : memref<9x16x32xbf16, #tpu.memory_space<vmem>>, vector<1x16x32xbf16>
    %33 = vector.shape_cast %32 : vector<1x16x32xbf16> to vector<16x32xbf16>
    %cst_27 = arith.constant dense<0.000000e+00> : vector<80x32xf32>
    %34 = tpu.matmul %31, %33, %cst_27 {dimension_numbers = #tpu.dot_dimension_numbers<[1], [0], [0], [1], [0, 0, 1, 1], [], []>} : vector<80x16xbf16>, vector<16x32xbf16>, vector<80x32xf32> -> vector<80x32xf32>
    %35 = arith.addf %28, %34 : vector<80x32xf32>
    %c0_28 = arith.constant 0 : index
    %c12 = arith.constant 12 : index
    %c0_29 = arith.constant 0 : index
    %36 = vector.load %arg1[%c0_28, %c12, %c0_29] : memref<1x110x16xf32, #tpu.memory_space<vmem>>, vector<1x80x16xf32>
    %37 = vector.shape_cast %36 : vector<1x80x16xf32> to vector<80x16xf32>
    %38 = arith.truncf %37 : vector<80x16xf32> to vector<80x16xbf16>
    %c5 = arith.constant 5 : index
    %c0_30 = arith.constant 0 : index
    %c0_31 = arith.constant 0 : index
    %39 = vector.load %arg2[%c5, %c0_30, %c0_31] : memref<9x16x32xbf16, #tpu.memory_space<vmem>>, vector<1x16x32xbf16>
    %40 = vector.shape_cast %39 : vector<1x16x32xbf16> to vector<16x32xbf16>
    %cst_32 = arith.constant dense<0.000000e+00> : vector<80x32xf32>
    %41 = tpu.matmul %38, %40, %cst_32 {dimension_numbers = #tpu.dot_dimension_numbers<[1], [0], [0], [1], [0, 0, 1, 1], [], []>} : vector<80x16xbf16>, vector<16x32xbf16>, vector<80x32xf32> -> vector<80x32xf32>
    %42 = arith.addf %35, %41 : vector<80x32xf32>
    %c0_33 = arith.constant 0 : index
    %c20 = arith.constant 20 : index
    %c0_34 = arith.constant 0 : index
    %43 = vector.load %arg1[%c0_33, %c20, %c0_34] : memref<1x110x16xf32, #tpu.memory_space<vmem>>, vector<1x80x16xf32>
    %44 = vector.shape_cast %43 : vector<1x80x16xf32> to vector<80x16xf32>
    %45 = arith.truncf %44 : vector<80x16xf32> to vector<80x16xbf16>
    %c6 = arith.constant 6 : index
    %c0_35 = arith.constant 0 : index
    %c0_36 = arith.constant 0 : index
    %46 = vector.load %arg2[%c6, %c0_35, %c0_36] : memref<9x16x32xbf16, #tpu.memory_space<vmem>>, vector<1x16x32xbf16>
    %47 = vector.shape_cast %46 : vector<1x16x32xbf16> to vector<16x32xbf16>
    %cst_37 = arith.constant dense<0.000000e+00> : vector<80x32xf32>
    %48 = tpu.matmul %45, %47, %cst_37 {dimension_numbers = #tpu.dot_dimension_numbers<[1], [0], [0], [1], [0, 0, 1, 1], [], []>} : vector<80x16xbf16>, vector<16x32xbf16>, vector<80x32xf32> -> vector<80x32xf32>
    %49 = arith.addf %42, %48 : vector<80x32xf32>
    %c0_38 = arith.constant 0 : index
    %c21 = arith.constant 21 : index
    %c0_39 = arith.constant 0 : index
    %50 = vector.load %arg1[%c0_38, %c21, %c0_39] : memref<1x110x16xf32, #tpu.memory_space<vmem>>, vector<1x80x16xf32>
    %51 = vector.shape_cast %50 : vector<1x80x16xf32> to vector<80x16xf32>
    %52 = arith.truncf %51 : vector<80x16xf32> to vector<80x16xbf16>
    %c7 = arith.constant 7 : index
    %c0_40 = arith.constant 0 : index
    %c0_41 = arith.constant 0 : index
    %53 = vector.load %arg2[%c7, %c0_40, %c0_41] : memref<9x16x32xbf16, #tpu.memory_space<vmem>>, vector<1x16x32xbf16>
    %54 = vector.shape_cast %53 : vector<1x16x32xbf16> to vector<16x32xbf16>
    %cst_42 = arith.constant dense<0.000000e+00> : vector<80x32xf32>
    %55 = tpu.matmul %52, %54, %cst_42 {dimension_numbers = #tpu.dot_dimension_numbers<[1], [0], [0], [1], [0, 0, 1, 1], [], []>} : vector<80x16xbf16>, vector<16x32xbf16>, vector<80x32xf32> -> vector<80x32xf32>
    %56 = arith.addf %49, %55 : vector<80x32xf32>
    %c0_43 = arith.constant 0 : index
    %c22 = arith.constant 22 : index
    %c0_44 = arith.constant 0 : index
    %57 = vector.load %arg1[%c0_43, %c22, %c0_44] : memref<1x110x16xf32, #tpu.memory_space<vmem>>, vector<1x80x16xf32>
    %58 = vector.shape_cast %57 : vector<1x80x16xf32> to vector<80x16xf32>
    %59 = arith.truncf %58 : vector<80x16xf32> to vector<80x16xbf16>
    %c8 = arith.constant 8 : index
    %c0_45 = arith.constant 0 : index
    %c0_46 = arith.constant 0 : index
    %60 = vector.load %arg2[%c8, %c0_45, %c0_46] : memref<9x16x32xbf16, #tpu.memory_space<vmem>>, vector<1x16x32xbf16>
    %61 = vector.shape_cast %60 : vector<1x16x32xbf16> to vector<16x32xbf16>
    %cst_47 = arith.constant dense<0.000000e+00> : vector<80x32xf32>
    %62 = tpu.matmul %59, %61, %cst_47 {dimension_numbers = #tpu.dot_dimension_numbers<[1], [0], [0], [1], [0, 0, 1, 1], [], []>} : vector<80x16xbf16>, vector<16x32xbf16>, vector<80x32xf32> -> vector<80x32xf32>
    %63 = arith.addf %56, %62 : vector<80x32xf32>
    %c0_48 = arith.constant 0 : index
    %c0_49 = arith.constant 0 : index
    %64 = vector.load %arg3[%c0_48, %c0_49] : memref<1x32xf32, #tpu.memory_space<vmem>>, vector<1x32xf32>
    %65 = vector.broadcast %64 : vector<1x32xf32> to vector<80x32xf32>
    %66 = arith.mulf %63, %65 : vector<80x32xf32>
    %c0_50 = arith.constant 0 : index
    %c0_51 = arith.constant 0 : index
    %67 = vector.load %arg4[%c0_50, %c0_51] : memref<1x32xf32, #tpu.memory_space<vmem>>, vector<1x32xf32>
    %68 = vector.broadcast %67 : vector<1x32xf32> to vector<80x32xf32>
    %69 = arith.addf %66, %68 : vector<80x32xf32>
    %cst_52 = arith.constant 0.000000e+00 : f32
    %70 = vector.broadcast %cst_52 : f32 to vector<80x32xf32>
    %71 = arith.maximumf %69, %70 : vector<80x32xf32>
    %72 = arith.truncf %71 : vector<80x32xf32> to vector<80x32xbf16>
    %c0_53 = arith.constant 0 : index
    %c0_54 = arith.constant 0 : index
    %c0_55 = arith.constant 0 : index
    %73 = vector.load %arg5[%c0_53, %c0_54, %c0_55] : memref<1x80x32xbf16, #tpu.memory_space<vmem>>, vector<1x80x32xbf16>
    %74 = vector.shape_cast %73 : vector<1x80x32xbf16> to vector<80x32xbf16>
    %75 = vector.shape_cast %72 : vector<80x32xbf16> to vector<1x80x32xbf16>
    tpu.vector_store %arg5[%c0_53, %c0_54, %c0_55], %75 {strides = array<i32>} : memref<1x80x32xbf16, #tpu.memory_space<vmem>>, vector<1x80x32xbf16>,
    return
  }
  func.func @transform_0(%arg0: i32) -> (i32, i32, i32) {
    %c0_i32 = arith.constant 0 : i32
    %c0_i32_0 = arith.constant 0 : i32
    %c0_i32_1 = arith.constant 0 : i32
    return %arg0, %c0_i32, %c0_i32_0 : i32, i32, i32
  }
  func.func @transform_1(%arg0: i32) -> (i32, i32, i32) {
    %c0_i32 = arith.constant 0 : i32
    %c0_i32_0 = arith.constant 0 : i32
    %c0_i32_1 = arith.constant 0 : i32
    %c0_i32_2 = arith.constant 0 : i32
    return %c0_i32, %c0_i32_0, %c0_i32_1 : i32, i32, i32
  }
  func.func @transform_2(%arg0: i32) -> (i32, i32) {
    %c0_i32 = arith.constant 0 : i32
    %c0_i32_0 = arith.constant 0 : i32
    %c0_i32_1 = arith.constant 0 : i32
    return %c0_i32, %c0_i32_0 : i32, i32
  }
  func.func @transform_3(%arg0: i32) -> (i32, i32) {
    %c0_i32 = arith.constant 0 : i32
    %c0_i32_0 = arith.constant 0 : i32
    %c0_i32_1 = arith.constant 0 : i32
    return %c0_i32, %c0_i32_0 : i32, i32
  }
  func.func @transform_4(%arg0: i32) -> (i32, i32, i32) {
    %c0_i32 = arith.constant 0 : i32
    %c0_i32_0 = arith.constant 0 : i32
    %c0_i32_1 = arith.constant 0 : i32
    return %arg0, %c0_i32, %c0_i32_0 : i32, i32, i32
  }
}

module attributes {stable_mosaic.version = 11 : i64} {
  func.func @kernel(%arg0: i32, %arg1: memref<1x42x32xf32, #tpu.memory_space<vmem>>, %arg2: memref<9x32x48xbf16, #tpu.memory_space<vmem>>, %arg3: memref<1x48xf32, #tpu.memory_space<vmem>>, %arg4: memref<1x48xf32, #tpu.memory_space<vmem>>, %arg5: memref<1x24x48xbf16, #tpu.memory_space<vmem>>) attributes {dimension_semantics = [#tpu.dimension_semantics<parallel>], iteration_bounds = array<i64: 2>, scalar_prefetch = 0 : i64, scratch_operands = 0 : i64, tpu.core_type = #tpu.core_type<tc>, window_params = [{transform_indices = @transform_0, window_bounds = array<i64: 1, 42, 32>}, {pipeline_mode = #tpu.pipeline_mode<synchronous>, transform_indices = @transform_1, window_bounds = array<i64: 9, 32, 48>}, {pipeline_mode = #tpu.pipeline_mode<synchronous>, transform_indices = @transform_2, window_bounds = array<i64: 1, 48>}, {pipeline_mode = #tpu.pipeline_mode<synchronous>, transform_indices = @transform_3, window_bounds = array<i64: 1, 48>}, {transform_indices = @transform_4, window_bounds = array<i64: 1, 24, 48>}]} {
    %cst = arith.constant 0.000000e+00 : f32
    %0 = vector.broadcast %cst : f32 to vector<24x48xf32>
    %c0 = arith.constant 0 : index
    %c0_0 = arith.constant 0 : index
    %c0_1 = arith.constant 0 : index
    %1 = vector.load %arg1[%c0, %c0_0, %c0_1] : memref<1x42x32xf32, #tpu.memory_space<vmem>>, vector<1x24x32xf32>
    %2 = vector.shape_cast %1 : vector<1x24x32xf32> to vector<24x32xf32>
    %3 = arith.truncf %2 : vector<24x32xf32> to vector<24x32xbf16>
    %c0_2 = arith.constant 0 : index
    %c0_3 = arith.constant 0 : index
    %c0_4 = arith.constant 0 : index
    %4 = vector.load %arg2[%c0_2, %c0_3, %c0_4] : memref<9x32x48xbf16, #tpu.memory_space<vmem>>, vector<1x32x48xbf16>
    %5 = vector.shape_cast %4 : vector<1x32x48xbf16> to vector<32x48xbf16>
    %cst_5 = arith.constant dense<0.000000e+00> : vector<24x48xf32>
    %6 = tpu.matmul %3, %5, %cst_5 {dimension_numbers = #tpu.dot_dimension_numbers<[1], [0], [0], [1], [0, 0, 1, 1], [], []>} : vector<24x32xbf16>, vector<32x48xbf16>, vector<24x48xf32> -> vector<24x48xf32>
    %7 = arith.addf %0, %6 : vector<24x48xf32>
    %c0_6 = arith.constant 0 : index
    %c1 = arith.constant 1 : index
    %c0_7 = arith.constant 0 : index
    %8 = vector.load %arg1[%c0_6, %c1, %c0_7] : memref<1x42x32xf32, #tpu.memory_space<vmem>>, vector<1x24x32xf32>
    %9 = vector.shape_cast %8 : vector<1x24x32xf32> to vector<24x32xf32>
    %10 = arith.truncf %9 : vector<24x32xf32> to vector<24x32xbf16>
    %c1_8 = arith.constant 1 : index
    %c0_9 = arith.constant 0 : index
    %c0_10 = arith.constant 0 : index
    %11 = vector.load %arg2[%c1_8, %c0_9, %c0_10] : memref<9x32x48xbf16, #tpu.memory_space<vmem>>, vector<1x32x48xbf16>
    %12 = vector.shape_cast %11 : vector<1x32x48xbf16> to vector<32x48xbf16>
    %cst_11 = arith.constant dense<0.000000e+00> : vector<24x48xf32>
    %13 = tpu.matmul %10, %12, %cst_11 {dimension_numbers = #tpu.dot_dimension_numbers<[1], [0], [0], [1], [0, 0, 1, 1], [], []>} : vector<24x32xbf16>, vector<32x48xbf16>, vector<24x48xf32> -> vector<24x48xf32>
    %14 = arith.addf %7, %13 : vector<24x48xf32>
    %c0_12 = arith.constant 0 : index
    %c2 = arith.constant 2 : index
    %c0_13 = arith.constant 0 : index
    %15 = vector.load %arg1[%c0_12, %c2, %c0_13] : memref<1x42x32xf32, #tpu.memory_space<vmem>>, vector<1x24x32xf32>
    %16 = vector.shape_cast %15 : vector<1x24x32xf32> to vector<24x32xf32>
    %17 = arith.truncf %16 : vector<24x32xf32> to vector<24x32xbf16>
    %c2_14 = arith.constant 2 : index
    %c0_15 = arith.constant 0 : index
    %c0_16 = arith.constant 0 : index
    %18 = vector.load %arg2[%c2_14, %c0_15, %c0_16] : memref<9x32x48xbf16, #tpu.memory_space<vmem>>, vector<1x32x48xbf16>
    %19 = vector.shape_cast %18 : vector<1x32x48xbf16> to vector<32x48xbf16>
    %cst_17 = arith.constant dense<0.000000e+00> : vector<24x48xf32>
    %20 = tpu.matmul %17, %19, %cst_17 {dimension_numbers = #tpu.dot_dimension_numbers<[1], [0], [0], [1], [0, 0, 1, 1], [], []>} : vector<24x32xbf16>, vector<32x48xbf16>, vector<24x48xf32> -> vector<24x48xf32>
    %21 = arith.addf %14, %20 : vector<24x48xf32>
    %c0_18 = arith.constant 0 : index
    %c6 = arith.constant 6 : index
    %c0_19 = arith.constant 0 : index
    %22 = vector.load %arg1[%c0_18, %c6, %c0_19] : memref<1x42x32xf32, #tpu.memory_space<vmem>>, vector<1x24x32xf32>
    %23 = vector.shape_cast %22 : vector<1x24x32xf32> to vector<24x32xf32>
    %24 = arith.truncf %23 : vector<24x32xf32> to vector<24x32xbf16>
    %c3 = arith.constant 3 : index
    %c0_20 = arith.constant 0 : index
    %c0_21 = arith.constant 0 : index
    %25 = vector.load %arg2[%c3, %c0_20, %c0_21] : memref<9x32x48xbf16, #tpu.memory_space<vmem>>, vector<1x32x48xbf16>
    %26 = vector.shape_cast %25 : vector<1x32x48xbf16> to vector<32x48xbf16>
    %cst_22 = arith.constant dense<0.000000e+00> : vector<24x48xf32>
    %27 = tpu.matmul %24, %26, %cst_22 {dimension_numbers = #tpu.dot_dimension_numbers<[1], [0], [0], [1], [0, 0, 1, 1], [], []>} : vector<24x32xbf16>, vector<32x48xbf16>, vector<24x48xf32> -> vector<24x48xf32>
    %28 = arith.addf %21, %27 : vector<24x48xf32>
    %c0_23 = arith.constant 0 : index
    %c7 = arith.constant 7 : index
    %c0_24 = arith.constant 0 : index
    %29 = vector.load %arg1[%c0_23, %c7, %c0_24] : memref<1x42x32xf32, #tpu.memory_space<vmem>>, vector<1x24x32xf32>
    %30 = vector.shape_cast %29 : vector<1x24x32xf32> to vector<24x32xf32>
    %31 = arith.truncf %30 : vector<24x32xf32> to vector<24x32xbf16>
    %c4 = arith.constant 4 : index
    %c0_25 = arith.constant 0 : index
    %c0_26 = arith.constant 0 : index
    %32 = vector.load %arg2[%c4, %c0_25, %c0_26] : memref<9x32x48xbf16, #tpu.memory_space<vmem>>, vector<1x32x48xbf16>
    %33 = vector.shape_cast %32 : vector<1x32x48xbf16> to vector<32x48xbf16>
    %cst_27 = arith.constant dense<0.000000e+00> : vector<24x48xf32>
    %34 = tpu.matmul %31, %33, %cst_27 {dimension_numbers = #tpu.dot_dimension_numbers<[1], [0], [0], [1], [0, 0, 1, 1], [], []>} : vector<24x32xbf16>, vector<32x48xbf16>, vector<24x48xf32> -> vector<24x48xf32>
    %35 = arith.addf %28, %34 : vector<24x48xf32>
    %c0_28 = arith.constant 0 : index
    %c8 = arith.constant 8 : index
    %c0_29 = arith.constant 0 : index
    %36 = vector.load %arg1[%c0_28, %c8, %c0_29] : memref<1x42x32xf32, #tpu.memory_space<vmem>>, vector<1x24x32xf32>
    %37 = vector.shape_cast %36 : vector<1x24x32xf32> to vector<24x32xf32>
    %38 = arith.truncf %37 : vector<24x32xf32> to vector<24x32xbf16>
    %c5 = arith.constant 5 : index
    %c0_30 = arith.constant 0 : index
    %c0_31 = arith.constant 0 : index
    %39 = vector.load %arg2[%c5, %c0_30, %c0_31] : memref<9x32x48xbf16, #tpu.memory_space<vmem>>, vector<1x32x48xbf16>
    %40 = vector.shape_cast %39 : vector<1x32x48xbf16> to vector<32x48xbf16>
    %cst_32 = arith.constant dense<0.000000e+00> : vector<24x48xf32>
    %41 = tpu.matmul %38, %40, %cst_32 {dimension_numbers = #tpu.dot_dimension_numbers<[1], [0], [0], [1], [0, 0, 1, 1], [], []>} : vector<24x32xbf16>, vector<32x48xbf16>, vector<24x48xf32> -> vector<24x48xf32>
    %42 = arith.addf %35, %41 : vector<24x48xf32>
    %c0_33 = arith.constant 0 : index
    %c12 = arith.constant 12 : index
    %c0_34 = arith.constant 0 : index
    %43 = vector.load %arg1[%c0_33, %c12, %c0_34] : memref<1x42x32xf32, #tpu.memory_space<vmem>>, vector<1x24x32xf32>
    %44 = vector.shape_cast %43 : vector<1x24x32xf32> to vector<24x32xf32>
    %45 = arith.truncf %44 : vector<24x32xf32> to vector<24x32xbf16>
    %c6_35 = arith.constant 6 : index
    %c0_36 = arith.constant 0 : index
    %c0_37 = arith.constant 0 : index
    %46 = vector.load %arg2[%c6_35, %c0_36, %c0_37] : memref<9x32x48xbf16, #tpu.memory_space<vmem>>, vector<1x32x48xbf16>
    %47 = vector.shape_cast %46 : vector<1x32x48xbf16> to vector<32x48xbf16>
    %cst_38 = arith.constant dense<0.000000e+00> : vector<24x48xf32>
    %48 = tpu.matmul %45, %47, %cst_38 {dimension_numbers = #tpu.dot_dimension_numbers<[1], [0], [0], [1], [0, 0, 1, 1], [], []>} : vector<24x32xbf16>, vector<32x48xbf16>, vector<24x48xf32> -> vector<24x48xf32>
    %49 = arith.addf %42, %48 : vector<24x48xf32>
    %c0_39 = arith.constant 0 : index
    %c13 = arith.constant 13 : index
    %c0_40 = arith.constant 0 : index
    %50 = vector.load %arg1[%c0_39, %c13, %c0_40] : memref<1x42x32xf32, #tpu.memory_space<vmem>>, vector<1x24x32xf32>
    %51 = vector.shape_cast %50 : vector<1x24x32xf32> to vector<24x32xf32>
    %52 = arith.truncf %51 : vector<24x32xf32> to vector<24x32xbf16>
    %c7_41 = arith.constant 7 : index
    %c0_42 = arith.constant 0 : index
    %c0_43 = arith.constant 0 : index
    %53 = vector.load %arg2[%c7_41, %c0_42, %c0_43] : memref<9x32x48xbf16, #tpu.memory_space<vmem>>, vector<1x32x48xbf16>
    %54 = vector.shape_cast %53 : vector<1x32x48xbf16> to vector<32x48xbf16>
    %cst_44 = arith.constant dense<0.000000e+00> : vector<24x48xf32>
    %55 = tpu.matmul %52, %54, %cst_44 {dimension_numbers = #tpu.dot_dimension_numbers<[1], [0], [0], [1], [0, 0, 1, 1], [], []>} : vector<24x32xbf16>, vector<32x48xbf16>, vector<24x48xf32> -> vector<24x48xf32>
    %56 = arith.addf %49, %55 : vector<24x48xf32>
    %c0_45 = arith.constant 0 : index
    %c14 = arith.constant 14 : index
    %c0_46 = arith.constant 0 : index
    %57 = vector.load %arg1[%c0_45, %c14, %c0_46] : memref<1x42x32xf32, #tpu.memory_space<vmem>>, vector<1x24x32xf32>
    %58 = vector.shape_cast %57 : vector<1x24x32xf32> to vector<24x32xf32>
    %59 = arith.truncf %58 : vector<24x32xf32> to vector<24x32xbf16>
    %c8_47 = arith.constant 8 : index
    %c0_48 = arith.constant 0 : index
    %c0_49 = arith.constant 0 : index
    %60 = vector.load %arg2[%c8_47, %c0_48, %c0_49] : memref<9x32x48xbf16, #tpu.memory_space<vmem>>, vector<1x32x48xbf16>
    %61 = vector.shape_cast %60 : vector<1x32x48xbf16> to vector<32x48xbf16>
    %cst_50 = arith.constant dense<0.000000e+00> : vector<24x48xf32>
    %62 = tpu.matmul %59, %61, %cst_50 {dimension_numbers = #tpu.dot_dimension_numbers<[1], [0], [0], [1], [0, 0, 1, 1], [], []>} : vector<24x32xbf16>, vector<32x48xbf16>, vector<24x48xf32> -> vector<24x48xf32>
    %63 = arith.addf %56, %62 : vector<24x48xf32>
    %c0_51 = arith.constant 0 : index
    %c0_52 = arith.constant 0 : index
    %64 = vector.load %arg3[%c0_51, %c0_52] : memref<1x48xf32, #tpu.memory_space<vmem>>, vector<1x48xf32>
    %65 = vector.broadcast %64 : vector<1x48xf32> to vector<24x48xf32>
    %66 = arith.mulf %63, %65 : vector<24x48xf32>
    %c0_53 = arith.constant 0 : index
    %c0_54 = arith.constant 0 : index
    %67 = vector.load %arg4[%c0_53, %c0_54] : memref<1x48xf32, #tpu.memory_space<vmem>>, vector<1x48xf32>
    %68 = vector.broadcast %67 : vector<1x48xf32> to vector<24x48xf32>
    %69 = arith.addf %66, %68 : vector<24x48xf32>
    %cst_55 = arith.constant 0.000000e+00 : f32
    %70 = vector.broadcast %cst_55 : f32 to vector<24x48xf32>
    %71 = arith.maximumf %69, %70 : vector<24x48xf32>
    %72 = arith.truncf %71 : vector<24x48xf32> to vector<24x48xbf16>
    %c0_56 = arith.constant 0 : index
    %c0_57 = arith.constant 0 : index
    %c0_58 = arith.constant 0 : index
    %73 = vector.load %arg5[%c0_56, %c0_57, %c0_58] : memref<1x24x48xbf16, #tpu.memory_space<vmem>>, vector<1x24x48xbf16>
    %74 = vector.shape_cast %73 : vector<1x24x48xbf16> to vector<24x48xbf16>
    %75 = vector.shape_cast %72 : vector<24x48xbf16> to vector<1x24x48xbf16>
    tpu.vector_store %arg5[%c0_56, %c0_57, %c0_58], %75 {strides = array<i32>} : memref<1x24x48xbf16, #tpu.memory_space<vmem>>, vector<1x24x48xbf16>,
    return
  }
  func.func @transform_0(%arg0: i32) -> (i32, i32, i32) {
    %c0_i32 = arith.constant 0 : i32
    %c0_i32_0 = arith.constant 0 : i32
    %c0_i32_1 = arith.constant 0 : i32
    return %arg0, %c0_i32, %c0_i32_0 : i32, i32, i32
  }
  func.func @transform_1(%arg0: i32) -> (i32, i32, i32) {
    %c0_i32 = arith.constant 0 : i32
    %c0_i32_0 = arith.constant 0 : i32
    %c0_i32_1 = arith.constant 0 : i32
    %c0_i32_2 = arith.constant 0 : i32
    return %c0_i32, %c0_i32_0, %c0_i32_1 : i32, i32, i32
  }
  func.func @transform_2(%arg0: i32) -> (i32, i32) {
    %c0_i32 = arith.constant 0 : i32
    %c0_i32_0 = arith.constant 0 : i32
    %c0_i32_1 = arith.constant 0 : i32
    return %c0_i32, %c0_i32_0 : i32, i32
  }
  func.func @transform_3(%arg0: i32) -> (i32, i32) {
    %c0_i32 = arith.constant 0 : i32
    %c0_i32_0 = arith.constant 0 : i32
    %c0_i32_1 = arith.constant 0 : i32
    return %c0_i32, %c0_i32_0 : i32, i32
  }
  func.func @transform_4(%arg0: i32) -> (i32, i32, i32) {
    %c0_i32 = arith.constant 0 : i32
    %c0_i32_0 = arith.constant 0 : i32
    %c0_i32_1 = arith.constant 0 : i32
    return %arg0, %c0_i32, %c0_i32_0 : i32, i32, i32
  }
}

module attributes {stable_mosaic.version = 11 : i64} {
  func.func @_fc_tail_kernel(%arg0: i32, %arg1: memref<2x768xbf16, #tpu.memory_space<vmem>>, %arg2: memref<768x256xbf16, #tpu.memory_space<vmem>>, %arg3: memref<1x256xf32, #tpu.memory_space<vmem>>, %arg4: memref<256x128xbf16, #tpu.memory_space<vmem>>, %arg5: memref<1x128xf32, #tpu.memory_space<vmem>>, %arg6: memref<128x4xbf16, #tpu.memory_space<vmem>>, %arg7: memref<1x4xf32, #tpu.memory_space<vmem>>, %arg8: memref<2x4xf32, #tpu.memory_space<vmem>>, %arg9: memref<2x256xf32, #tpu.memory_space<vmem>>) attributes {dimension_semantics = [#tpu.dimension_semantics<arbitrary>], iteration_bounds = array<i64: 1>, scalar_prefetch = 0 : i64, scratch_operands = 1 : i64, tpu.core_type = #tpu.core_type<tc>, window_params = [{transform_indices = @transform_0, window_bounds = array<i64: 2, 768>}, {transform_indices = @transform_1, window_bounds = array<i64: 768, 256>}, {pipeline_mode = #tpu.pipeline_mode<synchronous>, transform_indices = @transform_2, window_bounds = array<i64: 1, 256>}, {pipeline_mode = #tpu.pipeline_mode<synchronous>, transform_indices = @transform_3, window_bounds = array<i64: 256, 128>}, {pipeline_mode = #tpu.pipeline_mode<synchronous>, transform_indices = @transform_4, window_bounds = array<i64: 1, 128>}, {pipeline_mode = #tpu.pipeline_mode<synchronous>, transform_indices = @transform_5, window_bounds = array<i64: 128, 4>}, {pipeline_mode = #tpu.pipeline_mode<synchronous>, transform_indices = @transform_6, window_bounds = array<i64: 1, 4>}, {pipeline_mode = #tpu.pipeline_mode<synchronous>, transform_indices = @transform_7, window_bounds = array<i64: 2, 4>}]} {
    %c0_i32 = arith.constant 0 : i32
    %0 = arith.cmpi eq, %arg0, %c0_i32 : i32
    %1 = arith.extui %0 : i1 to i32
    %c0_i32_0 = arith.constant 0 : i32
    %2 = arith.cmpi ne, %1, %c0_i32_0 : i32
    scf.if %2 {
      %cst_10 = arith.constant 0.000000e+00 : f32
      %12 = vector.broadcast %cst_10 : f32 to vector<2x256xf32>
      %c0_11 = arith.constant 0 : index
      %c0_12 = arith.constant 0 : index
      %13 = vector.load %arg9[%c0_11, %c0_12] : memref<2x256xf32, #tpu.memory_space<vmem>>, vector<2x256xf32>
      tpu.vector_store %arg9[%c0_11, %c0_12], %12 {strides = array<i32>} : memref<2x256xf32, #tpu.memory_space<vmem>>, vector<2x256xf32>,
    } else {
    }
    %c0 = arith.constant 0 : index
    %c0_1 = arith.constant 0 : index
    %3 = vector.load %arg9[%c0, %c0_1] : memref<2x256xf32, #tpu.memory_space<vmem>>, vector<2x256xf32>
    %c0_2 = arith.constant 0 : index
    %c0_3 = arith.constant 0 : index
    %4 = vector.load %arg1[%c0_2, %c0_3] : memref<2x768xbf16, #tpu.memory_space<vmem>>, vector<2x768xbf16>
    %c0_4 = arith.constant 0 : index
    %c0_5 = arith.constant 0 : index
    %5 = vector.load %arg2[%c0_4, %c0_5] : memref<768x256xbf16, #tpu.memory_space<vmem>>, vector<768x256xbf16>
    %cst = arith.constant dense<0.000000e+00> : vector<2x256xf32>
    %6 = tpu.matmul %4, %5, %cst {dimension_numbers = #tpu.dot_dimension_numbers<[1], [0], [0], [1], [0, 0, 1, 1], [], []>} : vector<2x768xbf16>, vector<768x256xbf16>, vector<2x256xf32> -> vector<2x256xf32>
    %7 = arith.addf %3, %6 : vector<2x256xf32>
    %c0_6 = arith.constant 0 : index
    %c0_7 = arith.constant 0 : index
    %8 = vector.load %arg9[%c0_6, %c0_7] : memref<2x256xf32, #tpu.memory_space<vmem>>, vector<2x256xf32>
    tpu.vector_store %arg9[%c0_6, %c0_7], %7 {strides = array<i32>} : memref<2x256xf32, #tpu.memory_space<vmem>>, vector<2x256xf32>,
    %c0_i32_8 = arith.constant 0 : i32
    %9 = arith.cmpi eq, %arg0, %c0_i32_8 : i32
    %10 = arith.extui %9 : i1 to i32
    %c0_i32_9 = arith.constant 0 : i32
    %11 = arith.cmpi ne, %10, %c0_i32_9 : i32
    scf.if %11 {
      %c0_10 = arith.constant 0 : index
      %c0_11 = arith.constant 0 : index
      %12 = vector.load %arg9[%c0_10, %c0_11] : memref<2x256xf32, #tpu.memory_space<vmem>>, vector<2x256xf32>
      %c0_12 = arith.constant 0 : index
      %c0_13 = arith.constant 0 : index
      %13 = vector.load %arg3[%c0_12, %c0_13] : memref<1x256xf32, #tpu.memory_space<vmem>>, vector<1x256xf32>
      %14 = vector.broadcast %13 : vector<1x256xf32> to vector<2x256xf32>
      %15 = arith.addf %12, %14 : vector<2x256xf32>
      %cst_14 = arith.constant 0.000000e+00 : f32
      %16 = vector.broadcast %cst_14 : f32 to vector<2x256xf32>
      %17 = arith.maximumf %15, %16 : vector<2x256xf32>
      %18 = arith.truncf %17 : vector<2x256xf32> to vector<2x256xbf16>
      %c0_15 = arith.constant 0 : index
      %c0_16 = arith.constant 0 : index
      %19 = vector.load %arg4[%c0_15, %c0_16] : memref<256x128xbf16, #tpu.memory_space<vmem>>, vector<256x128xbf16>
      %cst_17 = arith.constant dense<0.000000e+00> : vector<2x128xf32>
      %20 = tpu.matmul %18, %19, %cst_17 {dimension_numbers = #tpu.dot_dimension_numbers<[1], [0], [0], [1], [0, 0, 1, 1], [], []>} : vector<2x256xbf16>, vector<256x128xbf16>, vector<2x128xf32> -> vector<2x128xf32>
      %c0_18 = arith.constant 0 : index
      %c0_19 = arith.constant 0 : index
      %21 = vector.load %arg5[%c0_18, %c0_19] : memref<1x128xf32, #tpu.memory_space<vmem>>, vector<1x128xf32>
      %22 = vector.broadcast %21 : vector<1x128xf32> to vector<2x128xf32>
      %23 = arith.addf %20, %22 : vector<2x128xf32>
      %cst_20 = arith.constant 0.000000e+00 : f32
      %24 = vector.broadcast %cst_20 : f32 to vector<2x128xf32>
      %25 = arith.maximumf %23, %24 : vector<2x128xf32>
      %26 = arith.truncf %25 : vector<2x128xf32> to vector<2x128xbf16>
      %c0_21 = arith.constant 0 : index
      %c0_22 = arith.constant 0 : index
      %27 = vector.load %arg6[%c0_21, %c0_22] : memref<128x4xbf16, #tpu.memory_space<vmem>>, vector<128x4xbf16>
      %cst_23 = arith.constant dense<0.000000e+00> : vector<2x4xf32>
      %28 = tpu.matmul %26, %27, %cst_23 {dimension_numbers = #tpu.dot_dimension_numbers<[1], [0], [0], [1], [0, 0, 1, 1], [], []>} : vector<2x128xbf16>, vector<128x4xbf16>, vector<2x4xf32> -> vector<2x4xf32>
      %c0_24 = arith.constant 0 : index
      %c0_25 = arith.constant 0 : index
      %29 = vector.load %arg7[%c0_24, %c0_25] : memref<1x4xf32, #tpu.memory_space<vmem>>, vector<1x4xf32>
      %30 = vector.broadcast %29 : vector<1x4xf32> to vector<2x4xf32>
      %31 = arith.addf %28, %30 : vector<2x4xf32>
      %32 = tpu.iota {dimensions = array<i32: 1>} : vector<2x4xi32>
      %c2_i32 = arith.constant 2 : i32
      %33 = vector.broadcast %c2_i32 : i32 to vector<2x4xi32>
      %34 = arith.cmpi sge, %32, %33 : vector<2x4xi32>
      %cst_26 = arith.constant -1.000000e+01 : f32
      %cst_27 = arith.constant -5.000000e-01 : f32
      %35 = vector.broadcast %cst_26 : f32 to vector<2x4xf32>
      %36 = arith.maximumf %35, %31 : vector<2x4xf32>
      %37 = vector.broadcast %cst_27 : f32 to vector<2x4xf32>
      %38 = arith.minimumf %37, %36 : vector<2x4xf32>
      %39 = arith.select %34, %38, %31 : vector<2x4xi1>, vector<2x4xf32>
      %c0_28 = arith.constant 0 : index
      %c0_29 = arith.constant 0 : index
      %40 = vector.load %arg8[%c0_28, %c0_29] : memref<2x4xf32, #tpu.memory_space<vmem>>, vector<2x4xf32>
      tpu.vector_store %arg8[%c0_28, %c0_29], %39 {strides = array<i32>} : memref<2x4xf32, #tpu.memory_space<vmem>>, vector<2x4xf32>,
    } else {
    }
    return
  }
  func.func @transform_0(%arg0: i32) -> (i32, i32) {
    %c0_i32 = arith.constant 0 : i32
    %c0_i32_0 = arith.constant 0 : i32
    return %c0_i32, %arg0 : i32, i32
  }
  func.func @transform_1(%arg0: i32) -> (i32, i32) {
    %c0_i32 = arith.constant 0 : i32
    %c0_i32_0 = arith.constant 0 : i32
    return %arg0, %c0_i32 : i32, i32
  }
  func.func @transform_2(%arg0: i32) -> (i32, i32) {
    %c0_i32 = arith.constant 0 : i32
    %c0_i32_0 = arith.constant 0 : i32
    %c0_i32_1 = arith.constant 0 : i32
    return %c0_i32, %c0_i32_0 : i32, i32
  }
  func.func @transform_3(%arg0: i32) -> (i32, i32) {
    %c0_i32 = arith.constant 0 : i32
    %c0_i32_0 = arith.constant 0 : i32
    %c0_i32_1 = arith.constant 0 : i32
    return %c0_i32, %c0_i32_0 : i32, i32
  }
  func.func @transform_4(%arg0: i32) -> (i32, i32) {
    %c0_i32 = arith.constant 0 : i32
    %c0_i32_0 = arith.constant 0 : i32
    %c0_i32_1 = arith.constant 0 : i32
    return %c0_i32, %c0_i32_0 : i32, i32
  }
  func.func @transform_5(%arg0: i32) -> (i32, i32) {
    %c0_i32 = arith.constant 0 : i32
    %c0_i32_0 = arith.constant 0 : i32
    %c0_i32_1 = arith.constant 0 : i32
    return %c0_i32, %c0_i32_0 : i32, i32
  }
  func.func @transform_6(%arg0: i32) -> (i32, i32) {
    %c0_i32 = arith.constant 0 : i32
    %c0_i32_0 = arith.constant 0 : i32
    %c0_i32_1 = arith.constant 0 : i32
    return %c0_i32, %c0_i32_0 : i32, i32
  }
  func.func @transform_7(%arg0: i32) -> (i32, i32) {
    %c0_i32 = arith.constant 0 : i32
    %c0_i32_0 = arith.constant 0 : i32
    %c0_i32_1 = arith.constant 0 : i32
    return %c0_i32, %c0_i32_0 : i32, i32
  }
}

</mosaic_0001>

<bundles_post_ra>
// kernel: policy_forward.4
= control target key start
LH: loop header
LB: loop body
LE: loop exit
PB: predicated region body
PF: predicated region fallthrough
CT: control target
= control target key end

     0   :  { %s3348_s15 = smov 0   ;;  %s5836_s0 = inlined_call_operand.vmem [shape: f32[2,342,1], index: 0, kind: input, shape index: {}]   ;;  %s5837_s1 = inlined_call_operand.vmem [shape: bf16[9,1,16], index: 1, kind: input, shape index: {}]   ;;  %s5838_s2 = inlined_call_operand.vmem [shape: f32[1,16], index: 2, kind: input, shape index: {}]   ;;  %s5839_s3 = inlined_call_operand.vmem [shape: f32[1,16], index: 3, kind: input, shape index: {}]   ;;  %s5840_s4 = inlined_call_operand.vmem [shape: bf16[2,288,16], index: 4, kind: output, shape index: {}]  }
   0x1 LB: > { %s3210_s16 = sadd.s32 4294967295, %s3320_s15   ;;  %p3214_p0 = scmp.ge.s32.totalorder %s3320_s15, 1  ;;  %s3320_s15 = sphi %s3348_s15, %s14_s15  }
   0x2   : > { %p162_p1 = scmp.lt.s32.totalorder %s3320_s15, 3 }
   0x4   : > { %p163_p2 = pnand %p3214_p0, %p162_p1 }
   0x6   : > { %166 = sbr.rel (%p163_p2) target bundleno = 807 (0x327), region = 36 }
   0xd   : > { %p188_p3 = scmp.lt.s32.totalorder %s3210_s16, 1  ;;  %v3322_v0 = vmov 0   ;;  %vm3118_vm0 = vcmask 125952  }
   0xe   : > { %3313 = vset.pattern.permute.xlu1 %v3322_v0  ;;  %3312 = vset.pattern.permute.xlu0 %v3322_v0 }
   0xf   : > { %s6314_s16 = smov (!%p188_p3, %s3210_s16), 1 }
  0x10   : > { %s3301_s17 = smul.u32 344, %s6314_s16 }
  0x11   : > { %s3302_s19 = smul.u32 144, %s6314_s16 }
  0x12   : > { %s3362_s20 = scalar_lea.vmem %s5836_s0, %s3301_s17 }
  0x13   : > { %v200_v1 = vld [vmem:[%s3362_s20 + $0x10] sm:$0xff]  ;;  %v198_v2 = vld [vmem:[%s3362_s20] sm:$0xff]  ;;  %v201_v3 = vld [vmem:[%s3362_s20 + $0x18] sm:$0xff]  ;;  %s5629_s21 = scalar_lea.vmem %s5840_s4, %s3302_s19 }
  0x14   : > { %248 = vperm.xlu1 %3313, %v200_v1   ;;  %238 = vperm.xlu0 %3312, %v198_v2   ;;  %v199_v4 = vld [vmem:[%s3362_s20 + $0x8] sm:$0xff]  ;;  %v202_v6 = vld [vmem:[%s3362_s20 + $0x20] sm:$0xff]  ;;  %v205_v7 = vld [vmem:[%s3362_s20 + $0x38] sm:$0xff] }
  0x15   : > { %v203_v5 = vld [vmem:[%s3362_s20 + $0x28] sm:$0xff]  ;;  %v204_v8 = vld [vmem:[%s3362_s20 + $0x30] sm:$0xff]  ;;  %v206_v10 = vld [vmem:[%s3362_s20 + $0x40] sm:$0xff] }
  0x16   : > { %v207_v9 = vld [vmem:[%s3362_s20 + $0x48] sm:$0xff]  ;;  %v209_v11 = vld [vmem:[%s3362_s20 + $0x58] sm:$0xff]  ;;  %v208_v12 = vld [vmem:[%s3362_s20 + $0x50] sm:$0xff] }
  0x17   : > { %v211_v13 = vld [vmem:[%s3362_s20 + $0x68] sm:$0xff]  ;;  %v210_v14 = vld [vmem:[%s3362_s20 + $0x60] sm:$0xff]  ;;  %v213_v15 = vld [vmem:[%s3362_s20 + $0x78] sm:$0xff] }
  0x18   : > { %253 = vperm.xlu1 %3313, %v201_v3   ;;  %243 = vperm.xlu0 %3312, %v199_v4   ;;  %v212_v16 = vld [vmem:[%s3362_s20 + $0x70] sm:$0xff]  ;;  %v215_v17 = vld [vmem:[%s3362_s20 + $0x88] sm:$0xff]  ;;  %v214_v18 = vld [vmem:[%s3362_s20 + $0x80] sm:$0xff] }
  0x19   : > { %v217_v19 = vld [vmem:[%s3362_s20 + $0x98] sm:$0xff]  ;;  %v216_v20 = vld [vmem:[%s3362_s20 + $0x90] sm:$0xff]  ;;  %v219_v21 = vld [vmem:[%s3362_s20 + $0xa8] sm:$0xff] }
  0x1a   : > { %v218_v22 = vld [vmem:[%s3362_s20 + $0xa0] sm:$0xff]  ;;  %v221_v23 = vld [vmem:[%s3362_s20 + $0xb8] sm:$0xff]  ;;  %v220_v24 = vld [vmem:[%s3362_s20 + $0xb0] sm:$0xff] }
  0x1b   : > { %v223_v25 = vld [vmem:[%s3362_s20 + $0xc8] sm:$0xff]  ;;  %v222_v26 = vld [vmem:[%s3362_s20 + $0xc0] sm:$0xff]  ;;  %v225_v27 = vld [vmem:[%s3362_s20 + $0xd8] sm:$0xff] }
  0x1c   : > { %263 = vperm.xlu1 %3313, %v203_v5   ;;  %258 = vperm.xlu0 %3312, %v202_v6   ;;  %v224_v28 = vld [vmem:[%s3362_s20 + $0xd0] sm:$0xff]  ;;  %v227_v29 = vld [vmem:[%s3362_s20 + $0xe8] sm:$0xff]  ;;  %v226_v30 = vld [vmem:[%s3362_s20 + $0xe0] sm:$0xff] }
  0x1d   : > { %v229_v31 = vld [vmem:[%s3362_s20 + $0xf8] sm:$0xff]  ;;  %v228_v32 = vld [vmem:[%s3362_s20 + $0xf0] sm:$0xff]  ;;  %v231_v33 = vld [vmem:[%s3362_s20 + $0x108] sm:$0xff] }
  0x1e   : > { %v230_v34 = vld [vmem:[%s3362_s20 + $0x100] sm:$0xff]  ;;  %v233_v35 = vld [vmem:[%s3362_s20 + $0x118] sm:$0xff]  ;;  %v232_v36 = vld [vmem:[%s3362_s20 + $0x110] sm:$0xff] }
  0x1f   : > { %v493_v37 = vld [vmem:[%s3362_s20 + $0x9] sm:$0xff]  ;;  %v492_v38 = vld [vmem:[%s3362_s20 + $0x1] sm:$0xff]  ;;  %v495_v39 = vld [vmem:[%s3362_s20 + $0x19] sm:$0xff] }
  0x20   : > { %273 = vperm.xlu1 %3313, %v205_v7   ;;  %268 = vperm.xlu0 %3312, %v204_v8   ;;  %v494_v40 = vld [vmem:[%s3362_s20 + $0x11] sm:$0xff]  ;;  %v497_v41 = vld [vmem:[%s3362_s20 + $0x29] sm:$0xff]  ;;  %v496_v42 = vld [vmem:[%s3362_s20 + $0x21] sm:$0xff] }
  0x21   : > { %v499_v43 = vld [vmem:[%s3362_s20 + $0x39] sm:$0xff]  ;;  %v498_v44 = vld [vmem:[%s3362_s20 + $0x31] sm:$0xff]  ;;  %v501_v45 = vld [vmem:[%s3362_s20 + $0x49] sm:$0xff] }
  0x22   : > { %v500_v46 = vld [vmem:[%s3362_s20 + $0x41] sm:$0xff]  ;;  %v503_v47 = vld [vmem:[%s3362_s20 + $0x59] sm:$0xff]  ;;  %v502_v48 = vld [vmem:[%s3362_s20 + $0x51] sm:$0xff] }
  0x23   : > { %v505_v49 = vld [vmem:[%s3362_s20 + $0x69] sm:$0xff]  ;;  %v504_v50 = vld [vmem:[%s3362_s20 + $0x61] sm:$0xff]  ;;  %v507_v51 = vld [vmem:[%s3362_s20 + $0x79] sm:$0xff] }
  0x24   : > { %283 = vperm.xlu1 %3313, %v207_v9   ;;  %278 = vperm.xlu0 %3312, %v206_v10   ;;  %v506_v52 = vld [vmem:[%s3362_s20 + $0x71] sm:$0xff]  ;;  %v509_v53 = vld [vmem:[%s3362_s20 + $0x89] sm:$0xff]  ;;  %v508_v54 = vld [vmem:[%s3362_s20 + $0x81] sm:$0xff] }
  0x25   : > { %v511_v55 = vld [vmem:[%s3362_s20 + $0x99] sm:$0xff]  ;;  %v510_v56 = vld [vmem:[%s3362_s20 + $0x91] sm:$0xff]  ;;  %v513_v57 = vld [vmem:[%s3362_s20 + $0xa9] sm:$0xff] }
  0x26   : > { %v512_v58 = vld [vmem:[%s3362_s20 + $0xa1] sm:$0xff]  ;;  %v515_v59 = vld [vmem:[%s3362_s20 + $0xb9] sm:$0xff]  ;;  %v514_v60 = vld [vmem:[%s3362_s20 + $0xb1] sm:$0xff] }
  0x27   : > { %v517_v61 = vld [vmem:[%s3362_s20 + $0xc9] sm:$0xff]  ;;  %v516_v62 = vld [vmem:[%s3362_s20 + $0xc1] sm:$0xff]  ;;  %v519_v63 = vld [vmem:[%s3362_s20 + $0xd9] sm:$0xff] }
  0x28   : > { %293 = vperm.xlu1 %3313, %v209_v11   ;;  %288 = vperm.xlu0 %3312, %v208_v12   ;;  %v518_v0 = vld [vmem:[%s3362_s20 + $0xd1] sm:$0xff]  ;;  %v521_v1 = vld [vmem:[%s3362_s20 + $0xe9] sm:$0xff]  ;;  %v520_v2 = vld [vmem:[%s3362_s20 + $0xe1] sm:$0xff] }
  0x29   : > { %v523_v5 = vld [vmem:[%s3362_s20 + $0xf9] sm:$0xff]  ;;  %v522_v6 = vld [vmem:[%s3362_s20 + $0xf1] sm:$0xff]  ;;  %v525_v9 = vld [vmem:[%s3362_s20 + $0x109] sm:$0xff] }
  0x2a   : > { %v524_v10 = vld [vmem:[%s3362_s20 + $0x101] sm:$0xff] }
  0x2c   : > { %303 = vperm.xlu1 %3313, %v211_v13   ;;  %298 = vperm.xlu0 %3312, %v210_v14   ;;  %v527_v13 = vld [vmem:[%s3362_s20 + $0x119] sm:$0xff]  ;;  %v526_v14 = vld [vmem:[%s3362_s20 + $0x111] sm:$0xff] }
  0x30   : > { %313 = vperm.xlu1 %3313, %v213_v15   ;;  %308 = vperm.xlu0 %3312, %v212_v16  }
  0x34   : > { %323 = vperm.xlu1 %3313, %v215_v17   ;;  %318 = vperm.xlu0 %3312, %v214_v18   ;;  %v788_v17 = vld [vmem:[%s3362_s20 + $0xa] sm:$0xff]  ;;  %v787_v18 = vld [vmem:[%s3362_s20 + $0x2] sm:$0xff] }
  0x38   : > { %333 = vperm.xlu1 %3313, %v217_v19   ;;  %328 = vperm.xlu0 %3312, %v216_v20  }
  0x3c   : > { %343 = vperm.xlu1 %3313, %v219_v21   ;;  %338 = vperm.xlu0 %3312, %v218_v22   ;;  %v3459_v21 = vld [vmem:[%s3362_s20 + $0x1a] sm:$0xff]  ;;  %v3462_v22 = vld [vmem:[%s3362_s20 + $0x12] sm:$0xff] }
  0x40   : > { %353 = vperm.xlu1 %3313, %v221_v23   ;;  %348 = vperm.xlu0 %3312, %v220_v24  }
  0x44   : > { %363 = vperm.xlu1 %3313, %v223_v25   ;;  %358 = vperm.xlu0 %3312, %v222_v26   ;;  %v3471_v25 = vld [vmem:[%s3362_s20 + $0x2a] sm:$0xff]  ;;  %v3474_v26 = vld [vmem:[%s3362_s20 + $0x22] sm:$0xff] }
  0x48   : > { %373 = vperm.xlu1 %3313, %v225_v27   ;;  %368 = vperm.xlu0 %3312, %v224_v28  }
  0x4c   : > { %383 = vperm.xlu1 %3313, %v227_v29   ;;  %378 = vperm.xlu0 %3312, %v226_v30   ;;  %v3483_v29 = vld [vmem:[%s3362_s20 + $0x3a] sm:$0xff]  ;;  %v3486_v30 = vld [vmem:[%s3362_s20 + $0x32] sm:$0xff] }
  0x50   : > { %393 = vperm.xlu1 %3313, %v229_v31   ;;  %388 = vperm.xlu0 %3312, %v228_v32  }
  0x54   : > { %403 = vperm.xlu1 %3313, %v231_v33   ;;  %398 = vperm.xlu0 %3312, %v230_v34   ;;  %v3495_v33 = vld [vmem:[%s3362_s20 + $0x4a] sm:$0xff]  ;;  %v3498_v34 = vld [vmem:[%s3362_s20 + $0x42] sm:$0xff] }
  0x58   : > { %413 = vperm.xlu1 %3313, %v233_v35   ;;  %408 = vperm.xlu0 %3312, %v232_v36  }
  0x5c   : > { %538 = vperm.xlu1 %3313, %v493_v37   ;;  %533 = vperm.xlu0 %3312, %v492_v38   ;;  %v3507_v37 = vld [vmem:[%s3362_s20 + $0x5a] sm:$0xff]  ;;  %v3510_v38 = vld [vmem:[%s3362_s20 + $0x52] sm:$0xff] }
  0x60   : > { %548 = vperm.xlu1 %3313, %v495_v39   ;;  %543 = vperm.xlu0 %3312, %v494_v40  }
  0x64   : > { %558 = vperm.xlu1 %3313, %v497_v41   ;;  %553 = vperm.xlu0 %3312, %v496_v42   ;;  %v3519_v41 = vld [vmem:[%s3362_s20 + $0x6a] sm:$0xff]  ;;  %v3522_v42 = vld [vmem:[%s3362_s20 + $0x62] sm:$0xff] }
  0x68   : > { %568 = vperm.xlu1 %3313, %v499_v43   ;;  %563 = vperm.xlu0 %3312, %v498_v44  }
  0x6c   : > { %578 = vperm.xlu1 %3313, %v501_v45   ;;  %573 = vperm.xlu0 %3312, %v500_v46   ;;  %v3531_v45 = vld [vmem:[%s3362_s20 + $0x7a] sm:$0xff]  ;;  %v3534_v46 = vld [vmem:[%s3362_s20 + $0x72] sm:$0xff] }
  0x70   : > { %588 = vperm.xlu1 %3313, %v503_v47   ;;  %583 = vperm.xlu0 %3312, %v502_v48  }
  0x74   : > { %598 = vperm.xlu1 %3313, %v505_v49   ;;  %593 = vperm.xlu0 %3312, %v504_v50   ;;  %v3543_v49 = vld [vmem:[%s3362_s20 + $0x8a] sm:$0xff]  ;;  %v3546_v50 = vld [vmem:[%s3362_s20 + $0x82] sm:$0xff] }
  0x78   : > { %608 = vperm.xlu1 %3313, %v507_v51   ;;  %603 = vperm.xlu0 %3312, %v506_v52  }
  0x7c   : > { %618 = vperm.xlu1 %3313, %v509_v53   ;;  %613 = vperm.xlu0 %3312, %v508_v54   ;;  %v3555_v53 = vld [vmem:[%s3362_s20 + $0x9a] sm:$0xff]  ;;  %v3558_v54 = vld [vmem:[%s3362_s20 + $0x92] sm:$0xff] }
  0x80   : > { %628 = vperm.xlu1 %3313, %v511_v55   ;;  %623 = vperm.xlu0 %3312, %v510_v56  }
  0x84   : > { %638 = vperm.xlu1 %3313, %v513_v57   ;;  %633 = vperm.xlu0 %3312, %v512_v58   ;;  %v3567_v57 = vld [vmem:[%s3362_s20 + $0xaa] sm:$0xff]  ;;  %v3570_v58 = vld [vmem:[%s3362_s20 + $0xa2] sm:$0xff] }
  0x88   : > { %648 = vperm.xlu1 %3313, %v515_v59   ;;  %643 = vperm.xlu0 %3312, %v514_v60  }
  0x8c   : > { %658 = vperm.xlu1 %3313, %v517_v61   ;;  %653 = vperm.xlu0 %3312, %v516_v62   ;;  %v3579_v61 = vld [vmem:[%s3362_s20 + $0xba] sm:$0xff]  ;;  %v3582_v62 = vld [vmem:[%s3362_s20 + $0xb2] sm:$0xff] }
  0x90   : > { %668 = vperm.xlu1 %3313, %v519_v63   ;;  %663 = vperm.xlu0 %3312, %v518_v0  }
  0x93   : > { %v3430_v3 = vpop.permute.xlu1 %248  ;;  %v3432_v4 = vpop.permute.xlu0 %238 }
  0x94   : > { %678 = vperm.xlu1 %3313, %v521_v1   ;;  %673 = vperm.xlu0 %3312, %v520_v2   ;;  %v3591_v1 = vld [vmem:[%s3362_s20 + $0xca] sm:$0xff]  ;;  %v3594_v2 = vld [vmem:[%s3362_s20 + $0xc2] sm:$0xff] }
  0x97   : > { %v3436_v7 = vpop.permute.xlu1 %253  ;;  %v3438_v8 = vpop.permute.xlu0 %243 }
  0x98   : > { %688 = vperm.xlu1 %3313, %v523_v5   ;;  %683 = vperm.xlu0 %3312, %v522_v6  }
  0x9b   : > { %v3442_v11 = vpop.permute.xlu1 %263  ;;  %v3444_v12 = vpop.permute.xlu0 %258 }
  0x9c   : > { %698 = vperm.xlu1 %3313, %v525_v9   ;;  %693 = vperm.xlu0 %3312, %v524_v10   ;;  %v3603_v9 = vld [vmem:[%s3362_s20 + $0xda] sm:$0xff]  ;;  %v3606_v10 = vld [vmem:[%s3362_s20 + $0xd2] sm:$0xff] }
  0x9f   : > { %v3448_v15 = vpop.permute.xlu1 %273  ;;  %v3450_v16 = vpop.permute.xlu0 %268 }
  0xa0   : > { %708 = vperm.xlu1 %3313, %v527_v13   ;;  %703 = vperm.xlu0 %3312, %v526_v14  }
  0xa3   : > { %v3454_v19 = vpop.permute.xlu1 %283  ;;  %v3456_v20 = vpop.permute.xlu0 %278 }
  0xa4   : > { %833 = vperm.xlu1 %3313, %v788_v17   ;;  %828 = vperm.xlu0 %3312, %v787_v18   ;;  %v3615_v17 = vld [vmem:[%s3362_s20 + $0xea] sm:$0xff]  ;;  %v3618_v18 = vld [vmem:[%s3362_s20 + $0xe2] sm:$0xff] }
  0xa7   : > { %v3464_v23 = vpop.permute.xlu1 %293  ;;  %v3466_v24 = vpop.permute.xlu0 %288 }
  0xa8   : > { %843 = vperm.xlu1 %3313, %v3459_v21   ;;  %838 = vperm.xlu0 %3312, %v3462_v22  }
  0xab   : > { %v3476_v27 = vpop.permute.xlu1 %303  ;;  %v3478_v28 = vpop.permute.xlu0 %298 }
  0xac   : > { %853 = vperm.xlu1 %3313, %v3471_v25   ;;  %848 = vperm.xlu0 %3312, %v3474_v26  }
  0xaf   : > { %v3488_v31 = vpop.permute.xlu1 %313  ;;  %v3490_v32 = vpop.permute.xlu0 %308 }
  0xb0   : > { %863 = vperm.xlu1 %3313, %v3483_v29   ;;  %858 = vperm.xlu0 %3312, %v3486_v30  }
  0xb3   : > { %v3500_v35 = vpop.permute.xlu1 %323  ;;  %v3502_v36 = vpop.permute.xlu0 %318 }
  0xb4   : > { %873 = vperm.xlu1 %3313, %v3495_v33   ;;  %868 = vperm.xlu0 %3312, %v3498_v34  }
  0xb7   : > { %v3512_v39 = vpop.permute.xlu1 %333  ;;  %v3514_v40 = vpop.permute.xlu0 %328 }
  0xb8   : > { %883 = vperm.xlu1 %3313, %v3507_v37   ;;  %878 = vperm.xlu0 %3312, %v3510_v38  }
  0xbb   : > { %v3524_v43 = vpop.permute.xlu1 %343  ;;  %v3526_v44 = vpop.permute.xlu0 %338 }
  0xbc   : > { %893 = vperm.xlu1 %3313, %v3519_v41   ;;  %888 = vperm.xlu0 %3312, %v3522_v42  }
  0xbf   : > { %v3536_v47 = vpop.permute.xlu1 %353  ;;  %v3538_v48 = vpop.permute.xlu0 %348 }
  0xc0   : > { %903 = vperm.xlu1 %3313, %v3531_v45   ;;  %898 = vperm.xlu0 %3312, %v3534_v46  }
  0xc3   : > { %v3548_v51 = vpop.permute.xlu1 %363  ;;  %v3550_v52 = vpop.permute.xlu0 %358 }
  0xc4   : > { %5841 = vst [vmem:[#allocation2_spill] sm:$0xff] %v3548_v51  ;;  %5842 = vst [vmem:[#allocation3_spill] sm:$0xff] %v3550_v52  ;;  %913 = vperm.xlu1 %3313, %v3543_v49   ;;  %908 = vperm.xlu0 %3312, %v3546_v50  }
  0xc7   : > { %v3560_v55 = vpop.permute.xlu1 %373  ;;  %v3562_v56 = vpop.permute.xlu0 %368 }
  0xc8   : > { %5843 = vst [vmem:[#allocation4_spill] sm:$0xff] %v3560_v55  ;;  %5844 = vst [vmem:[#allocation5_spill] sm:$0xff] %v3562_v56  ;;  %923 = vperm.xlu1 %3313, %v3555_v53   ;;  %918 = vperm.xlu0 %3312, %v3558_v54   ;;  %v3651_v56 = vld [vmem:[%s3362_s20 + $0x11a] sm:$0xff] }
  0xcb   : > { %v3572_v59 = vpop.permute.xlu1 %383  ;;  %v3574_v60 = vpop.permute.xlu0 %378 }
  0xcc   : > { %5845 = vst [vmem:[#allocation6_spill] sm:$0xff] %v3572_v59  ;;  %5846 = vst [vmem:[#allocation7_spill] sm:$0xff] %v3574_v60  ;;  %933 = vperm.xlu1 %3313, %v3567_v57   ;;  %928 = vperm.xlu0 %3312, %v3570_v58   ;;  %v3639_v60 = vld [vmem:[%s3362_s20 + $0x10a] sm:$0xff] }
  0xcf   : > { %v3584_v63 = vpop.permute.xlu1 %393  ;;  %v3586_v0 = vpop.permute.xlu0 %388 }
  0xd0   : > { %5847 = vst [vmem:[#allocation8_spill] sm:$0xff] %v3584_v63  ;;  %5848 = vst [vmem:[#allocation9_spill] sm:$0xff] %v3586_v0  ;;  %943 = vperm.xlu1 %3313, %v3579_v61   ;;  %938 = vperm.xlu0 %3312, %v3582_v62  }
  0xd3   : > { %v3596_v5 = vpop.permute.xlu1 %403  ;;  %v3598_v6 = vpop.permute.xlu0 %398 }
  0xd4   : > { %5849 = vst [vmem:[#allocation10_spill] sm:$0xff] %v3596_v5  ;;  %5850 = vst [vmem:[#allocation11_spill] sm:$0xff] %v3598_v6  ;;  %953 = vperm.xlu1 %3313, %v3591_v1   ;;  %948 = vperm.xlu0 %3312, %v3594_v2  }
  0xd7   : > { %v3608_v13 = vpop.permute.xlu1 %413  ;;  %v3610_v14 = vpop.permute.xlu0 %408 }
  0xd8   : > { %5851 = vst [vmem:[#allocation12_spill] sm:$0xff] %v3608_v13  ;;  %5852 = vst [vmem:[#allocation13_spill] sm:$0xff] %v3610_v14  ;;  %963 = vperm.xlu1 %3313, %v3603_v9   ;;  %958 = vperm.xlu0 %3312, %v3606_v10   ;;  %v3627_v14 = vld [vmem:[%s3362_s20 + $0xfa] sm:$0xff]  ;;  %v3630_v13 = vld [vmem:[%s3362_s20 + $0xf2] sm:$0xff] }
  0xdb   : > { %v3620_v6 = vpop.permute.xlu1 %538  ;;  %v3622_v5 = vpop.permute.xlu0 %533 }
  0xdc   : > { %5853 = vst [vmem:[#allocation14_spill] sm:$0xff] %v3620_v6  ;;  %5854 = vst [vmem:[#allocation15_spill] sm:$0xff] %v3622_v5  ;;  %973 = vperm.xlu1 %3313, %v3615_v17   ;;  %968 = vperm.xlu0 %3312, %v3618_v18   ;;  %v3642_v5 = vld [vmem:[%s3362_s20 + $0x102] sm:$0xff] }
  0xdf   : > { %v3632_v0 = vpop.permute.xlu1 %548  ;;  %v3634_v63 = vpop.permute.xlu0 %543 }
  0xe0   : > { %5855 = vst [vmem:[#allocation16_spill] sm:$0xff] %v3632_v0  ;;  %5856 = vst [vmem:[#allocation17_spill] sm:$0xff] %v3634_v63  ;;  %983 = vperm.xlu1 %3313, %v3627_v14   ;;  %978 = vperm.xlu0 %3312, %v3630_v13   ;;  %v3654_v0 = vld [vmem:[%s3362_s20 + $0x112] sm:$0xff] }
  0xe3   : > { %v3644_v59 = vpop.permute.xlu1 %558  ;;  %v3646_v6 = vpop.permute.xlu0 %553 }
  0xe4   : > { %5857 = vst [vmem:[#allocation18_spill] sm:$0xff] %v3644_v59  ;;  %5858 = vst [vmem:[#allocation19_spill] sm:$0xff] %v3646_v6  ;;  %993 = vperm.xlu1 %3313, %v3639_v60   ;;  %988 = vperm.xlu0 %3312, %v3642_v5  }
  0xe7   : > { %v3656_v63 = vpop.permute.xlu1 %568  ;;  %v3658_v55 = vpop.permute.xlu0 %563 }
  0xe8   : > { %5859 = vst [vmem:[#allocation20_spill] sm:$0xff] %v3656_v63  ;;  %5860 = vst [vmem:[#allocation21_spill] sm:$0xff] %v3658_v55  ;;  %1003 = vperm.xlu1 %3313, %v3651_v56   ;;  %998 = vperm.xlu0 %3312, %v3654_v0  }
  0xeb   : > { %v3662_v52 = vpop.permute.xlu1 %578  ;;  %v3664_v59 = vpop.permute.xlu0 %573 }
  0xec   : > { %5861 = vst [vmem:[#allocation22_spill] sm:$0xff] %v3662_v52  ;;  %5862 = vst [vmem:[#allocation23_spill] sm:$0xff] %v3664_v59  ;;  %1128 = vperm.xlu1 %3313, %v3459_v21   ;;  %1123 = vperm.xlu0 %3312, %v3462_v22  }
  0xef   : > { %v3668_v6 = vpop.permute.xlu1 %588  ;;  %v3670_v51 = vpop.permute.xlu0 %583 }
  0xf0   : > { %5863 = vst [vmem:[#allocation24_spill] sm:$0xff] %v3668_v6  ;;  %5864 = vst [vmem:[#allocation25_spill] sm:$0xff] %v3670_v51  ;;  %1138 = vperm.xlu1 %3313, %v3471_v25   ;;  %1133 = vperm.xlu0 %3312, %v3474_v26  }
  0xf3   : > { %v3674_v55 = vpop.permute.xlu1 %598  ;;  %v3676_v63 = vpop.permute.xlu0 %593 }
  0xf4   : > { %5865 = vst [vmem:[#allocation26_spill] sm:$0xff] %v3674_v55  ;;  %5866 = vst [vmem:[#allocation27_spill] sm:$0xff] %v3676_v63  ;;  %1148 = vperm.xlu1 %3313, %v3483_v29   ;;  %1143 = vperm.xlu0 %3312, %v3486_v30   ;;  %v4077_v55 = vld [vmem:[%s3362_s20 + $0x12c] sm:$0xff] }
  0xf7   : > { %v3680_v59 = vpop.permute.xlu1 %608  ;;  %v3682_v21 = vpop.permute.xlu0 %603 }
  0xf8   : > { %5867 = vst [vmem:[#allocation28_spill] sm:$0xff] %v3680_v59  ;;  %5868 = vst [vmem:[#allocation29_spill] sm:$0xff] %v3682_v21  ;;  %1158 = vperm.xlu1 %3313, %v3495_v33   ;;  %1153 = vperm.xlu0 %3312, %v3498_v34  }
  0xfb   : > { %v3686_v22 = vpop.permute.xlu1 %618  ;;  %v3688_v25 = vpop.permute.xlu0 %613 }
  0xfc   : > { %5869 = vst [vmem:[#allocation30_spill] sm:$0xff] %v3686_v22  ;;  %5870 = vst [vmem:[#allocation31_spill] sm:$0xff] %v3688_v25  ;;  %1168 = vperm.xlu1 %3313, %v3507_v37   ;;  %1163 = vperm.xlu0 %3312, %v3510_v38  }
  0xff   : > { %v3692_v26 = vpop.permute.xlu1 %628  ;;  %v3694_v29 = vpop.permute.xlu0 %623 }
 0x100   : > { %5871 = vst [vmem:[#allocation32_spill] sm:$0xff] %v3692_v26  ;;  %5872 = vst [vmem:[#allocation33_spill] sm:$0xff] %v3694_v29  ;;  %1178 = vperm.xlu1 %3313, %v3519_v41   ;;  %1173 = vperm.xlu0 %3312, %v3522_v42  }
 0x103   : > { %v3698_v30 = vpop.permute.xlu1 %638  ;;  %v3700_v33 = vpop.permute.xlu0 %633 }
 0x104   : > { %5873 = vst [vmem:[#allocation34_spill] sm:$0xff] %v3698_v30  ;;  %5874 = vst [vmem:[#allocation35_spill] sm:$0xff] %v3700_v33  ;;  %1188 = vperm.xlu1 %3313, %v3531_v45   ;;  %1183 = vperm.xlu0 %3312, %v3534_v46  }
 0x107   : > { %v3704_v34 = vpop.permute.xlu1 %648  ;;  %v3706_v37 = vpop.permute.xlu0 %643 }
 0x108   : > { %5875 = vst [vmem:[#allocation36_spill] sm:$0xff] %v3704_v34  ;;  %5876 = vst [vmem:[#allocation37_spill] sm:$0xff] %v3706_v37  ;;  %1198 = vperm.xlu1 %3313, %v3543_v49   ;;  %1193 = vperm.xlu0 %3312, %v3546_v50  }
 0x10b   : > { %v3710_v38 = vpop.permute.xlu1 %658  ;;  %v3712_v41 = vpop.permute.xlu0 %653 }
 0x10c   : > { %5877 = vst [vmem:[#allocation38_spill] sm:$0xff] %v3710_v38  ;;  %5878 = vst [vmem:[#allocation39_spill] sm:$0xff] %v3712_v41  ;;  %1208 = vperm.xlu1 %3313, %v3555_v53   ;;  %1203 = vperm.xlu0 %3312, %v3558_v54  }
 0x10f   : > { %v3716_v42 = vpop.permute.xlu1 %668  ;;  %v3718_v45 = vpop.permute.xlu0 %663 }
 0x110   : > { %5879 = vst [vmem:[#allocation40_spill] sm:$0xff] %v3716_v42  ;;  %5880 = vst [vmem:[#allocation41_spill] sm:$0xff] %v3718_v45  ;;  %1218 = vperm.xlu1 %3313, %v3567_v57   ;;  %1213 = vperm.xlu0 %3312, %v3570_v58  }
 0x113   : > { %v3722_v46 = vpop.permute.xlu1 %678  ;;  %v3724_v49 = vpop.permute.xlu0 %673 }
 0x114   : > { %5881 = vst [vmem:[#allocation42_spill] sm:$0xff] %v3722_v46  ;;  %5882 = vst [vmem:[#allocation43_spill] sm:$0xff] %v3724_v49  ;;  %1228 = vperm.xlu1 %3313, %v3579_v61   ;;  %1223 = vperm.xlu0 %3312, %v3582_v62  }
 0x117   : > { %v3728_v50 = vpop.permute.xlu1 %688  ;;  %v3730_v53 = vpop.permute.xlu0 %683 }
 0x118   : > { %5883 = vst [vmem:[#allocation44_spill] sm:$0xff] %v3728_v50  ;;  %5884 = vst [vmem:[#allocation45_spill] sm:$0xff] %v3730_v53  ;;  %1238 = vperm.xlu1 %3313, %v3591_v1   ;;  %1233 = vperm.xlu0 %3312, %v3594_v2  }
 0x11b   : > { %v3734_v54 = vpop.permute.xlu1 %698  ;;  %v3736_v57 = vpop.permute.xlu0 %693 }
 0x11c   : > { %5885 = vst [vmem:[#allocation46_spill] sm:$0xff] %v3734_v54  ;;  %5886 = vst [vmem:[#allocation47_spill] sm:$0xff] %v3736_v57  ;;  %1248 = vperm.xlu1 %3313, %v3603_v9   ;;  %1243 = vperm.xlu0 %3312, %v3606_v10  }
 0x11f   : > { %v3740_v58 = vpop.permute.xlu1 %708  ;;  %v3742_v61 = vpop.permute.xlu0 %703 }
 0x120   : > { %5887 = vst [vmem:[#allocation48_spill] sm:$0xff] %v3740_v58  ;;  %5888 = vst [vmem:[#allocation49_spill] sm:$0xff] %v3742_v61  ;;  %1258 = vperm.xlu1 %3313, %v3615_v17   ;;  %1253 = vperm.xlu0 %3312, %v3618_v18  }
 0x123   : > { %v3746_v62 = vpop.permute.xlu1 %833  ;;  %v3748_v1 = vpop.permute.xlu0 %828 }
 0x124   : > { %5889 = vst [vmem:[#allocation50_spill] sm:$0xff] %v3746_v62  ;;  %5890 = vst [vmem:[#allocation51_spill] sm:$0xff] %v3748_v1  ;;  %1268 = vperm.xlu1 %3313, %v3627_v14   ;;  %1263 = vperm.xlu0 %3312, %v3630_v13   ;;  %v1117_v13 = vld [vmem:[%s3362_s20 + $0x12a] sm:$0xff]  ;;  %v1116_v14 = vld [vmem:[%s3362_s20 + $0x122] sm:$0xff] }
 0x127   : > { %v3752_v2 = vpop.permute.xlu1 %843  ;;  %v3754_v9 = vpop.permute.xlu0 %838 }
 0x128   : > { %5891 = vst [vmem:[#allocation52_spill] sm:$0xff] %v3752_v2  ;;  %5892 = vst [vmem:[#allocation53_spill] sm:$0xff] %v3754_v9  ;;  %1278 = vperm.xlu1 %3313, %v3639_v60   ;;  %1273 = vperm.xlu0 %3312, %v3642_v5   ;;  %v1378_v60 = vld [vmem:[%s3362_s20 + $0x1b] sm:$0xff]  ;;  %v1377_v5 = vld [vmem:[%s3362_s20 + $0x13] sm:$0xff] }
 0x12b   : > { %v3758_v10 = vpop.permute.xlu1 %853  ;;  %v3760_v17 = vpop.permute.xlu0 %848 }
 0x12c   : > { %5893 = vst [vmem:[#allocation54_spill] sm:$0xff] %v3758_v10  ;;  %5894 = vst [vmem:[#allocation55_spill] sm:$0xff] %v3760_v17  ;;  %1288 = vperm.xlu1 %3313, %v3651_v56   ;;  %1283 = vperm.xlu0 %3312, %v3654_v0   ;;  %v1380_v56 = vld [vmem:[%s3362_s20 + $0x2b] sm:$0xff]  ;;  %v1379_v0 = vld [vmem:[%s3362_s20 + $0x23] sm:$0xff] }
 0x12f   : > { %v3766_v18 = vpop.permute.xlu1 %863  ;;  %v3768_v9 = vpop.permute.xlu0 %858 }
 0x130   : > { %5895 = vst [vmem:[#allocation56_spill] sm:$0xff] %v3766_v18  ;;  %5896 = vst [vmem:[#allocation57_spill] sm:$0xff] %v3768_v9  ;;  %1298 = vperm.xlu1 %3313, %v1117_v13   ;;  %1293 = vperm.xlu0 %3312, %v1116_v14   ;;  %v1382_v13 = vld [vmem:[%s3362_s20 + $0x3b] sm:$0xff]  ;;  %v1381_v14 = vld [vmem:[%s3362_s20 + $0x33] sm:$0xff] }
 0x133   : > { %v3772_v10 = vpop.permute.xlu1 %873  ;;  %v3774_v17 = vpop.permute.xlu0 %868 }
 0x134   : > { %5897 = vst [vmem:[#allocation58_spill] sm:$0xff] %v3772_v10  ;;  %5898 = vst [vmem:[#allocation59_spill] sm:$0xff] %v3774_v17  ;;  %1423 = vperm.xlu1 %3313, %v1378_v60   ;;  %1418 = vperm.xlu0 %3312, %v1377_v5   ;;  %v1384_v60 = vld [vmem:[%s3362_s20 + $0x4b] sm:$0xff]  ;;  %v1383_v5 = vld [vmem:[%s3362_s20 + $0x43] sm:$0xff] }
 0x137   : > { %v3778_v2 = vpop.permute.xlu1 %883  ;;  %v3780_v18 = vpop.permute.xlu0 %878 }
 0x138   : > { %5899 = vst [vmem:[#allocation60_spill] sm:$0xff] %v3778_v2  ;;  %5900 = vst [vmem:[#allocation61_spill] sm:$0xff] %v3780_v18  ;;  %1433 = vperm.xlu1 %3313, %v1380_v56   ;;  %1428 = vperm.xlu0 %3312, %v1379_v0   ;;  %v1386_v56 = vld [vmem:[%s3362_s20 + $0x5b] sm:$0xff]  ;;  %v1385_v0 = vld [vmem:[%s3362_s20 + $0x53] sm:$0xff] }
 0x13b   : > { %v3784_v9 = vpop.permute.xlu1 %893  ;;  %v3786_v10 = vpop.permute.xlu0 %888 }
 0x13c   : > { %5901 = vst [vmem:[#allocation62_spill] sm:$0xff] %v3784_v9  ;;  %5902 = vst [vmem:[#allocation63_spill] sm:$0xff] %v3786_v10  ;;  %1443 = vperm.xlu1 %3313, %v1382_v13   ;;  %1438 = vperm.xlu0 %3312, %v1381_v14   ;;  %v1388_v13 = vld [vmem:[%s3362_s20 + $0x6b] sm:$0xff]  ;;  %v1387_v14 = vld [vmem:[%s3362_s20 + $0x63] sm:$0xff] }
 0x13f   : > { %v3790_v17 = vpop.permute.xlu1 %903  ;;  %v3792_v2 = vpop.permute.xlu0 %898 }
 0x140   : > { %5903 = vst [vmem:[#allocation64_spill] sm:$0xff] %v3790_v17  ;;  %5904 = vst [vmem:[#allocation65_spill] sm:$0xff] %v3792_v2  ;;  %1453 = vperm.xlu1 %3313, %v1384_v60   ;;  %1448 = vperm.xlu0 %3312, %v1383_v5   ;;  %v1390_v60 = vld [vmem:[%s3362_s20 + $0x7b] sm:$0xff]  ;;  %v1389_v5 = vld [vmem:[%s3362_s20 + $0x73] sm:$0xff] }
 0x143   : > { %v3796_v18 = vpop.permute.xlu1 %913  ;;  %v3798_v9 = vpop.permute.xlu0 %908 }
 0x144   : > { %5905 = vst [vmem:[#allocation66_spill] sm:$0xff] %v3796_v18  ;;  %5906 = vst [vmem:[#allocation67_spill] sm:$0xff] %v3798_v9  ;;  %1463 = vperm.xlu1 %3313, %v1386_v56   ;;  %1458 = vperm.xlu0 %3312, %v1385_v0   ;;  %v1392_v56 = vld [vmem:[%s3362_s20 + $0x8b] sm:$0xff]  ;;  %v1391_v0 = vld [vmem:[%s3362_s20 + $0x83] sm:$0xff] }
 0x147   : > { %v3802_v10 = vpop.permute.xlu1 %923  ;;  %v3804_v17 = vpop.permute.xlu0 %918 }
 0x148   : > { %5907 = vst [vmem:[#allocation68_spill] sm:$0xff] %v3802_v10  ;;  %5908 = vst [vmem:[#allocation69_spill] sm:$0xff] %v3804_v17  ;;  %1473 = vperm.xlu1 %3313, %v1388_v13   ;;  %1468 = vperm.xlu0 %3312, %v1387_v14   ;;  %v1394_v13 = vld [vmem:[%s3362_s20 + $0x9b] sm:$0xff]  ;;  %v1393_v14 = vld [vmem:[%s3362_s20 + $0x93] sm:$0xff] }
 0x14b   : > { %v3808_v2 = vpop.permute.xlu1 %933  ;;  %v3810_v18 = vpop.permute.xlu0 %928 }
 0x14c   : > { %5909 = vst [vmem:[#allocation70_spill] sm:$0xff] %v3808_v2  ;;  %5910 = vst [vmem:[#allocation71_spill] sm:$0xff] %v3810_v18  ;;  %1483 = vperm.xlu1 %3313, %v1390_v60   ;;  %1478 = vperm.xlu0 %3312, %v1389_v5   ;;  %v1396_v60 = vld [vmem:[%s3362_s20 + $0xab] sm:$0xff]  ;;  %v1395_v5 = vld [vmem:[%s3362_s20 + $0xa3] sm:$0xff] }
 0x14f   : > { %v3814_v9 = vpop.permute.xlu1 %943  ;;  %v3816_v10 = vpop.permute.xlu0 %938 }
 0x150   : > { %5911 = vst [vmem:[#allocation72_spill] sm:$0xff] %v3814_v9  ;;  %5912 = vst [vmem:[#allocation73_spill] sm:$0xff] %v3816_v10  ;;  %1493 = vperm.xlu1 %3313, %v1392_v56   ;;  %1488 = vperm.xlu0 %3312, %v1391_v0   ;;  %v1398_v56 = vld [vmem:[%s3362_s20 + $0xbb] sm:$0xff]  ;;  %v1397_v0 = vld [vmem:[%s3362_s20 + $0xb3] sm:$0xff] }
 0x153   : > { %v3820_v17 = vpop.permute.xlu1 %953  ;;  %v3822_v2 = vpop.permute.xlu0 %948 }
 0x154   : > { %5913 = vst [vmem:[#allocation74_spill] sm:$0xff] %v3820_v17  ;;  %5914 = vst [vmem:[#allocation75_spill] sm:$0xff] %v3822_v2  ;;  %1503 = vperm.xlu1 %3313, %v1394_v13   ;;  %1498 = vperm.xlu0 %3312, %v1393_v14   ;;  %v1400_v13 = vld [vmem:[%s3362_s20 + $0xcb] sm:$0xff]  ;;  %v1399_v14 = vld [vmem:[%s3362_s20 + $0xc3] sm:$0xff] }
 0x157   : > { %v3826_v18 = vpop.permute.xlu1 %963  ;;  %v3828_v9 = vpop.permute.xlu0 %958 }
 0x158   : > { %5915 = vst [vmem:[#allocation76_spill] sm:$0xff] %v3826_v18  ;;  %5916 = vst [vmem:[#allocation77_spill] sm:$0xff] %v3828_v9  ;;  %1513 = vperm.xlu1 %3313, %v1396_v60   ;;  %1508 = vperm.xlu0 %3312, %v1395_v5   ;;  %v1402_v60 = vld [vmem:[%s3362_s20 + $0xdb] sm:$0xff]  ;;  %v1401_v5 = vld [vmem:[%s3362_s20 + $0xd3] sm:$0xff] }
 0x15b   : > { %v3832_v10 = vpop.permute.xlu1 %973  ;;  %v3834_v17 = vpop.permute.xlu0 %968 }
 0x15c   : > { %5917 = vst [vmem:[#allocation78_spill] sm:$0xff] %v3832_v10  ;;  %5918 = vst [vmem:[#allocation79_spill] sm:$0xff] %v3834_v17  ;;  %1523 = vperm.xlu1 %3313, %v1398_v56   ;;  %1518 = vperm.xlu0 %3312, %v1397_v0   ;;  %v1404_v56 = vld [vmem:[%s3362_s20 + $0xeb] sm:$0xff]  ;;  %v1403_v0 = vld [vmem:[%s3362_s20 + $0xe3] sm:$0xff] }
 0x15f   : > { %v3838_v2 = vpop.permute.xlu1 %983  ;;  %v3840_v18 = vpop.permute.xlu0 %978 }
 0x160   : > { %5919 = vst [vmem:[#allocation80_spill] sm:$0xff] %v3838_v2  ;;  %5920 = vst [vmem:[#allocation81_spill] sm:$0xff] %v3840_v18  ;;  %1533 = vperm.xlu1 %3313, %v1400_v13   ;;  %1528 = vperm.xlu0 %3312, %v1399_v14   ;;  %v1406_v13 = vld [vmem:[%s3362_s20 + $0xfb] sm:$0xff]  ;;  %v1405_v14 = vld [vmem:[%s3362_s20 + $0xf3] sm:$0xff] }
 0x163   : > { %v3844_v9 = vpop.permute.xlu1 %993  ;;  %v3846_v10 = vpop.permute.xlu0 %988 }
 0x164   : > { %5921 = vst [vmem:[#allocation82_spill] sm:$0xff] %v3844_v9  ;;  %5922 = vst [vmem:[#allocation83_spill] sm:$0xff] %v3846_v10  ;;  %1543 = vperm.xlu1 %3313, %v1402_v60   ;;  %1538 = vperm.xlu0 %3312, %v1401_v5   ;;  %v1408_v60 = vld [vmem:[%s3362_s20 + $0x10b] sm:$0xff]  ;;  %v1407_v5 = vld [vmem:[%s3362_s20 + $0x103] sm:$0xff] }
 0x167   : > { %v3850_v17 = vpop.permute.xlu1 %1003  ;;  %v3852_v2 = vpop.permute.xlu0 %998 }
 0x168   : > { %5923 = vst [vmem:[#allocation84_spill] sm:$0xff] %v3850_v17  ;;  %5924 = vst [vmem:[#allocation85_spill] sm:$0xff] %v3852_v2  ;;  %1553 = vperm.xlu1 %3313, %v1404_v56   ;;  %1548 = vperm.xlu0 %3312, %v1403_v0   ;;  %v1410_v56 = vld [vmem:[%s3362_s20 + $0x11b] sm:$0xff]  ;;  %v1409_v0 = vld [vmem:[%s3362_s20 + $0x113] sm:$0xff] }
 0x16b   : > { %v3856_v18 = vpop.permute.xlu1 %1128  ;;  %v3858_v9 = vpop.permute.xlu0 %1123 }
 0x16c   : > { %5925 = vst [vmem:[#allocation86_spill] sm:$0xff] %v3856_v18  ;;  %5926 = vst [vmem:[#allocation87_spill] sm:$0xff] %v3858_v9  ;;  %1563 = vperm.xlu1 %3313, %v1406_v13   ;;  %1558 = vperm.xlu0 %3312, %v1405_v14   ;;  %v1412_v13 = vld [vmem:[%s3362_s20 + $0x12b] sm:$0xff]  ;;  %v1411_v14 = vld [vmem:[%s3362_s20 + $0x123] sm:$0xff] }
 0x16f   : > { %v3862_v10 = vpop.permute.xlu1 %1138  ;;  %v3864_v17 = vpop.permute.xlu0 %1133 }
 0x170   : > { %5927 = vst [vmem:[#allocation88_spill] sm:$0xff] %v3862_v10  ;;  %5928 = vst [vmem:[#allocation89_spill] sm:$0xff] %v3864_v17  ;;  %1573 = vperm.xlu1 %3313, %v1408_v60   ;;  %1568 = vperm.xlu0 %3312, %v1407_v5   ;;  %v1673_v60 = vld [vmem:[%s3362_s20 + $0x1c] sm:$0xff]  ;;  %v1672_v5 = vld [vmem:[%s3362_s20 + $0x14] sm:$0xff] }
 0x173   : > { %v3868_v2 = vpop.permute.xlu1 %1148  ;;  %v3870_v18 = vpop.permute.xlu0 %1143 }
 0x174   : > { %5929 = vst [vmem:[#allocation90_spill] sm:$0xff] %v3868_v2  ;;  %5930 = vst [vmem:[#allocation91_spill] sm:$0xff] %v3870_v18  ;;  %1583 = vperm.xlu1 %3313, %v1410_v56   ;;  %1578 = vperm.xlu0 %3312, %v1409_v0   ;;  %v3885_v56 = vld [vmem:[%s3362_s20 + $0x2c] sm:$0xff]  ;;  %v3888_v0 = vld [vmem:[%s3362_s20 + $0x24] sm:$0xff] }
 0x177   : > { %v3874_v9 = vpop.permute.xlu1 %1158  ;;  %v3876_v10 = vpop.permute.xlu0 %1153 }
 0x178   : > { %5931 = vst [vmem:[#allocation92_spill] sm:$0xff] %v3874_v9  ;;  %5932 = vst [vmem:[#allocation93_spill] sm:$0xff] %v3876_v10  ;;  %1593 = vperm.xlu1 %3313, %v1412_v13   ;;  %1588 = vperm.xlu0 %3312, %v1411_v14   ;;  %v3897_v13 = vld [vmem:[%s3362_s20 + $0x3c] sm:$0xff]  ;;  %v3900_v14 = vld [vmem:[%s3362_s20 + $0x34] sm:$0xff] }
 0x17b   : > { %v3880_v17 = vpop.permute.xlu1 %1168  ;;  %v3882_v2 = vpop.permute.xlu0 %1163 }
 0x17c   : > { %5933 = vst [vmem:[#allocation94_spill] sm:$0xff] %v3880_v17  ;;  %5934 = vst [vmem:[#allocation95_spill] sm:$0xff] %v3882_v2  ;;  %1718 = vperm.xlu1 %3313, %v1673_v60   ;;  %1713 = vperm.xlu0 %3312, %v1672_v5  }
 0x17f   : > { %v3890_v9 = vpop.permute.xlu1 %1178  ;;  %v3892_v10 = vpop.permute.xlu0 %1173 }
 0x180   : > { %5935 = vst [vmem:[#allocation96_spill] sm:$0xff] %v3890_v9  ;;  %5936 = vst [vmem:[#allocation97_spill] sm:$0xff] %v3892_v10  ;;  %1728 = vperm.xlu1 %3313, %v3885_v56   ;;  %1723 = vperm.xlu0 %3312, %v3888_v0   ;;  %v3909_v10 = vld [vmem:[%s3362_s20 + $0x4c] sm:$0xff]  ;;  %v3912_v9 = vld [vmem:[%s3362_s20 + $0x44] sm:$0xff] }
 0x183   : > { %v3902_v60 = vpop.permute.xlu1 %1188  ;;  %v3904_v5 = vpop.permute.xlu0 %1183 }
 0x184   : > { %5937 = vst [vmem:[#allocation98_spill] sm:$0xff] %v3902_v60  ;;  %5938 = vst [vmem:[#allocation99_spill] sm:$0xff] %v3904_v5  ;;  %1738 = vperm.xlu1 %3313, %v3897_v13   ;;  %1733 = vperm.xlu0 %3312, %v3900_v14   ;;  %v3921_v5 = vld [vmem:[%s3362_s20 + $0x5c] sm:$0xff]  ;;  %v3924_v60 = vld [vmem:[%s3362_s20 + $0x54] sm:$0xff] }
 0x187   : > { %v3914_v2 = vpop.permute.xlu1 %1198  ;;  %v3916_v17 = vpop.permute.xlu0 %1193 }
 0x188   : > { %5939 = vst [vmem:[#allocation100_spill] sm:$0xff] %v3914_v2  ;;  %5940 = vst [vmem:[#allocation101_spill] sm:$0xff] %v3916_v17  ;;  %1748 = vperm.xlu1 %3313, %v3909_v10   ;;  %1743 = vperm.xlu0 %3312, %v3912_v9   ;;  %v3933_v17 = vld [vmem:[%s3362_s20 + $0x6c] sm:$0xff]  ;;  %v3936_v2 = vld [vmem:[%s3362_s20 + $0x64] sm:$0xff] }
 0x18b   : > { %v3926_v18 = vpop.permute.xlu1 %1208  ;;  %v3928_v1 = vpop.permute.xlu0 %1203 }
 0x18c   : > { %5941 = vst [vmem:[#allocation102_spill] sm:$0xff] %v3926_v18  ;;  %5942 = vst [vmem:[#allocation103_spill] sm:$0xff] %v3928_v1  ;;  %1758 = vperm.xlu1 %3313, %v3921_v5   ;;  %1753 = vperm.xlu0 %3312, %v3924_v60   ;;  %v3945_v1 = vld [vmem:[%s3362_s20 + $0x7c] sm:$0xff]  ;;  %v3948_v18 = vld [vmem:[%s3362_s20 + $0x74] sm:$0xff] }
 0x18f   : > { %v3938_v62 = vpop.permute.xlu1 %1218  ;;  %v3940_v61 = vpop.permute.xlu0 %1213 }
 0x190   : > { %5943 = vst [vmem:[#allocation104_spill] sm:$0xff] %v3938_v62  ;;  %5944 = vst [vmem:[#allocation105_spill] sm:$0xff] %v3940_v61  ;;  %1768 = vperm.xlu1 %3313, %v3933_v17   ;;  %1763 = vperm.xlu0 %3312, %v3936_v2   ;;  %v3957_v61 = vld [vmem:[%s3362_s20 + $0x8c] sm:$0xff]  ;;  %v3960_v62 = vld [vmem:[%s3362_s20 + $0x84] sm:$0xff] }
 0x193   : > { %v3950_v58 = vpop.permute.xlu1 %1228  ;;  %v3952_v57 = vpop.permute.xlu0 %1223 }
 0x194   : > { %5945 = vst [vmem:[#allocation106_spill] sm:$0xff] %v3950_v58  ;;  %5946 = vst [vmem:[#allocation107_spill] sm:$0xff] %v3952_v57  ;;  %1778 = vperm.xlu1 %3313, %v3945_v1   ;;  %1773 = vperm.xlu0 %3312, %v3948_v18   ;;  %v3969_v57 = vld [vmem:[%s3362_s20 + $0x9c] sm:$0xff]  ;;  %v3972_v58 = vld [vmem:[%s3362_s20 + $0x94] sm:$0xff] }
 0x197   : > { %v3962_v54 = vpop.permute.xlu1 %1238  ;;  %v3964_v53 = vpop.permute.xlu0 %1233 }
 0x198   : > { %5947 = vst [vmem:[#allocation108_spill] sm:$0xff] %v3962_v54  ;;  %5948 = vst [vmem:[#allocation109_spill] sm:$0xff] %v3964_v53  ;;  %1788 = vperm.xlu1 %3313, %v3957_v61   ;;  %1783 = vperm.xlu0 %3312, %v3960_v62   ;;  %v3981_v53 = vld [vmem:[%s3362_s20 + $0xac] sm:$0xff]  ;;  %v3984_v54 = vld [vmem:[%s3362_s20 + $0xa4] sm:$0xff] }
 0x19b   : > { %v3974_v50 = vpop.permute.xlu1 %1248  ;;  %v3976_v49 = vpop.permute.xlu0 %1243 }
 0x19c   : > { %5949 = vst [vmem:[#allocation110_spill] sm:$0xff] %v3974_v50  ;;  %5950 = vst [vmem:[#allocation111_spill] sm:$0xff] %v3976_v49  ;;  %1798 = vperm.xlu1 %3313, %v3969_v57   ;;  %1793 = vperm.xlu0 %3312, %v3972_v58   ;;  %v3993_v49 = vld [vmem:[%s3362_s20 + $0xbc] sm:$0xff]  ;;  %v3996_v50 = vld [vmem:[%s3362_s20 + $0xb4] sm:$0xff] }
 0x19f   : > { %v3986_v46 = vpop.permute.xlu1 %1258  ;;  %v3988_v45 = vpop.permute.xlu0 %1253 }
 0x1a0   : > { %5951 = vst [vmem:[#allocation112_spill] sm:$0xff] %v3986_v46  ;;  %5952 = vst [vmem:[#allocation113_spill] sm:$0xff] %v3988_v45  ;;  %1808 = vperm.xlu1 %3313, %v3981_v53   ;;  %1803 = vperm.xlu0 %3312, %v3984_v54   ;;  %v4005_v45 = vld [vmem:[%s3362_s20 + $0xcc] sm:$0xff]  ;;  %v4008_v46 = vld [vmem:[%s3362_s20 + $0xc4] sm:$0xff] }
 0x1a3   : > { %v3998_v42 = vpop.permute.xlu1 %1268  ;;  %v4000_v41 = vpop.permute.xlu0 %1263 }
 0x1a4   : > { %5953 = vst [vmem:[#allocation114_spill] sm:$0xff] %v3998_v42  ;;  %5954 = vst [vmem:[#allocation115_spill] sm:$0xff] %v4000_v41  ;;  %1818 = vperm.xlu1 %3313, %v3993_v49   ;;  %1813 = vperm.xlu0 %3312, %v3996_v50   ;;  %v4017_v41 = vld [vmem:[%s3362_s20 + $0xdc] sm:$0xff]  ;;  %v4020_v42 = vld [vmem:[%s3362_s20 + $0xd4] sm:$0xff] }
 0x1a7   : > { %v4010_v38 = vpop.permute.xlu1 %1278  ;;  %v4012_v37 = vpop.permute.xlu0 %1273 }
 0x1a8   : > { %5955 = vst [vmem:[#allocation116_spill] sm:$0xff] %v4010_v38  ;;  %5956 = vst [vmem:[#allocation117_spill] sm:$0xff] %v4012_v37  ;;  %1828 = vperm.xlu1 %3313, %v4005_v45   ;;  %1823 = vperm.xlu0 %3312, %v4008_v46   ;;  %v4029_v37 = vld [vmem:[%s3362_s20 + $0xec] sm:$0xff]  ;;  %v4032_v38 = vld [vmem:[%s3362_s20 + $0xe4] sm:$0xff] }
 0x1ab   : > { %v4022_v34 = vpop.permute.xlu1 %1288  ;;  %v4024_v33 = vpop.permute.xlu0 %1283 }
 0x1ac   : > { %5957 = vst [vmem:[#allocation118_spill] sm:$0xff] %v4022_v34  ;;  %5958 = vst [vmem:[#allocation119_spill] sm:$0xff] %v4024_v33  ;;  %1838 = vperm.xlu1 %3313, %v4017_v41   ;;  %1833 = vperm.xlu0 %3312, %v4020_v42   ;;  %v4041_v33 = vld [vmem:[%s3362_s20 + $0xfc] sm:$0xff]  ;;  %v4044_v34 = vld [vmem:[%s3362_s20 + $0xf4] sm:$0xff] }
 0x1af   : > { %v4034_v30 = vpop.permute.xlu1 %1298  ;;  %v4036_v29 = vpop.permute.xlu0 %1293 }
 0x1b0   : > { %5959 = vst [vmem:[#allocation120_spill] sm:$0xff] %v4034_v30  ;;  %5960 = vst [vmem:[#allocation121_spill] sm:$0xff] %v4036_v29  ;;  %1848 = vperm.xlu1 %3313, %v4029_v37   ;;  %1843 = vperm.xlu0 %3312, %v4032_v38   ;;  %v4053_v29 = vld [vmem:[%s3362_s20 + $0x10c] sm:$0xff]  ;;  %v4056_v30 = vld [vmem:[%s3362_s20 + $0x104] sm:$0xff] }
 0x1b3   : > { %v4046_v26 = vpop.permute.xlu1 %1423  ;;  %v4048_v25 = vpop.permute.xlu0 %1418 }
 0x1b4   : > { %5961 = vst [vmem:[#allocation122_spill] sm:$0xff] %v4046_v26  ;;  %5962 = vst [vmem:[#allocation123_spill] sm:$0xff] %v4048_v25  ;;  %1858 = vperm.xlu1 %3313, %v4041_v33   ;;  %1853 = vperm.xlu0 %3312, %v4044_v34   ;;  %v4065_v26 = vld [vmem:[%s3362_s20 + $0x11c] sm:$0xff]  ;;  %v4068_v25 = vld [vmem:[%s3362_s20 + $0x114] sm:$0xff] }
 0x1b7   : > { %v4058_v22 = vpop.permute.xlu1 %1433  ;;  %v4060_v21 = vpop.permute.xlu0 %1428 }
 0x1b8   : > { %5963 = vst [vmem:[#allocation124_spill] sm:$0xff] %v4058_v22  ;;  %5964 = vst [vmem:[#allocation125_spill] sm:$0xff] %v4060_v21  ;;  %1868 = vperm.xlu1 %3313, %v4053_v29   ;;  %1863 = vperm.xlu0 %3312, %v4056_v30   ;;  %v4080_v22 = vld [vmem:[%s3362_s20 + $0x124] sm:$0xff] }
 0x1bb   : > { %v4070_v59 = vpop.permute.xlu1 %1443  ;;  %v4072_v63 = vpop.permute.xlu0 %1438 }
 0x1bc   : > { %5965 = vst [vmem:[#allocation126_spill] sm:$0xff] %v4070_v59  ;;  %5966 = vst [vmem:[#allocation127_spill] sm:$0xff] %v4072_v63  ;;  %1878 = vperm.xlu1 %3313, %v4065_v26   ;;  %1873 = vperm.xlu0 %3312, %v4068_v25  }
 0x1bf   : > { %v4082_v21 = vpop.permute.xlu1 %1453  ;;  %v4084_v51 = vpop.permute.xlu0 %1448 }
 0x1c0   : > { %5967 = vst [vmem:[#allocation128_spill] sm:$0xff] %v4082_v21  ;;  %5968 = vst [vmem:[#allocation129_spill] sm:$0xff] %v4084_v51  ;;  %1888 = vperm.xlu1 %3313, %v4077_v55   ;;  %1883 = vperm.xlu0 %3312, %v4080_v22  }
 0x1c3   : > { %v4088_v6 = vpop.permute.xlu1 %1463  ;;  %v4090_v59 = vpop.permute.xlu0 %1458 }
 0x1c4   : > { %5969 = vst [vmem:[#allocation130_spill] sm:$0xff] %v4090_v59  ;;  %2013 = vperm.xlu1 %3313, %v3885_v56   ;;  %2008 = vperm.xlu0 %3312, %v3888_v0  }
 0x1c7   : > { %v4094_v63 = vpop.permute.xlu1 %1473  ;;  %v4096_v52 = vpop.permute.xlu0 %1468 }
 0x1c8   : > { %2023 = vperm.xlu1 %3313, %v3897_v13   ;;  %2018 = vperm.xlu0 %3312, %v3900_v14  }
 0x1cb   : > { %v4100_v51 = vpop.permute.xlu1 %1483  ;;  %v4102_v21 = vpop.permute.xlu0 %1478 }
 0x1cc   : > { %5970 = vst [vmem:[#allocation131_spill] sm:$0xff] %v4100_v51  ;;  %5971 = vst [vmem:[#allocation132_spill] sm:$0xff] %v4102_v21  ;;  %2033 = vperm.xlu1 %3313, %v3909_v10   ;;  %2028 = vperm.xlu0 %3312, %v3912_v9   ;;  %v6072_v21 = vld [vmem:[#allocation30_spill] sm:$0xff] }
 0x1cf   : > { %v4106_v59 = vpop.permute.xlu1 %1493  ;;  %v4108_v56 = vpop.permute.xlu0 %1488 }
 0x1d0   : > { %5972 = vst [vmem:[#allocation133_spill] sm:$0xff] %v4106_v59  ;;  %5973 = vst [vmem:[#allocation134_spill] sm:$0xff] %v4108_v56  ;;  %2043 = vperm.xlu1 %3313, %v3921_v5   ;;  %2038 = vperm.xlu0 %3312, %v3924_v60   ;;  %v6061_v56 = vld [vmem:[#allocation21_spill] sm:$0xff] }
 0x1d3   : > { %v4112_v0 = vpop.permute.xlu1 %1503  ;;  %v4114_v13 = vpop.permute.xlu0 %1498 }
 0x1d4   : > { %5974 = vst [vmem:[#allocation135_spill] sm:$0xff] %v4112_v0  ;;  %5975 = vst [vmem:[#allocation136_spill] sm:$0xff] %v4114_v13  ;;  %2053 = vperm.xlu1 %3313, %v3933_v17   ;;  %2048 = vperm.xlu0 %3312, %v3936_v2  }
 0x1d7   : > { %v4118_v14 = vpop.permute.xlu1 %1513  ;;  %v4120_v10 = vpop.permute.xlu0 %1508 }
 0x1d8   : > { %5976 = vst [vmem:[#allocation137_spill] sm:$0xff] %v4118_v14  ;;  %5977 = vst [vmem:[#allocation138_spill] sm:$0xff] %v4120_v10  ;;  %2063 = vperm.xlu1 %3313, %v3945_v1   ;;  %2058 = vperm.xlu0 %3312, %v3948_v18   ;;  %v6056_v10 = vld [vmem:[#allocation12_spill] sm:$0xff] }
 0x1db   : > { %v4124_v9 = vpop.permute.xlu1 %1523  ;;  %v4126_v5 = vpop.permute.xlu0 %1518 }
 0x1dc   : > { %5978 = vst [vmem:[#allocation139_spill] sm:$0xff] %v4124_v9  ;;  %5979 = vst [vmem:[#allocation140_spill] sm:$0xff] %v4126_v5  ;;  %2073 = vperm.xlu1 %3313, %v3957_v61   ;;  %2068 = vperm.xlu0 %3312, %v3960_v62   ;;  %v6054_v5 = vld [vmem:[#allocation18_spill] sm:$0xff]  ;;  %v6055_v9 = vld [vmem:[#allocation19_spill] sm:$0xff] }
 0x1df   : > { %v4130_v60 = vpop.permute.xlu1 %1533  ;;  %v4132_v17 = vpop.permute.xlu0 %1528 }
 0x1e0   : > { %5980 = vst [vmem:[#allocation141_spill] sm:$0xff] %v4130_v60  ;;  %5981 = vst [vmem:[#allocation142_spill] sm:$0xff] %v4132_v17  ;;  %2083 = vperm.xlu1 %3313, %v3969_v57   ;;  %2078 = vperm.xlu0 %3312, %v3972_v58   ;;  %v6053_v60 = vld [vmem:[#allocation11_spill] sm:$0xff] }
 0x1e3   : > { %v4136_v2 = vpop.permute.xlu1 %1543  ;;  %v4138_v1 = vpop.permute.xlu0 %1538 }
 0x1e4   : > { %5982 = vst [vmem:[#allocation143_spill] sm:$0xff] %v4136_v2  ;;  %5983 = vst [vmem:[#allocation144_spill] sm:$0xff] %v4138_v1  ;;  %2093 = vperm.xlu1 %3313, %v3981_v53   ;;  %2088 = vperm.xlu0 %3312, %v3984_v54   ;;  %v6045_v1 = vld [vmem:[#allocation6_spill] sm:$0xff]  ;;  %v6046_v2 = vld [vmem:[#allocation15_spill] sm:$0xff] }
 0x1e7   : > { %v4142_v18 = vpop.permute.xlu1 %1553  ;;  %v4144_v61 = vpop.permute.xlu0 %1548 }
 0x1e8   : > { %5984 = vst [vmem:[#allocation145_spill] sm:$0xff] %v4142_v18  ;;  %5985 = vst [vmem:[#allocation146_spill] sm:$0xff] %v4144_v61  ;;  %2103 = vperm.xlu1 %3313, %v3993_v49   ;;  %2098 = vperm.xlu0 %3312, %v3996_v50  }
 0x1eb   : > { %v4148_v62 = vpop.permute.xlu1 %1563  ;;  %v4150_v57 = vpop.permute.xlu0 %1558 }
 0x1ec   : > { %5986 = vst [vmem:[#allocation147_spill] sm:$0xff] %v4148_v62  ;;  %5987 = vst [vmem:[#allocation148_spill] sm:$0xff] %v4150_v57  ;;  %2113 = vperm.xlu1 %3313, %v4005_v45   ;;  %2108 = vperm.xlu0 %3312, %v4008_v46  }
 0x1ef   : > { %v4154_v58 = vpop.permute.xlu1 %1573  ;;  %v4156_v53 = vpop.permute.xlu0 %1568 }
 0x1f0   : > { %5988 = vst [vmem:[#allocation149_spill] sm:$0xff] %v4154_v58  ;;  %5989 = vst [vmem:[#allocation150_spill] sm:$0xff] %v4156_v53  ;;  %2123 = vperm.xlu1 %3313, %v4017_v41   ;;  %2118 = vperm.xlu0 %3312, %v4020_v42  }
 0x1f3   : > { %v4160_v54 = vpop.permute.xlu1 %1583  ;;  %v4162_v49 = vpop.permute.xlu0 %1578 }
 0x1f4   : > { %5990 = vst [vmem:[#allocation151_spill] sm:$0xff] %v4160_v54  ;;  %5991 = vst [vmem:[#allocation152_spill] sm:$0xff] %v4162_v49  ;;  %2133 = vperm.xlu1 %3313, %v4029_v37   ;;  %2128 = vperm.xlu0 %3312, %v4032_v38  }
 0x1f7   : > { %v4166_v50 = vpop.permute.xlu1 %1593  ;;  %v4168_v45 = vpop.permute.xlu0 %1588 }
 0x1f8   : > { %5992 = vst [vmem:[#allocation153_spill] sm:$0xff] %v4166_v50  ;;  %5993 = vst [vmem:[#allocation154_spill] sm:$0xff] %v4168_v45  ;;  %2143 = vperm.xlu1 %3313, %v4041_v33   ;;  %2138 = vperm.xlu0 %3312, %v4044_v34  }
 0x1fb   : > { %v4172_v41 = vpop.permute.xlu1 %1718  ;;  %v4174_v42 = vpop.permute.xlu0 %1713 }
 0x1fc   : > { %5994 = vst [vmem:[#allocation155_spill] sm:$0xff] %v4172_v41  ;;  %5995 = vst [vmem:[#allocation156_spill] sm:$0xff] %v4174_v42  ;;  %2153 = vperm.xlu1 %3313, %v4053_v29   ;;  %2148 = vperm.xlu0 %3312, %v4056_v30   ;;  %v2002_v29 = vld [vmem:[%s3362_s20 + $0x13c] sm:$0xff]  ;;  %v2001_v30 = vld [vmem:[%s3362_s20 + $0x134] sm:$0xff] }
 0x1ff   : > { %v4178_v37 = vpop.permute.xlu1 %1728  ;;  %v4180_v38 = vpop.permute.xlu0 %1723 }
 0x200   : > { %5996 = vst [vmem:[#allocation157_spill] sm:$0xff] %v4178_v37  ;;  %5997 = vst [vmem:[#allocation158_spill] sm:$0xff] %v4180_v38  ;;  %2163 = vperm.xlu1 %3313, %v4065_v26   ;;  %2158 = vperm.xlu0 %3312, %v4068_v25   ;;  %v2263_v25 = vld [vmem:[%s3362_s20 + $0x2d] sm:$0xff]  ;;  %v2262_v26 = vld [vmem:[%s3362_s20 + $0x25] sm:$0xff] }
 0x203   : > { %v4184_v33 = vpop.permute.xlu1 %1738  ;;  %v4186_v34 = vpop.permute.xlu0 %1733 }
 0x204   : > { %5998 = vst [vmem:[#allocation159_spill] sm:$0xff] %v4184_v33  ;;  %5999 = vst [vmem:[#allocation160_spill] sm:$0xff] %v4186_v34  ;;  %2173 = vperm.xlu1 %3313, %v4077_v55   ;;  %2168 = vperm.xlu0 %3312, %v4080_v22   ;;  %v2265_v55 = vld [vmem:[%s3362_s20 + $0x3d] sm:$0xff]  ;;  %v2264_v22 = vld [vmem:[%s3362_s20 + $0x35] sm:$0xff] }
 0x207   : > { %v4192_v46 = vpop.permute.xlu1 %1748  ;;  %v4194_v38 = vpop.permute.xlu0 %1743 }
 0x208   : > { %6000 = vst [vmem:[#allocation161_spill] sm:$0xff] %v4192_v46  ;;  %6001 = vst [vmem:[#allocation162_spill] sm:$0xff] %v4194_v38  ;;  %2183 = vperm.xlu1 %3313, %v2002_v29   ;;  %2178 = vperm.xlu0 %3312, %v2001_v30   ;;  %v2267_v29 = vld [vmem:[%s3362_s20 + $0x4d] sm:$0xff]  ;;  %v2266_v30 = vld [vmem:[%s3362_s20 + $0x45] sm:$0xff] }
 0x20b   : > { %v4198_v33 = vpop.permute.xlu1 %1758  ;;  %v4200_v34 = vpop.permute.xlu0 %1753 }
 0x20c   : > { %6002 = vst [vmem:[#allocation163_spill] sm:$0xff] %v4198_v33  ;;  %6003 = vst [vmem:[#allocation164_spill] sm:$0xff] %v4200_v34  ;;  %2308 = vperm.xlu1 %3313, %v2263_v25   ;;  %2303 = vperm.xlu0 %3312, %v2262_v26   ;;  %v2269_v25 = vld [vmem:[%s3362_s20 + $0x5d] sm:$0xff]  ;;  %v2268_v26 = vld [vmem:[%s3362_s20 + $0x55] sm:$0xff] }
 0x20f   : > { %v4204_v37 = vpop.permute.xlu1 %1768  ;;  %v4206_v46 = vpop.permute.xlu0 %1763 }
 0x210   : > { %6004 = vst [vmem:[#allocation165_spill] sm:$0xff] %v4204_v37  ;;  %6005 = vst [vmem:[#allocation166_spill] sm:$0xff] %v4206_v46  ;;  %2318 = vperm.xlu1 %3313, %v2265_v55   ;;  %2313 = vperm.xlu0 %3312, %v2264_v22   ;;  %v2271_v55 = vld [vmem:[%s3362_s20 + $0x6d] sm:$0xff]  ;;  %v2270_v22 = vld [vmem:[%s3362_s20 + $0x65] sm:$0xff] }
 0x211   : > { %v6057_v37 = vld [vmem:[#allocation13_spill] sm:$0xff] }
 0x213   : > { %v4210_v38 = vpop.permute.xlu1 %1778  ;;  %v4212_v33 = vpop.permute.xlu0 %1773 }
 0x214   : > { %6006 = vst [vmem:[#allocation167_spill] sm:$0xff] %v4210_v38  ;;  %6007 = vst [vmem:[#allocation168_spill] sm:$0xff] %v4212_v33  ;;  %2328 = vperm.xlu1 %3313, %v2267_v29   ;;  %2323 = vperm.xlu0 %3312, %v2266_v30   ;;  %v2273_v29 = vld [vmem:[%s3362_s20 + $0x7d] sm:$0xff]  ;;  %v2272_v30 = vld [vmem:[%s3362_s20 + $0x75] sm:$0xff] }
 0x215   : > { %v6051_v33 = vld [vmem:[#allocation17_spill] sm:$0xff]  ;;  %v6052_v38 = vld [vmem:[#allocation10_spill] sm:$0xff] }
 0x217   : > { %v4216_v34 = vpop.permute.xlu1 %1788  ;;  %v4218_v42 = vpop.permute.xlu0 %1783 }
 0x218   : > { %6008 = vst [vmem:[#allocation169_spill] sm:$0xff] %v4216_v34  ;;  %6009 = vst [vmem:[#allocation170_spill] sm:$0xff] %v4218_v42  ;;  %2338 = vperm.xlu1 %3313, %v2269_v25   ;;  %2333 = vperm.xlu0 %3312, %v2268_v26   ;;  %v2275_v25 = vld [vmem:[%s3362_s20 + $0x8d] sm:$0xff]  ;;  %v2274_v26 = vld [vmem:[%s3362_s20 + $0x85] sm:$0xff] }
 0x219   : > { %v6047_v42 = vld [vmem:[#allocation16_spill] sm:$0xff] }
 0x21b   : > { %v4222_v41 = vpop.permute.xlu1 %1798  ;;  %v4224_v45 = vpop.permute.xlu0 %1793 }
 0x21c   : > { %6010 = vst [vmem:[#allocation171_spill] sm:$0xff] %v4222_v41  ;;  %6011 = vst [vmem:[#allocation172_spill] sm:$0xff] %v4224_v45  ;;  %2348 = vperm.xlu1 %3313, %v2271_v55   ;;  %2343 = vperm.xlu0 %3312, %v2270_v22   ;;  %v2277_v55 = vld [vmem:[%s3362_s20 + $0x9d] sm:$0xff]  ;;  %v2276_v22 = vld [vmem:[%s3362_s20 + $0x95] sm:$0xff] }
 0x21f   : > { %v4228_v50 = vpop.permute.xlu1 %1808  ;;  %v4230_v49 = vpop.permute.xlu0 %1803 }
 0x220   : > { %6012 = vst [vmem:[#allocation173_spill] sm:$0xff] %v4228_v50  ;;  %6013 = vst [vmem:[#allocation174_spill] sm:$0xff] %v4230_v49  ;;  %2358 = vperm.xlu1 %3313, %v2273_v29   ;;  %2353 = vperm.xlu0 %3312, %v2272_v30   ;;  %v2279_v29 = vld [vmem:[%s3362_s20 + $0xad] sm:$0xff]  ;;  %v2278_v30 = vld [vmem:[%s3362_s20 + $0xa5] sm:$0xff] }
 0x223   : > { %v4234_v54 = vpop.permute.xlu1 %1818  ;;  %v4236_v53 = vpop.permute.xlu0 %1813 }
 0x224   : > { %6014 = vst [vmem:[#allocation175_spill] sm:$0xff] %v4234_v54  ;;  %6015 = vst [vmem:[#allocation176_spill] sm:$0xff] %v4236_v53  ;;  %2368 = vperm.xlu1 %3313, %v2275_v25   ;;  %2363 = vperm.xlu0 %3312, %v2274_v26   ;;  %v2281_v25 = vld [vmem:[%s3362_s20 + $0xbd] sm:$0xff]  ;;  %v2280_v26 = vld [vmem:[%s3362_s20 + $0xb5] sm:$0xff] }
 0x227   : > { %v4240_v58 = vpop.permute.xlu1 %1828  ;;  %v4242_v57 = vpop.permute.xlu0 %1823 }
 0x228   : > { %6016 = vst [vmem:[#allocation177_spill] sm:$0xff] %v4240_v58  ;;  %6017 = vst [vmem:[#allocation178_spill] sm:$0xff] %v4242_v57  ;;  %2378 = vperm.xlu1 %3313, %v2277_v55   ;;  %2373 = vperm.xlu0 %3312, %v2276_v22   ;;  %v2283_v55 = vld [vmem:[%s3362_s20 + $0xcd] sm:$0xff]  ;;  %v2282_v22 = vld [vmem:[%s3362_s20 + $0xc5] sm:$0xff] }
 0x22b   : > { %v4246_v62 = vpop.permute.xlu1 %1838  ;;  %v4248_v54 = vpop.permute.xlu0 %1833 }
 0x22c   : > { %6018 = vst [vmem:[#allocation179_spill] sm:$0xff] %v4246_v62  ;;  %6019 = vst [vmem:[#allocation180_spill] sm:$0xff] %v4248_v54  ;;  %2388 = vperm.xlu1 %3313, %v2279_v29   ;;  %2383 = vperm.xlu0 %3312, %v2278_v30   ;;  %v2285_v29 = vld [vmem:[%s3362_s20 + $0xdd] sm:$0xff]  ;;  %v2284_v30 = vld [vmem:[%s3362_s20 + $0xd5] sm:$0xff] }
 0x22f   : > { %v4252_v53 = vpop.permute.xlu1 %1848  ;;  %v4254_v58 = vpop.permute.xlu0 %1843 }
 0x230   : > { %6020 = vst [vmem:[#allocation181_spill] sm:$0xff] %v4252_v53  ;;  %6021 = vst [vmem:[#allocation182_spill] sm:$0xff] %v4254_v58  ;;  %2398 = vperm.xlu1 %3313, %v2281_v25   ;;  %2393 = vperm.xlu0 %3312, %v2280_v26   ;;  %v2287_v25 = vld [vmem:[%s3362_s20 + $0xed] sm:$0xff]  ;;  %v2286_v26 = vld [vmem:[%s3362_s20 + $0xe5] sm:$0xff] }
 0x233   : > { %v4258_v57 = vpop.permute.xlu1 %1858  ;;  %v4260_v62 = vpop.permute.xlu0 %1853 }
 0x234   : > { %6022 = vst [vmem:[#allocation183_spill] sm:$0xff] %v4258_v57  ;;  %6023 = vst [vmem:[#allocation184_spill] sm:$0xff] %v4260_v62  ;;  %2408 = vperm.xlu1 %3313, %v2283_v55   ;;  %2403 = vperm.xlu0 %3312, %v2282_v22   ;;  %v416_v62 = vlaneseq  ;;  %v2289_v55 = vld [vmem:[%s3362_s20 + $0xfd] sm:$0xff]  ;;  %v2288_v22 = vld [vmem:[%s3362_s20 + $0xf5] sm:$0xff] }
 0x237   : > { %v4264_v54 = vpop.permute.xlu1 %1868  ;;  %v4266_v53 = vpop.permute.xlu0 %1863 }
 0x238   : > { %6024 = vst [vmem:[#allocation185_spill] sm:$0xff] %v4264_v54  ;;  %6025 = vst [vmem:[#allocation186_spill] sm:$0xff] %v4266_v53  ;;  %2418 = vperm.xlu1 %3313, %v2285_v29   ;;  %2413 = vperm.xlu0 %3312, %v2284_v30   ;;  %v417_v29 = vshrl.u32 %v416_v62, 7  ;;  %v234_v30 = vld [vmem:[%s5837_s1] sm:$0x1] }
 0x239   : > { %v3217_v62 = vld [vmem:[%s5837_s1 + $0x1] sm:$0x1] }
 0x23b   : > { %v4270_v58 = vpop.permute.xlu1 %1878  ;;  %v4272_v57 = vpop.permute.xlu0 %1873 }
 0x23c   : > { %6026 = vst [vmem:[#allocation187_spill] sm:$0xff] %v4270_v58  ;;  %6027 = vst [vmem:[#allocation188_spill] sm:$0xff] %v4272_v57  ;;  %2428 = vperm.xlu1 %3313, %v2287_v25   ;;  %2423 = vperm.xlu0 %3312, %v2286_v26   ;;  %v2291_v58 = vld [vmem:[%s3362_s20 + $0x10d] sm:$0xff]  ;;  %v2290_v57 = vld [vmem:[%s3362_s20 + $0x105] sm:$0xff]  ;;  %v235_v26 = vunpack.c.l.bf16 %v234_v30 }
 0x23d   : > { %v2295_v30 = vld [vmem:[%s3362_s20 + $0x12d] sm:$0xff] }
 0x23f   : > { %v4276_v49 = vpop.permute.xlu1 %1888  ;;  %v4278_v53 = vpop.permute.xlu0 %1883 }
 0x240   : > { %6028 = vst [vmem:[#allocation189_spill] sm:$0xff] %v4276_v49  ;;  %6029 = vst [vmem:[#allocation190_spill] sm:$0xff] %v4278_v53  ;;  %2438 = vperm.xlu1 %3313, %v2289_v55   ;;  %2433 = vperm.xlu0 %3312, %v2288_v22   ;;  %v4289_v49 = vsub.s32 0, %v417_v29  ;;  %v2293_v55 = vld [vmem:[%s3362_s20 + $0x11d] sm:$0xff]  ;;  %v2292_v22 = vld [vmem:[%s3362_s20 + $0x115] sm:$0xff]  ;;  %v530_v53 = vunpack.c.l.bf16 %v3217_v62 }
 0x242   : > { %v4304_v29 = vrot.slane %v235_v26, %v4289_v49  ;;  %v4309_v62 = vrot.slane %v530_v53, %v4289_v49 }
 0x243   : > { %v4285_v54 = vpop.permute.xlu1 %2013  ;;  %v4287_v25 = vpop.permute.xlu0 %2008 }
 0x244   : > { %6030 = vst [vmem:[#allocation191_spill] sm:$0xff] %v4285_v54  ;;  %6031 = vst [vmem:[#allocation192_spill] sm:$0xff] %v4287_v25  ;;  %2448 = vperm.xlu1 %3313, %v2291_v58   ;;  %2443 = vperm.xlu0 %3312, %v2290_v57   ;;  %v3218_v54 = vld [vmem:[%s5837_s1 + $0x2] sm:$0x1]  ;;  %v2294_v57 = vld [vmem:[%s3362_s20 + $0x125] sm:$0xff]  ;;  %v4321_v26 = vmul.f32 %v4304_v29, %v3432_v4  ;;  %v421_v53 = vmul.f32 %v4304_v29, %v3438_v8 }
 0x245   : > { %v825_v58 = vunpack.c.l.bf16 %v3218_v54  ;;  %v4331_v54 = vmul.f32 %v4304_v29, %v3442_v11  ;;  %v4339_v4 = vmul.f32 %v4304_v29, %v3448_v15  ;;  %v4349_v8 = vmul.f32 %v4304_v29, %v3454_v19 }
 0x246   : > { %v4353_v11 = vmul.f32 %v4304_v29, %v3456_v20  ;;  %v4360_v15 = vmul.f32 %v4304_v29, %v3464_v23  ;;  %v4368_v19 = vmul.f32 %v4304_v29, %v3476_v27  ;;  %v4372_v20 = vmul.f32 %v4304_v29, %v3478_v28 }
 0x247   : > { %v4299_v50 = vpop.permute.xlu1 %2023  ;;  %v4301_v25 = vpop.permute.xlu0 %2018  ;;  %v4380_v23 = vmul.f32 %v4304_v29, %v3488_v31  ;;  %v4388_v27 = vmul.f32 %v4304_v29, %v3500_v35  ;;  %v4392_v28 = vmul.f32 %v4304_v29, %v3502_v36  ;;  %v4400_v31 = vmul.f32 %v4304_v29, %v3514_v40  ;;  %v2558_v35 = vld [vmem:[%s3362_s20 + $0x2e] sm:$0xff]  ;;  %v6038_v40 = vld [vmem:[#allocation2_spill] sm:$0xff] }
 0x248   : > { %6032 = vst [vmem:[#allocation193_spill] sm:$0xff] %v4299_v50  ;;  %6033 = vst [vmem:[#allocation194_spill] sm:$0xff] %v4301_v25  ;;  %2458 = vperm.xlu1 %3313, %v2293_v55   ;;  %2453 = vperm.xlu0 %3312, %v2292_v22   ;;  %v4317_v25 = vmul.f32 %v4304_v29, %v3430_v3  ;;  %v4325_v55 = vmul.f32 %v4304_v29, %v3436_v7  ;;  %v2297_v22 = vld [vmem:[%s3362_s20 + $0x13d] sm:$0xff]  ;;  %v2296_v7 = vld [vmem:[%s3362_s20 + $0x135] sm:$0xff] }
 0x249   : > { %v4335_v3 = vmul.f32 %v4304_v29, %v3444_v12  ;;  %v4356_v12 = vrot.slane %v825_v58, %v4289_v49  ;;  %v4414_v36 = vmul.f32 %v4304_v29, %v3536_v47  ;;  %v6041_v50 = vld [vmem:[#allocation5_spill] sm:$0xff]  ;;  %v718_v34 = vmul.f32 %v4309_v62, %v6047_v42  ;;  %v3219_v42 = vld [vmem:[%s5837_s1 + $0x3] sm:$0x1] }
 0x24a   : > { %v4434_v47 = vmul.f32 %v4304_v29, %v6041_v50  ;;  %v6048_v50 = vld [vmem:[#allocation7_spill] sm:$0xff]  ;;  %v4483_v46 = vmul.f32 %v4304_v29, %v6056_v10  ;;  %v4487_v14 = vmul.f32 %v4304_v29, %v6057_v37  ;;  %v721_v37 = vmul.f32 %v4309_v62, %v6061_v56 }
 0x24b   : > { %v4311_v61 = vpop.permute.xlu1 %2033  ;;  %v4313_v45 = vpop.permute.xlu0 %2028  ;;  %v4452_v17 = vmul.f32 %v4304_v29, %v6048_v50  ;;  %v4471_v50 = vmul.f32 %v4304_v29, %v6052_v38  ;;  %v4501_v10 = vadd.f32 %v718_v34, %v4325_v55  ;;  %v2562_v34 = vld [vmem:[%s3362_s20 + $0x4e] sm:$0xff]  ;;  %v2561_v55 = vld [vmem:[%s3362_s20 + $0x46] sm:$0xff] }
 0x24c   : > { %6034 = vst [vmem:[#allocation195_spill] sm:$0xff] %v4311_v61  ;;  %6035 = vst [vmem:[#allocation196_spill] sm:$0xff] %v4313_v45  ;;  %2468 = vperm.xlu1 %3313, %v2295_v30   ;;  %2463 = vperm.xlu0 %3312, %v2294_v57   ;;  %v4345_v30 = vmul.f32 %v4304_v29, %v3450_v16  ;;  %v4364_v16 = vmul.f32 %v4304_v29, %v3466_v24  ;;  %v6040_v61 = vld [vmem:[#allocation4_spill] sm:$0xff] }
 0x24d   : > { %v4384_v24 = vmul.f32 %v4304_v29, %v3490_v32  ;;  %v4404_v32 = vmul.f32 %v4304_v29, %v3524_v43  ;;  %v6039_v43 = vld [vmem:[#allocation3_spill] sm:$0xff] }
 0x24e   : > { %v4426_v45 = vmul.f32 %v4304_v29, %v6039_v43  ;;  %v4444_v43 = vmul.f32 %v4304_v29, %v6045_v1 }
 0x24f   : > { %v4374_v57 = vpop.permute.xlu1 %2043  ;;  %v4376_v58 = vpop.permute.xlu0 %2038 }
 0x250   : > { %6036 = vst [vmem:[#allocation197_spill] sm:$0xff] %v4374_v57  ;;  %6037 = vst [vmem:[#allocation198_spill] sm:$0xff] %v4376_v58  ;;  %2478 = vperm.xlu1 %3313, %v2297_v22   ;;  %2473 = vperm.xlu0 %3312, %v2296_v7   ;;  %v4396_v58 = vmul.f32 %v4304_v29, %v3512_v39  ;;  %v2557_v57 = vld [vmem:[%s3362_s20 + $0x26] sm:$0xff]  ;;  %v4410_v22 = vmul.f32 %v4304_v29, %v3526_v44 }
 0x251   : > { %v4418_v39 = vmul.f32 %v4304_v29, %v3538_v48  ;;  %v4422_v7 = vmul.f32 %v4304_v29, %v6038_v40  ;;  %v4430_v44 = vmul.f32 %v4304_v29, %v6040_v61  ;;  %v6042_v48 = vld [vmem:[#allocation14_spill] sm:$0xff]  ;;  %v715_v61 = vmul.f32 %v4309_v62, %v6046_v2 }
 0x252   : > { %v716_v41 = vmul.f32 %v4309_v62, %v6042_v48  ;;  %v6049_v48 = vld [vmem:[#allocation8_spill] sm:$0xff]  ;;  %v717_v2 = vmul.f32 %v4309_v62, %v6051_v33  ;;  %v719_v33 = vmul.f32 %v4309_v62, %v6055_v9 }
 0x253   : > { %v4438_v18 = vpop.permute.xlu1 %2053  ;;  %v4440_v40 = vpop.permute.xlu0 %2048  ;;  %v4498_v9 = vadd.f32 %v715_v61, %v4321_v26  ;;  %v6064_v26 = vld [vmem:[#allocation24_spill] sm:$0xff] }
 0x254   : > { %6043 = vst [vmem:[#allocation2_spill] sm:$0xff] %v4438_v18  ;;  %6044 = vst [vmem:[#allocation3_spill] sm:$0xff] %v4440_v40  ;;  %2603 = vperm.xlu1 %3313, %v2558_v35   ;;  %2598 = vperm.xlu0 %3312, %v2557_v57   ;;  %v4456_v18 = vmul.f32 %v4304_v29, %v6049_v48  ;;  %v6050_v40 = vld [vmem:[#allocation9_spill] sm:$0xff]  ;;  %v4475_v48 = vmul.f32 %v4304_v29, %v6053_v60  ;;  %v6058_v60 = vld [vmem:[#allocation20_spill] sm:$0xff] }
 0x255   : > { %v4460_v1 = vmul.f32 %v4304_v29, %v6050_v40  ;;  %v2560_v57 = vld [vmem:[%s3362_s20 + $0x3e] sm:$0xff]  ;;  %v2559_v35 = vld [vmem:[%s3362_s20 + $0x36] sm:$0xff]  ;;  %v720_v40 = vmul.f32 %v4309_v62, %v6054_v5  ;;  %v4489_v38 = vadd.f32 %v716_v41, %v421_v53  ;;  %v722_v13 = vmul.f32 %v4309_v62, %v6058_v60 }
 0x256   : > { %v1120_v29 = vunpack.c.l.bf16 %v3219_v42  ;;  %v4506_v41 = vadd.f32 %v717_v2, %v4317_v25  ;;  %v6062_v53 = vld [vmem:[#allocation22_spill] sm:$0xff]  ;;  %v726_v61 = vmul.f32 %v4309_v62, %v6064_v26  ;;  %v4520_v56 = vadd.f32 %v719_v33, %v4335_v3  ;;  %v6065_v42 = vld [vmem:[#allocation25_spill] sm:$0xff]  ;;  %v6068_v26 = vld [vmem:[#allocation28_spill] sm:$0xff] }
 0x257   : > { %v4493_v0 = vpop.permute.xlu1 %2063  ;;  %v4495_v5 = vpop.permute.xlu0 %2058  ;;  %v724_v60 = vmul.f32 %v4309_v62, %v6062_v53  ;;  %v4517_v59 = vadd.f32 %v720_v40, %v4331_v54  ;;  %v725_v25 = vmul.f32 %v4309_v62, %v6065_v42  ;;  %v6066_v2 = vld [vmem:[#allocation26_spill] sm:$0xff]  ;;  %v730_v54 = vmul.f32 %v4309_v62, %v6068_v26  ;;  %v6069_v40 = vld [vmem:[#allocation29_spill] sm:$0xff] }
 0x258   : > { %6059 = vst [vmem:[#allocation4_spill] sm:$0xff] %v4493_v0  ;;  %6060 = vst [vmem:[#allocation5_spill] sm:$0xff] %v4495_v5  ;;  %2613 = vperm.xlu1 %3313, %v2560_v57   ;;  %2608 = vperm.xlu0 %3312, %v2559_v35   ;;  %v6063_v0 = vld [vmem:[#allocation23_spill] sm:$0xff]  ;;  %v728_v57 = vmul.f32 %v4309_v62, %v6066_v2  ;;  %v729_v3 = vmul.f32 %v4309_v62, %v6069_v40 }
 0x259   : > { %v723_v5 = vmul.f32 %v4309_v62, %v6063_v0  ;;  %v4527_v0 = vadd.f32 %v722_v13, %v4339_v4  ;;  %v6067_v35 = vld [vmem:[#allocation27_spill] sm:$0xff]  ;;  %v4540_v2 = vadd.f32 %v721_v37, %v4345_v30  ;;  %v732_v13 = vmul.f32 %v4309_v62, %v6072_v21  ;;  %v2564_v37 = vld [vmem:[%s3362_s20 + $0x5e] sm:$0xff] }
 0x25a   : > { %v727_v53 = vmul.f32 %v4309_v62, %v6067_v35  ;;  %v4545_v4 = vrot.slane %v1120_v29, %v4289_v49  ;;  %v4548_v35 = vadd.f32 %v724_v60, %v4349_v8  ;;  %v4554_v40 = vadd.f32 %v726_v61, %v4360_v15  ;;  %v6075_v60 = vld [vmem:[#allocation33_spill] sm:$0xff]  ;;  %v6076_v61 = vld [vmem:[#allocation34_spill] sm:$0xff] }
 0x25b   : > { %v4535_v33 = vpop.permute.xlu1 %2073  ;;  %v4537_v42 = vpop.permute.xlu0 %2068  ;;  %v4551_v26 = vadd.f32 %v723_v5, %v4353_v11  ;;  %v4561_v21 = vadd.f32 %v725_v25, %v4364_v16  ;;  %v4564_v29 = vadd.f32 %v728_v57, %v4368_v19  ;;  %v733_v11 = vmul.f32 %v4309_v62, %v6075_v60 }
 0x25c   : > { %6070 = vst [vmem:[#allocation14_spill] sm:$0xff] %v4535_v33  ;;  %6071 = vst [vmem:[#allocation6_spill] sm:$0xff] %v4537_v42  ;;  %2623 = vperm.xlu1 %3313, %v2562_v34   ;;  %2618 = vperm.xlu0 %3312, %v2561_v55   ;;  %v6073_v42 = vld [vmem:[#allocation31_spill] sm:$0xff]  ;;  %v2563_v33 = vld [vmem:[%s3362_s20 + $0x56] sm:$0xff]  ;;  %v4571_v15 = vadd.f32 %v727_v53, %v4372_v20  ;;  %v4574_v5 = vadd.f32 %v730_v54, %v4380_v23 }
 0x25d   : > { %v731_v30 = vmul.f32 %v4309_v62, %v6073_v42  ;;  %v6074_v34 = vld [vmem:[#allocation32_spill] sm:$0xff]  ;;  %v4577_v16 = vadd.f32 %v729_v3, %v4384_v24  ;;  %v736_v19 = vmul.f32 %v4309_v62, %v6076_v61  ;;  %v4586_v57 = vadd.f32 %v732_v13, %v4388_v27  ;;  %v6079_v42 = vld [vmem:[#allocation35_spill] sm:$0xff]  ;;  %v6081_v54 = vld [vmem:[#allocation37_spill] sm:$0xff] }
 0x25e   : > { %v734_v8 = vmul.f32 %v4309_v62, %v6074_v34  ;;  %v735_v20 = vmul.f32 %v4309_v62, %v6079_v42  ;;  %v6080_v53 = vld [vmem:[#allocation36_spill] sm:$0xff]  ;;  %v737_v3 = vmul.f32 %v4309_v62, %v6081_v54  ;;  %v6082_v34 = vld [vmem:[#allocation38_spill] sm:$0xff]  ;;  %v6083_v61 = vld [vmem:[#allocation39_spill] sm:$0xff] }
 0x25f   : > { %v4581_v55 = vpop.permute.xlu1 %2083  ;;  %v4583_v25 = vpop.permute.xlu0 %2078  ;;  %v738_v23 = vmul.f32 %v4309_v62, %v6080_v53  ;;  %v4593_v24 = vadd.f32 %v731_v30, %v4392_v28  ;;  %v740_v60 = vmul.f32 %v4309_v62, %v6082_v34  ;;  %v739_v27 = vmul.f32 %v4309_v62, %v6083_v61  ;;  %v2566_v13 = vld [vmem:[%s3362_s20 + $0x6e] sm:$0xff]  ;;  %v6085_v30 = vld [vmem:[#allocation41_spill] sm:$0xff]  ;;  %v6086_v34 = vld [vmem:[#allocation42_spill] sm:$0xff] }
 0x260   : > { %6077 = vst [vmem:[#allocation15_spill] sm:$0xff] %v4581_v55  ;;  %6078 = vst [vmem:[#allocation16_spill] sm:$0xff] %v4583_v25  ;;  %2633 = vperm.xlu1 %3313, %v2564_v37   ;;  %2628 = vperm.xlu0 %3312, %v2563_v33   ;;  %v2565_v25 = vld [vmem:[%s3362_s20 + $0x66] sm:$0xff]  ;;  %v4604_v42 = vadd.f32 %v734_v8, %v4396_v58  ;;  %v4607_v37 = vadd.f32 %v733_v11, %v4400_v31  ;;  %v6084_v33 = vld [vmem:[#allocation40_spill] sm:$0xff] }
 0x261   : > { %v742_v28 = vmul.f32 %v4309_v62, %v6084_v33  ;;  %v741_v53 = vmul.f32 %v4309_v62, %v6085_v30  ;;  %v4614_v54 = vadd.f32 %v736_v19, %v4404_v32  ;;  %v744_v61 = vmul.f32 %v4309_v62, %v6086_v34  ;;  %v6087_v55 = vld [vmem:[#allocation43_spill] sm:$0xff]  ;;  %v6088_v8 = vld [vmem:[#allocation44_spill] sm:$0xff]  ;;  %v6091_v19 = vld [vmem:[#allocation45_spill] sm:$0xff] }
 0x262   : > { %v743_v58 = vmul.f32 %v4309_v62, %v6087_v55  ;;  %v746_v31 = vmul.f32 %v4309_v62, %v6088_v8  ;;  %v4627_v30 = vadd.f32 %v735_v20, %v4410_v22  ;;  %v4630_v32 = vadd.f32 %v738_v23, %v4414_v36  ;;  %v2568_v20 = vld [vmem:[%s3362_s20 + $0x7e] sm:$0xff]  ;;  %v2567_v36 = vld [vmem:[%s3362_s20 + $0x76] sm:$0xff] }
 0x263   : > { %v4622_v11 = vpop.permute.xlu1 %2093  ;;  %v4624_v33 = vpop.permute.xlu0 %2088  ;;  %v745_v51 = vmul.f32 %v4309_v62, %v6091_v19  ;;  %v4635_v55 = vadd.f32 %v737_v3, %v4418_v39  ;;  %v4638_v34 = vadd.f32 %v740_v60, %v4422_v7  ;;  %v4641_v8 = vadd.f32 %v739_v27, %v4426_v45  ;;  %v6094_v3 = vld [vmem:[#allocation48_spill] sm:$0xff]  ;;  %v6095_v27 = vld [vmem:[#allocation49_spill] sm:$0xff]  ;;  %v6099_v19 = vld [vmem:[#allocation51_spill] sm:$0xff] }
 0x264   : > { %6089 = vst [vmem:[#allocation7_spill] sm:$0xff] %v4622_v11  ;;  %6090 = vst [vmem:[#allocation8_spill] sm:$0xff] %v4624_v33  ;;  %2643 = vperm.xlu1 %3313, %v2566_v13   ;;  %2638 = vperm.xlu0 %3312, %v2565_v25   ;;  %v6092_v33 = vld [vmem:[#allocation46_spill] sm:$0xff]  ;;  %v4648_v23 = vadd.f32 %v742_v28, %v4430_v44  ;;  %v4651_v13 = vadd.f32 %v741_v53, %v4434_v47  ;;  %v6093_v25 = vld [vmem:[#allocation47_spill] sm:$0xff] }
 0x265   : > { %v748_v22 = vmul.f32 %v4309_v62, %v6092_v33  ;;  %v747_v39 = vmul.f32 %v4309_v62, %v6093_v25  ;;  %v750_v7 = vmul.f32 %v4309_v62, %v6094_v3  ;;  %v4658_v45 = vadd.f32 %v744_v61, %v4444_v43  ;;  %v6098_v43 = vld [vmem:[#allocation50_spill] sm:$0xff] }
 0x266   : > { %v4661_v60 = vadd.f32 %v743_v58, %v4452_v17  ;;  %v4664_v44 = vadd.f32 %v746_v31, %v4456_v18  ;;  %v749_v47 = vmul.f32 %v4309_v62, %v6095_v27  ;;  %v4673_v33 = vadd.f32 %v745_v51, %v4460_v1  ;;  %v3220_v18 = vld [vmem:[%s5837_s1 + $0x4] sm:$0x1]  ;;  %v6100_v58 = vld [vmem:[#allocation52_spill] sm:$0xff]  ;;  %v6101_v51 = vld [vmem:[#allocation53_spill] sm:$0xff] }
 0x267   : > { %v4668_v28 = vpop.permute.xlu1 %2103  ;;  %v4670_v53 = vpop.permute.xlu0 %2098  ;;  %v1011_v61 = vmul.f32 %v4356_v12, %v6098_v43  ;;  %v1010_v17 = vmul.f32 %v4356_v12, %v6099_v19  ;;  %v4683_v62 = vadd.f32 %v748_v22, %v4471_v50  ;;  %v1013_v31 = vmul.f32 %v4356_v12, %v6100_v58  ;;  %v6102_v25 = vld [vmem:[#allocation54_spill] sm:$0xff]  ;;  %v2570_v27 = vld [vmem:[%s3362_s20 + $0x8e] sm:$0xff] }
 0x268   : > { %6096 = vst [vmem:[#allocation9_spill] sm:$0xff] %v4668_v28  ;;  %6097 = vst [vmem:[#allocation17_spill] sm:$0xff] %v4670_v53  ;;  %2653 = vperm.xlu1 %3313, %v2568_v20   ;;  %2648 = vperm.xlu0 %3312, %v2567_v36   ;;  %v1012_v1 = vmul.f32 %v4356_v12, %v6101_v51  ;;  %v1015_v3 = vmul.f32 %v4356_v12, %v6102_v25  ;;  %v2569_v43 = vld [vmem:[%s3362_s20 + $0x86] sm:$0xff]  ;;  %v6104_v22 = vld [vmem:[#allocation56_spill] sm:$0xff] }
 0x269   : > { %v4694_v19 = vadd.f32 %v747_v39, %v4475_v48  ;;  %v4697_v20 = vadd.f32 %v750_v7, %v4483_v46  ;;  %v6103_v36 = vld [vmem:[#allocation55_spill] sm:$0xff]  ;;  %v1017_v58 = vmul.f32 %v4356_v12, %v6104_v22  ;;  %v4704_v51 = vadd.f32 %v749_v47, %v4487_v14  ;;  %v6105_v53 = vld [vmem:[#allocation57_spill] sm:$0xff]  ;;  %v6106_v28 = vld [vmem:[#allocation58_spill] sm:$0xff] }
 0x26a   : > { %v1014_v50 = vmul.f32 %v4356_v12, %v6103_v36  ;;  %v1016_v25 = vmul.f32 %v4356_v12, %v6105_v53  ;;  %v1019_v48 = vmul.f32 %v4356_v12, %v6106_v28  ;;  %v1415_v39 = vunpack.c.l.bf16 %v3220_v18  ;;  %v6109_v14 = vld [vmem:[#allocation59_spill] sm:$0xff] }
 0x26b   : > { %v4710_v46 = vpop.permute.xlu1 %2113  ;;  %v4712_v7 = vpop.permute.xlu0 %2108  ;;  %v4715_v36 = vadd.f32 %v1011_v61, %v4489_v38  ;;  %v4718_v22 = vadd.f32 %v1010_v17, %v4498_v9  ;;  %v1018_v47 = vmul.f32 %v4356_v12, %v6109_v14  ;;  %v4723_v53 = vadd.f32 %v1013_v31, %v4501_v10  ;;  %v2572_v61 = vld [vmem:[%s3362_s20 + $0x9e] sm:$0xff]  ;;  %v2571_v9 = vld [vmem:[%s3362_s20 + $0x96] sm:$0xff] }
 0x26c   : > { %6107 = vst [vmem:[#allocation10_spill] sm:$0xff] %v4710_v46  ;;  %6108 = vst [vmem:[#allocation11_spill] sm:$0xff] %v4712_v7  ;;  %2663 = vperm.xlu1 %3313, %v2570_v27   ;;  %2658 = vperm.xlu0 %3312, %v2569_v43   ;;  %v4726_v28 = vadd.f32 %v1012_v1, %v4506_v41  ;;  %v4729_v18 = vadd.f32 %v1015_v3, %v4517_v59  ;;  %v6110_v7 = vld [vmem:[#allocation60_spill] sm:$0xff]  ;;  %v6111_v43 = vld [vmem:[#allocation61_spill] sm:$0xff] }
 0x26d   : > { %v1021_v38 = vmul.f32 %v4356_v12, %v6110_v7  ;;  %v4736_v17 = vadd.f32 %v1014_v50, %v4520_v56  ;;  %v4739_v27 = vadd.f32 %v1017_v58, %v4527_v0  ;;  %v1020_v10 = vmul.f32 %v4356_v12, %v6111_v43  ;;  %v6112_v31 = vld [vmem:[#allocation62_spill] sm:$0xff]  ;;  %v6113_v3 = vld [vmem:[#allocation63_spill] sm:$0xff]  ;;  %v6116_v14 = vld [vmem:[#allocation64_spill] sm:$0xff] }
 0x26e   : > { %v1023_v41 = vmul.f32 %v4356_v12, %v6112_v31  ;;  %v4746_v59 = vadd.f32 %v1016_v25, %v4540_v2  ;;  %v4749_v1 = vadd.f32 %v1019_v48, %v4548_v35  ;;  %v1022_v56 = vmul.f32 %v4356_v12, %v6113_v3  ;;  %v6117_v25 = vld [vmem:[#allocation65_spill] sm:$0xff]  ;;  %v6119_v31 = vld [vmem:[#allocation67_spill] sm:$0xff]  ;;  %v6124_v46 = vld [vmem:[#allocation72_spill] sm:$0xff] }
 0x26f   : > { %v4754_v0 = vrot.slane %v1415_v39, %v4289_v49  ;;  %v4756_v50 = vpop.permute.xlu1 %2123  ;;  %v4758_v58 = vpop.permute.xlu0 %2118  ;;  %v4761_v7 = vadd.f32 %v1018_v47, %v4551_v26  ;;  %v1025_v2 = vmul.f32 %v4356_v12, %v6116_v14  ;;  %v1024_v35 = vmul.f32 %v4356_v12, %v6117_v25  ;;  %v6118_v39 = vld [vmem:[#allocation66_spill] sm:$0xff]  ;;  %v2574_v47 = vld [vmem:[%s3362_s20 + $0xae] sm:$0xff] }
 0x270   : > { %6114 = vst [vmem:[#allocation18_spill] sm:$0xff] %v4756_v50  ;;  %6115 = vst [vmem:[#allocation19_spill] sm:$0xff] %v4758_v58  ;;  %2673 = vperm.xlu1 %3313, %v2572_v61   ;;  %2668 = vperm.xlu0 %3312, %v2571_v9   ;;  %v4768_v48 = vadd.f32 %v1021_v38, %v4554_v40  ;;  %v1027_v43 = vmul.f32 %v4356_v12, %v6118_v39  ;;  %v6120_v58 = vld [vmem:[#allocation68_spill] sm:$0xff]  ;;  %v2573_v50 = vld [vmem:[%s3362_s20 + $0xa6] sm:$0xff] }
 0x271   : > { %v1026_v3 = vmul.f32 %v4356_v12, %v6119_v31  ;;  %v1029_v26 = vmul.f32 %v4356_v12, %v6120_v58  ;;  %v4779_v14 = vadd.f32 %v1020_v10, %v4561_v21  ;;  %v4782_v61 = vadd.f32 %v1023_v41, %v4564_v29  ;;  %v6121_v9 = vld [vmem:[#allocation69_spill] sm:$0xff]  ;;  %v6122_v38 = vld [vmem:[#allocation70_spill] sm:$0xff]  ;;  %v6123_v31 = vld [vmem:[#allocation71_spill] sm:$0xff] }
 0x272   : > { %v1028_v40 = vmul.f32 %v4356_v12, %v6121_v9  ;;  %v1031_v25 = vmul.f32 %v4356_v12, %v6122_v38  ;;  %v4789_v39 = vadd.f32 %v1022_v56, %v4571_v15  ;;  %v1030_v58 = vmul.f32 %v4356_v12, %v6123_v31  ;;  %v6125_v10 = vld [vmem:[#allocation73_spill] sm:$0xff]  ;;  %v6128_v56 = vld [vmem:[#allocation74_spill] sm:$0xff] }
 0x273   : > { %v1033_v21 = vmul.f32 %v4356_v12, %v6124_v46  ;;  %v1032_v29 = vmul.f32 %v4356_v12, %v6125_v10  ;;  %v4797_v41 = vpop.permute.xlu1 %2133  ;;  %v4799_v9 = vpop.permute.xlu0 %2128  ;;  %v4802_v38 = vadd.f32 %v1025_v2, %v4574_v5  ;;  %v4805_v15 = vadd.f32 %v1024_v35, %v4577_v16  ;;  %v2576_v2 = vld [vmem:[%s3362_s20 + $0xbe] sm:$0xff]  ;;  %v2575_v16 = vld [vmem:[%s3362_s20 + $0xb6] sm:$0xff] }
 0x274   : > { %6126 = vst [vmem:[#allocation12_spill] sm:$0xff] %v4797_v41  ;;  %6127 = vst [vmem:[#allocation13_spill] sm:$0xff] %v4799_v9  ;;  %v1035_v11 = vmul.f32 %v4356_v12, %v6128_v56  ;;  %2683 = vperm.xlu1 %3313, %v2574_v47   ;;  %2678 = vperm.xlu0 %3312, %v2573_v50   ;;  %v4810_v46 = vadd.f32 %v1027_v43, %v4586_v57  ;;  %v6129_v9 = vld [vmem:[#allocation75_spill] sm:$0xff]  ;;  %v6130_v50 = vld [vmem:[#allocation76_spill] sm:$0xff] }
 0x275   : > { %v4813_v31 = vadd.f32 %v1026_v3, %v4593_v24  ;;  %v4816_v10 = vadd.f32 %v1029_v26, %v4604_v42  ;;  %v1034_v5 = vmul.f32 %v4356_v12, %v6129_v9  ;;  %v4823_v35 = vadd.f32 %v1028_v40, %v4607_v37  ;;  %v6131_v43 = vld [vmem:[#allocation77_spill] sm:$0xff]  ;;  %v6132_v26 = vld [vmem:[#allocation78_spill] sm:$0xff]  ;;  %v6135_v56 = vld [vmem:[#allocation79_spill] sm:$0xff] }
 0x276   : > { %v4826_v47 = vadd.f32 %v1031_v25, %v4614_v54  ;;  %v1037_v57 = vmul.f32 %v4356_v12, %v6130_v50  ;;  %v1036_v24 = vmul.f32 %v4356_v12, %v6131_v43  ;;  %v4833_v42 = vadd.f32 %v1030_v58, %v4627_v30  ;;  %v6136_v58 = vld [vmem:[#allocation80_spill] sm:$0xff]  ;;  %v6138_v50 = vld [vmem:[#allocation82_spill] sm:$0xff]  ;;  %v6181_v41 = vld [vmem:[#allocation117_spill] sm:$0xff] }
 0x277   : > { %v4836_v3 = vadd.f32 %v1033_v21, %v4630_v32  ;;  %v4839_v37 = vadd.f32 %v1032_v29, %v4635_v55  ;;  %v1039_v54 = vmul.f32 %v4356_v12, %v6132_v26  ;;  %v4843_v40 = vpop.permute.xlu1 %2143  ;;  %v4845_v25 = vpop.permute.xlu0 %2138  ;;  %v4848_v9 = vadd.f32 %v1035_v11, %v4638_v34  ;;  %v6137_v21 = vld [vmem:[#allocation81_spill] sm:$0xff]  ;;  %v6139_v26 = vld [vmem:[#allocation83_spill] sm:$0xff] }
 0x278   : > { %6133 = vst [vmem:[#allocation20_spill] sm:$0xff] %v4843_v40  ;;  %6134 = vst [vmem:[#allocation21_spill] sm:$0xff] %v4845_v25  ;;  %v1038_v30 = vmul.f32 %v4356_v12, %v6135_v56  ;;  %v1041_v32 = vmul.f32 %v4356_v12, %v6136_v58  ;;  %2693 = vperm.xlu1 %3313, %v2576_v2   ;;  %2688 = vperm.xlu0 %3312, %v2575_v16   ;;  %v2578_v34 = vld [vmem:[%s3362_s20 + $0xce] sm:$0xff]  ;;  %v2577_v25 = vld [vmem:[%s3362_s20 + $0xc6] sm:$0xff] }
 0x279   : > { %v4855_v55 = vadd.f32 %v1034_v5, %v4641_v8  ;;  %v1040_v29 = vmul.f32 %v4356_v12, %v6137_v21  ;;  %v1043_v43 = vmul.f32 %v4356_v12, %v6138_v50  ;;  %v1042_v11 = vmul.f32 %v4356_v12, %v6139_v26  ;;  %v6140_v16 = vld [vmem:[#allocation84_spill] sm:$0xff]  ;;  %v6141_v5 = vld [vmem:[#allocation85_spill] sm:$0xff]  ;;  %v6142_v50 = vld [vmem:[#allocation86_spill] sm:$0xff] }
 0x27a   : > { %v4866_v56 = vadd.f32 %v1037_v57, %v4648_v23  ;;  %v4869_v2 = vadd.f32 %v1036_v24, %v4651_v13  ;;  %v1045_v8 = vmul.f32 %v4356_v12, %v6140_v16  ;;  %v1044_v58 = vmul.f32 %v4356_v12, %v6141_v5  ;;  %v6143_v40 = vld [vmem:[#allocation87_spill] sm:$0xff]  ;;  %v6144_v57 = vld [vmem:[#allocation88_spill] sm:$0xff] }
 0x27b   : > { %v4876_v21 = vadd.f32 %v1039_v54, %v4658_v45  ;;  %v1306_v26 = vmul.f32 %v4545_v4, %v6142_v50  ;;  %v1305_v23 = vmul.f32 %v4545_v4, %v6143_v40  ;;  %v1308_v13 = vmul.f32 %v4545_v4, %v6144_v57  ;;  %v4884_v24 = vpop.permute.xlu1 %2153  ;;  %v4886_v16 = vpop.permute.xlu0 %2148  ;;  %v6147_v54 = vld [vmem:[#allocation89_spill] sm:$0xff] }
 0x27c   : > { %6145 = vst [vmem:[#allocation22_spill] sm:$0xff] %v4884_v24  ;;  %6146 = vst [vmem:[#allocation23_spill] sm:$0xff] %v4886_v16  ;;  %v4889_v12 = vadd.f32 %v1038_v30, %v4661_v60  ;;  %v4892_v45 = vadd.f32 %v1041_v32, %v4664_v44  ;;  %v1307_v5 = vmul.f32 %v4545_v4, %v6147_v54  ;;  %2703 = vperm.xlu1 %3313, %v2578_v34   ;;  %v6148_v16 = vld [vmem:[#allocation90_spill] sm:$0xff]  ;;  %v2579_v32 = vld [vmem:[%s3362_s20 + $0xd6] sm:$0xff] }
 0x27d   : > { %2698 = vperm.xlu0 %3312, %v2577_v25   ;;  %v4897_v40 = vadd.f32 %v1040_v29, %v4673_v33  ;;  %v4900_v50 = vadd.f32 %v1043_v43, %v4683_v62  ;;  %v4903_v57 = vadd.f32 %v1042_v11, %v4694_v19  ;;  %v1310_v60 = vmul.f32 %v4545_v4, %v6148_v16  ;;  %v3221_v44 = vld [vmem:[%s5837_s1 + $0x5] sm:$0x1]  ;;  %v6149_v62 = vld [vmem:[#allocation91_spill] sm:$0xff]  ;;  %v6150_v19 = vld [vmem:[#allocation92_spill] sm:$0xff] }
 0x27e   : > { %v2580_v30 = vld [vmem:[%s3362_s20 + $0xde] sm:$0xff]  ;;  %v4913_v25 = vadd.f32 %v1045_v8, %v4697_v20  ;;  %v4916_v33 = vadd.f32 %v1044_v58, %v4704_v51  ;;  %v1309_v29 = vmul.f32 %v4545_v4, %v6149_v62  ;;  %v1312_v43 = vmul.f32 %v4545_v4, %v6150_v19  ;;  %v6155_v62 = vld [vmem:[#allocation95_spill] sm:$0xff] }
 0x27f   : > { %v4923_v11 = vadd.f32 %v1306_v26, %v4715_v36  ;;  %v4926_v34 = vadd.f32 %v1305_v23, %v4718_v22  ;;  %v4929_v20 = vadd.f32 %v1308_v13, %v4723_v53  ;;  %v6151_v8 = vld [vmem:[#allocation93_spill] sm:$0xff]  ;;  %v4933_v58 = vpop.permute.xlu1 %2163  ;;  %v4935_v16 = vpop.permute.xlu0 %2158  ;;  %v4938_v54 = vadd.f32 %v1307_v5, %v4726_v28  ;;  %v6154_v36 = vld [vmem:[#allocation94_spill] sm:$0xff]  ;;  %v6156_v13 = vld [vmem:[#allocation96_spill] sm:$0xff] }
 0x280   : > { %v1311_v51 = vmul.f32 %v4545_v4, %v6151_v8  ;;  %6152 = vst [vmem:[#allocation24_spill] sm:$0xff] %v4933_v58  ;;  %6153 = vst [vmem:[#allocation25_spill] sm:$0xff] %v4935_v16  ;;  %v1314_v26 = vmul.f32 %v4545_v4, %v6154_v36  ;;  %v1313_v22 = vmul.f32 %v4545_v4, %v6155_v62  ;;  %v1710_v23 = vunpack.c.l.bf16 %v3221_v44  ;;  %v6157_v8 = vld [vmem:[#allocation97_spill] sm:$0xff]  ;;  %v6158_v28 = vld [vmem:[#allocation98_spill] sm:$0xff] }
 0x281   : > { %2713 = vperm.xlu1 %3313, %v2580_v30   ;;  %2708 = vperm.xlu0 %3312, %v2579_v32   ;;  %v4945_v53 = vadd.f32 %v1310_v60, %v4729_v18  ;;  %v1316_v19 = vmul.f32 %v4545_v4, %v6156_v13  ;;  %v1315_v16 = vmul.f32 %v4545_v4, %v6157_v8  ;;  %v2582_v58 = vld [vmem:[%s3362_s20 + $0xee] sm:$0xff]  ;;  %v2581_v36 = vld [vmem:[%s3362_s20 + $0xe6] sm:$0xff]  ;;  %v6161_v13 = vld [vmem:[#allocation101_spill] sm:$0xff] }
 0x282   : > { %v1318_v5 = vmul.f32 %v4545_v4, %v6158_v28  ;;  %v4956_v24 = vadd.f32 %v1309_v29, %v4736_v17  ;;  %v4959_v44 = vadd.f32 %v1312_v43, %v4739_v27  ;;  %v6159_v30 = vld [vmem:[#allocation99_spill] sm:$0xff]  ;;  %v6160_v60 = vld [vmem:[#allocation100_spill] sm:$0xff]  ;;  %v4966_v62 = vadd.f32 %v1311_v51, %v4746_v59  ;;  %v6162_v28 = vld [vmem:[#allocation102_spill] sm:$0xff] }
 0x283   : > { %v1317_v18 = vmul.f32 %v4545_v4, %v6159_v30  ;;  %v1320_v32 = vmul.f32 %v4545_v4, %v6160_v60  ;;  %v1319_v8 = vmul.f32 %v4545_v4, %v6161_v13  ;;  %v1322_v17 = vmul.f32 %v4545_v4, %v6162_v28  ;;  %v6163_v29 = vld [vmem:[#allocation103_spill] sm:$0xff]  ;;  %v4974_v43 = vpop.permute.xlu1 %2173  ;;  %v4976_v30 = vpop.permute.xlu0 %2168 }
 0x284   : > { %v1321_v27 = vmul.f32 %v4545_v4, %v6163_v29  ;;  %6164 = vst [vmem:[#allocation26_spill] sm:$0xff] %v4974_v43  ;;  %6165 = vst [vmem:[#allocation27_spill] sm:$0xff] %v4976_v30  ;;  %v4979_v60 = vadd.f32 %v1314_v26, %v4749_v1  ;;  %v4982_v59 = vadd.f32 %v1313_v22, %v4761_v7  ;;  %v6166_v30 = vld [vmem:[#allocation104_spill] sm:$0xff]  ;;  %v2584_v26 = vld [vmem:[%s3362_s20 + $0xfe] sm:$0xff] }
 0x285   : > { %v4985_v51 = vrot.slane %v1710_v23, %v4289_v49  ;;  %2723 = vperm.xlu1 %3313, %v2582_v58   ;;  %2718 = vperm.xlu0 %3312, %v2581_v36   ;;  %v4988_v13 = vadd.f32 %v1316_v19, %v4768_v48  ;;  %v4991_v28 = vadd.f32 %v1315_v16, %v4779_v14  ;;  %v2583_v7 = vld [vmem:[%s3362_s20 + $0xf6] sm:$0xff]  ;;  %v6168_v19 = vld [vmem:[#allocation106_spill] sm:$0xff] }
 0x286   : > { %v4994_v29 = vadd.f32 %v1318_v5, %v4782_v61  ;;  %v1324_v1 = vmul.f32 %v4545_v4, %v6166_v30  ;;  %v5001_v22 = vadd.f32 %v1317_v18, %v4789_v39  ;;  %v5004_v58 = vadd.f32 %v1320_v32, %v4802_v38  ;;  %v6167_v23 = vld [vmem:[#allocation105_spill] sm:$0xff]  ;;  %v6169_v5 = vld [vmem:[#allocation107_spill] sm:$0xff]  ;;  %v6172_v32 = vld [vmem:[#allocation108_spill] sm:$0xff] }
 0x287   : > { %v1323_v48 = vmul.f32 %v4545_v4, %v6167_v23  ;;  %v1326_v14 = vmul.f32 %v4545_v4, %v6168_v19  ;;  %v5011_v61 = vadd.f32 %v1319_v8, %v4805_v15  ;;  %v5014_v16 = vadd.f32 %v1322_v17, %v4810_v46  ;;  %v5021_v36 = vpop.permute.xlu1 %2183  ;;  %v5023_v18 = vpop.permute.xlu0 %2178  ;;  %v6173_v23 = vld [vmem:[#allocation109_spill] sm:$0xff]  ;;  %v6174_v8 = vld [vmem:[#allocation110_spill] sm:$0xff]  ;;  %v6175_v17 = vld [vmem:[#allocation111_spill] sm:$0xff] }
 0x288   : > { %v5017_v39 = vadd.f32 %v1321_v27, %v4813_v31  ;;  %v1325_v38 = vmul.f32 %v4545_v4, %v6169_v5  ;;  %6170 = vst [vmem:[#allocation28_spill] sm:$0xff] %v5021_v36  ;;  %6171 = vst [vmem:[#allocation29_spill] sm:$0xff] %v5023_v18  ;;  %v1328_v30 = vmul.f32 %v4545_v4, %v6172_v32  ;;  %v6176_v19 = vld [vmem:[#allocation112_spill] sm:$0xff]  ;;  %v6177_v18 = vld [vmem:[#allocation113_spill] sm:$0xff] }
 0x289   : > { %v1327_v15 = vmul.f32 %v4545_v4, %v6173_v23  ;;  %v1330_v46 = vmul.f32 %v4545_v4, %v6174_v8  ;;  %2733 = vperm.xlu1 %3313, %v2584_v26   ;;  %2728 = vperm.xlu0 %3312, %v2583_v7   ;;  %v5032_v31 = vadd.f32 %v1324_v1, %v4816_v10  ;;  %v2586_v36 = vld [vmem:[%s3362_s20 + $0x10e] sm:$0xff]  ;;  %v2585_v43 = vld [vmem:[%s3362_s20 + $0x106] sm:$0xff] }
 0x28a   : > { %v1329_v27 = vmul.f32 %v4545_v4, %v6175_v17  ;;  %v1332_v5 = vmul.f32 %v4545_v4, %v6176_v19  ;;  %v1331_v32 = vmul.f32 %v4545_v4, %v6177_v18  ;;  %v5043_v23 = vadd.f32 %v1323_v48, %v4823_v35  ;;  %v6178_v7 = vld [vmem:[#allocation114_spill] sm:$0xff]  ;;  %v6179_v1 = vld [vmem:[#allocation115_spill] sm:$0xff]  ;;  %v6180_v19 = vld [vmem:[#allocation116_spill] sm:$0xff] }
 0x28b   : > { %v5046_v26 = vadd.f32 %v1326_v14, %v4826_v47  ;;  %v1334_v10 = vmul.f32 %v4545_v4, %v6178_v7  ;;  %v1333_v8 = vmul.f32 %v4545_v4, %v6179_v1  ;;  %v5053_v17 = vadd.f32 %v1325_v38, %v4833_v42  ;;  %v6182_v48 = vld [vmem:[#allocation118_spill] sm:$0xff]  ;;  %v5061_v14 = vpop.permute.xlu1 %2308  ;;  %v5063_v7 = vpop.permute.xlu0 %2303 }
 0x28c   : > { %v1336_v18 = vmul.f32 %v4545_v4, %v6180_v19  ;;  %v1335_v35 = vmul.f32 %v4545_v4, %v6181_v41  ;;  %v1338_v47 = vmul.f32 %v4545_v4, %v6182_v48  ;;  %6183 = vst [vmem:[#allocation30_spill] sm:$0xff] %v5063_v7  ;;  %v5066_v1 = vadd.f32 %v1328_v30, %v4836_v3  ;;  %v6184_v7 = vld [vmem:[#allocation119_spill] sm:$0xff]  ;;  %v2588_v30 = vld [vmem:[%s3362_s20 + $0x11e] sm:$0xff] }
 0x28d   : > { %v5069_v42 = vadd.f32 %v1327_v15, %v4839_v37  ;;  %v5072_v38 = vadd.f32 %v1330_v46, %v4848_v9  ;;  %2743 = vperm.xlu1 %3313, %v2586_v36   ;;  %2738 = vperm.xlu0 %3312, %v2585_v43   ;;  %v5075_v41 = vadd.f32 %v1329_v27, %v4855_v55  ;;  %v2587_v37 = vld [vmem:[%s3362_s20 + $0x116] sm:$0xff]  ;;  %v6187_v27 = vld [vmem:[#allocation122_spill] sm:$0xff] }
 0x28e   : > { %v5078_v19 = vadd.f32 %v1332_v5, %v4866_v56  ;;  %v5081_v48 = vadd.f32 %v1331_v32, %v4869_v2  ;;  %v1337_v3 = vmul.f32 %v4545_v4, %v6184_v7  ;;  %v5088_v15 = vadd.f32 %v1334_v10, %v4876_v21  ;;  %v6185_v43 = vld [vmem:[#allocation120_spill] sm:$0xff]  ;;  %v6186_v36 = vld [vmem:[#allocation121_spill] sm:$0xff]  ;;  %v3222_v5 = vld [vmem:[%s5837_s1 + $0x6] sm:$0x1] }
 0x28f   : > { %v5091_v9 = vadd.f32 %v1333_v8, %v4889_v12  ;;  %v1340_v55 = vmul.f32 %v4545_v4, %v6185_v43  ;;  %v1339_v56 = vmul.f32 %v4545_v4, %v6186_v36  ;;  %v5098_v2 = vadd.f32 %v1336_v18, %v4892_v45  ;;  %v5111_v32 = vpop.permute.xlu1 %2318  ;;  %v5113_v4 = vpop.permute.xlu0 %2313  ;;  %v6190_v45 = vld [vmem:[#allocation123_spill] sm:$0xff]  ;;  %v6192_v18 = vld [vmem:[#allocation125_spill] sm:$0xff] }
 0x290   : > { %v5101_v46 = vadd.f32 %v1335_v35, %v4897_v40  ;;  %v5104_v21 = vadd.f32 %v1338_v47, %v4900_v50  ;;  %v1601_v12 = vmul.f32 %v4754_v0, %v6187_v27  ;;  %6188 = vst [vmem:[#allocation31_spill] sm:$0xff] %v5111_v32  ;;  %6189 = vst [vmem:[#allocation32_spill] sm:$0xff] %v5113_v4  ;;  %v6191_v40 = vld [vmem:[#allocation124_spill] sm:$0xff]  ;;  %v6193_v47 = vld [vmem:[#allocation126_spill] sm:$0xff] }
 0x291   : > { %v1600_v10 = vmul.f32 %v4754_v0, %v6190_v45  ;;  %v1603_v8 = vmul.f32 %v4754_v0, %v6191_v40  ;;  %v1602_v50 = vmul.f32 %v4754_v0, %v6192_v18  ;;  %2753 = vperm.xlu1 %3313, %v2588_v30   ;;  %2748 = vperm.xlu0 %3312, %v2587_v37   ;;  %v6194_v43 = vld [vmem:[#allocation127_spill] sm:$0xff]  ;;  %v6195_v27 = vld [vmem:[#allocation128_spill] sm:$0xff]  ;;  %v6196_v37 = vld [vmem:[#allocation129_spill] sm:$0xff] }
 0x292   : > { %v5122_v35 = vadd.f32 %v1337_v3, %v4903_v57  ;;  %v1605_v7 = vmul.f32 %v4754_v0, %v6193_v47  ;;  %v1604_v36 = vmul.f32 %v4754_v0, %v6194_v43  ;;  %v1607_v45 = vmul.f32 %v4754_v0, %v6195_v27  ;;  %v2590_v4 = vld [vmem:[%s3362_s20 + $0x12e] sm:$0xff]  ;;  %v2589_v32 = vld [vmem:[%s3362_s20 + $0x126] sm:$0xff] }
 0x293   : > { %v5133_v40 = vadd.f32 %v1340_v55, %v4913_v25  ;;  %v5136_v30 = vadd.f32 %v1339_v56, %v4916_v33  ;;  %v1606_v57 = vmul.f32 %v4754_v0, %v6196_v37  ;;  %v2005_v3 = vunpack.c.l.bf16 %v3222_v5  ;;  %v6197_v43 = vld [vmem:[#allocation130_spill] sm:$0xff]  ;;  %v5149_v33 = vpop.permute.xlu1 %2328  ;;  %v5151_v55 = vpop.permute.xlu0 %2323 }
 0x294   : > { %v5141_v18 = vadd.f32 %v1601_v12, %v4923_v11  ;;  %v1609_v47 = vmul.f32 %v4754_v0, %v4088_v6  ;;  %v1608_v27 = vmul.f32 %v4754_v0, %v6197_v43  ;;  %v1611_v25 = vmul.f32 %v4754_v0, %v4094_v63  ;;  %6198 = vst [vmem:[#allocation33_spill] sm:$0xff] %v5149_v33  ;;  %v6216_v33 = vld [vmem:[#allocation5_spill] sm:$0xff] }
 0x295   : > { %6199 = vst [vmem:[#allocation34_spill] sm:$0xff] %v5151_v55  ;;  %v5154_v56 = vadd.f32 %v1600_v10, %v4926_v34  ;;  %v5157_v11 = vadd.f32 %v1603_v8, %v4929_v20  ;;  %v5160_v12 = vadd.f32 %v1602_v50, %v4938_v54  ;;  %2763 = vperm.xlu1 %3313, %v2590_v4   ;;  %v2592_v10 = vld [vmem:[%s3362_s20 + $0x13e] sm:$0xff]  ;;  %v2591_v20 = vld [vmem:[%s3362_s20 + $0x136] sm:$0xff]  ;;  %v6200_v54 = vld [vmem:[#allocation131_spill] sm:$0xff] }
 0x296   : > { %2758 = vperm.xlu0 %3312, %v2589_v32   ;;  %v5163_v6 = vadd.f32 %v1605_v7, %v4945_v53  ;;  %v5166_v63 = vadd.f32 %v1604_v36, %v4956_v24  ;;  %v5169_v5 = vadd.f32 %v1607_v45, %v4959_v44  ;;  %v1610_v34 = vmul.f32 %v4754_v0, %v4096_v52  ;;  %v6201_v4 = vld [vmem:[#allocation132_spill] sm:$0xff]  ;;  %v6203_v7 = vld [vmem:[#allocation133_spill] sm:$0xff]  ;;  %v3223_v36 = vld [vmem:[%s5837_s1 + $0x7] sm:$0x1] }
 0x297   : > { %v5176_v8 = vadd.f32 %v1606_v57, %v4966_v62  ;;  %v1613_v32 = vmul.f32 %v4754_v0, %v6200_v54  ;;  %v1612_v53 = vmul.f32 %v4754_v0, %v6201_v4  ;;  %v5183_v24 = vrot.slane %v2005_v3, %v4289_v49  ;;  %v5197_v45 = vpop.permute.xlu1 %2338  ;;  %v5199_v37 = vpop.permute.xlu0 %2333  ;;  %v6206_v57 = vld [vmem:[#allocation134_spill] sm:$0xff]  ;;  %v6207_v3 = vld [vmem:[#allocation135_spill] sm:$0xff]  ;;  %v6210_v54 = vld [vmem:[#allocation165_spill] sm:$0xff] }
 0x298   : > { %v5186_v44 = vadd.f32 %v1609_v47, %v4979_v60  ;;  %v5189_v50 = vadd.f32 %v1608_v27, %v4982_v59  ;;  %v1647_v52 = vadd.f32 %v1611_v25, %v4988_v13  ;;  %v1615_v62 = vmul.f32 %v4754_v0, %v6203_v7  ;;  %6204 = vst [vmem:[#allocation36_spill] sm:$0xff] %v5197_v45  ;;  %v6208_v47 = vld [vmem:[#allocation136_spill] sm:$0xff]  ;;  %v6209_v27 = vld [vmem:[#allocation137_spill] sm:$0xff]  ;;  %v6211_v7 = vld [vmem:[#allocation166_spill] sm:$0xff] }
 0x299   : > { %6205 = vst [vmem:[#allocation37_spill] sm:$0xff] %v5199_v37  ;;  %v1614_v60 = vmul.f32 %v4754_v0, %v6206_v57  ;;  %v1617_v59 = vmul.f32 %v4754_v0, %v6207_v3  ;;  %v1616_v13 = vmul.f32 %v4754_v0, %v6208_v47  ;;  %2773 = vperm.xlu1 %3313, %v2592_v10   ;;  %v6212_v45 = vld [vmem:[#allocation138_spill] sm:$0xff]  ;;  %v2300_v10 = vunpack.c.l.bf16 %v3223_v36  ;;  %v6215_v55 = vld [vmem:[#allocation4_spill] sm:$0xff] }
 0x29a   : > { %6202 = vst [vmem:[#allocation35_spill] sm:$0xff] %v5189_v50  ;;  %2768 = vperm.xlu0 %3312, %v2591_v20   ;;  %v1646_v43 = vadd.f32 %v1610_v34, %v4991_v28  ;;  %v1619_v25 = vmul.f32 %v4754_v0, %v6209_v27  ;;  %v1906_v4 = vmul.f32 %v4985_v51, %v6210_v54  ;;  %v6213_v20 = vld [vmem:[#allocation139_spill] sm:$0xff]  ;;  %v6214_v34 = vld [vmem:[#allocation140_spill] sm:$0xff] }
 0x29b   : > { %v1905_v37 = vmul.f32 %v4985_v51, %v6211_v7  ;;  %v1649_v57 = vadd.f32 %v1613_v32, %v4994_v29  ;;  %v1648_v3 = vadd.f32 %v1612_v53, %v5001_v22  ;;  %v1618_v47 = vmul.f32 %v4754_v0, %v6212_v45  ;;  %v5226_v50 = vpop.permute.xlu1 %2348  ;;  %v5228_v29 = vpop.permute.xlu0 %2343 }
 0x29c   : > { %v1621_v28 = vmul.f32 %v4754_v0, %v6213_v20  ;;  %v1620_v27 = vmul.f32 %v4754_v0, %v6214_v34  ;;  %v2201_v54 = vmul.f32 %v5183_v24, %v6215_v55  ;;  %v2200_v7 = vmul.f32 %v5183_v24, %v6216_v33  ;;  %6217 = vst [vmem:[#allocation38_spill] sm:$0xff] %v5226_v50  ;;  %v6219_v20 = vld [vmem:[#allocation141_spill] sm:$0xff] }
 0x29d   : > { %6218 = vst [vmem:[#allocation39_spill] sm:$0xff] %v5228_v29  ;;  %v1651_v22 = vadd.f32 %v1615_v62, %v5004_v58  ;;  %v1650_v32 = vadd.f32 %v1614_v60, %v5011_v61  ;;  %v1653_v53 = vadd.f32 %v1617_v59, %v5014_v16  ;;  %v1652_v36 = vadd.f32 %v1616_v13, %v5017_v39  ;;  %v6220_v29 = vld [vmem:[#allocation167_spill] sm:$0xff]  ;;  %v6221_v62 = vld [vmem:[#allocation168_spill] sm:$0xff]  ;;  %v6222_v59 = vld [vmem:[#allocation14_spill] sm:$0xff] }
 0x29e   : > { %v5235_v45 = vadd.f32 %v1619_v25, %v5032_v31  ;;  %v1623_v55 = vmul.f32 %v4754_v0, %v6219_v20  ;;  %v1942_v34 = vadd.f32 %v1906_v4, %v1647_v52  ;;  %v1941_v33 = vadd.f32 %v1905_v37, %v1646_v43  ;;  %v6223_v43 = vld [vmem:[#allocation6_spill] sm:$0xff] }
 0x29f   : > { %v5240_v50 = vadd.f32 %v1618_v47, %v5043_v23  ;;  %v1908_v58 = vmul.f32 %v4985_v51, %v6220_v29  ;;  %v1907_v61 = vmul.f32 %v4985_v51, %v6221_v62  ;;  %v5247_v16 = vrot.slane %v2300_v10, %v4289_v49  ;;  %v2359_v60 = vpop.permute.xlu1 %2358  ;;  %v2354_v23 = vpop.permute.xlu0 %2353  ;;  %v6224_v10 = vld [vmem:[#allocation142_spill] sm:$0xff]  ;;  %v6228_v62 = vld [vmem:[#allocation143_spill] sm:$0xff] }
 0x2a0   : > { %v5250_v39 = vadd.f32 %v1621_v28, %v5046_v26  ;;  %v5253_v31 = vadd.f32 %v1620_v27, %v5053_v17  ;;  %v2237_v52 = vadd.f32 %v2201_v54, %v1942_v34  ;;  %v2236_v37 = vadd.f32 %v2200_v7, %v1941_v33  ;;  %v6225_v28 = vld [vmem:[#allocation169_spill] sm:$0xff]  ;;  %v6226_v54 = vld [vmem:[#allocation170_spill] sm:$0xff] }
 0x2a1   : > { %v2203_v13 = vmul.f32 %v5183_v24, %v6222_v59  ;;  %v2202_v25 = vmul.f32 %v5183_v24, %v6223_v43  ;;  %v2496_v4 = vmul.f32 %v5247_v16, %v2359_v60  ;;  %v2495_v47 = vmul.f32 %v5247_v16, %v2354_v23  ;;  %v6230_v23 = vld [vmem:[#allocation15_spill] sm:$0xff]  ;;  %v6231_v43 = vld [vmem:[#allocation16_spill] sm:$0xff] }
 0x2a2   : > { %v5262_v26 = vadd.f32 %v1623_v55, %v5066_v1  ;;  %v1622_v17 = vmul.f32 %v4754_v0, %v6224_v10  ;;  %v1910_v27 = vmul.f32 %v4985_v51, %v6225_v28  ;;  %v1909_v7 = vmul.f32 %v4985_v51, %v6226_v54  ;;  %v6229_v1 = vld [vmem:[#allocation144_spill] sm:$0xff] }
 0x2a3   : > { %v1944_v29 = vadd.f32 %v1908_v58, %v1649_v57  ;;  %v1943_v20 = vadd.f32 %v1907_v61, %v1648_v3  ;;  %v5270_v34 = vadd.f32 %v2496_v4, %v2237_v52  ;;  %v5272_v33 = vadd.f32 %v2495_v47, %v2236_v37  ;;  %v2369_v28 = vpop.permute.xlu1 %2368  ;;  %v2364_v54 = vpop.permute.xlu0 %2363  ;;  %v6232_v37 = vld [vmem:[#allocation145_spill] sm:$0xff] }
 0x2a4   : > { %v1625_v60 = vmul.f32 %v4754_v0, %v6228_v62  ;;  %v1624_v55 = vmul.f32 %v4754_v0, %v6229_v1  ;;  %v2205_v59 = vmul.f32 %v5183_v24, %v6230_v23  ;;  %v2204_v10 = vmul.f32 %v5183_v24, %v6231_v43  ;;  %v6233_v1 = vld [vmem:[#allocation171_spill] sm:$0xff]  ;;  %v6234_v43 = vld [vmem:[#allocation172_spill] sm:$0xff] }
 0x2a5   : > { %6227 = vst [vmem:[#allocation40_spill] sm:$0xff] %v5272_v33  ;;  %v2239_v57 = vadd.f32 %v2203_v13, %v1944_v29  ;;  %v2238_v3 = vadd.f32 %v2202_v25, %v1943_v20  ;;  %v2498_v58 = vmul.f32 %v5247_v16, %v2369_v28  ;;  %v2497_v61 = vmul.f32 %v5247_v16, %v2364_v54  ;;  %v6236_v28 = vld [vmem:[#allocation8_spill] sm:$0xff] }
 0x2a6   : > { %v5285_v52 = vadd.f32 %v1622_v17, %v5069_v42  ;;  %v1627_v4 = vmul.f32 %v4754_v0, %v6232_v37  ;;  %v1946_v47 = vadd.f32 %v1910_v27, %v1651_v22  ;;  %v1945_v62 = vadd.f32 %v1909_v7, %v1650_v32  ;;  %v6235_v27 = vld [vmem:[#allocation7_spill] sm:$0xff] }
 0x2a7   : > { %v1912_v23 = vmul.f32 %v4985_v51, %v6233_v1  ;;  %v1911_v33 = vmul.f32 %v4985_v51, %v6234_v43  ;;  %v5293_v13 = vadd.f32 %v2498_v58, %v2239_v57  ;;  %v5295_v25 = vadd.f32 %v2497_v61, %v2238_v3  ;;  %v2379_v22 = vpop.permute.xlu1 %2378  ;;  %v2374_v32 = vpop.permute.xlu0 %2373  ;;  %v6240_v1 = vld [vmem:[#allocation147_spill] sm:$0xff] }
 0x2a8   : > { %v5298_v29 = vadd.f32 %v1625_v60, %v5072_v38  ;;  %v5301_v42 = vadd.f32 %v1624_v55, %v5075_v41  ;;  %v2241_v17 = vadd.f32 %v2205_v59, %v1946_v47  ;;  %v2240_v20 = vadd.f32 %v2204_v10, %v1945_v62  ;;  %v6237_v60 = vld [vmem:[#allocation146_spill] sm:$0xff]  ;;  %v6238_v55 = vld [vmem:[#allocation173_spill] sm:$0xff] }
 0x2a9   : > { %v2207_v7 = vmul.f32 %v5183_v24, %v6235_v27  ;;  %v2206_v54 = vmul.f32 %v5183_v24, %v6236_v28  ;;  %v2500_v57 = vmul.f32 %v5247_v16, %v2379_v22  ;;  %v2499_v3 = vmul.f32 %v5247_v16, %v2374_v32  ;;  %v6239_v10 = vld [vmem:[#allocation174_spill] sm:$0xff]  ;;  %v6242_v22 = vld [vmem:[#allocation9_spill] sm:$0xff] }
 0x2aa   : > { %v5310_v38 = vadd.f32 %v1627_v4, %v5078_v19  ;;  %v1626_v41 = vmul.f32 %v4754_v0, %v6237_v60  ;;  %v1914_v59 = vmul.f32 %v4985_v51, %v6238_v55  ;;  %v1913_v58 = vmul.f32 %v4985_v51, %v6239_v10  ;;  %v6241_v19 = vld [vmem:[#allocation148_spill] sm:$0xff]  ;;  %v6243_v27 = vld [vmem:[#allocation17_spill] sm:$0xff] }
 0x2ab   : > { %v1948_v61 = vadd.f32 %v1912_v23, %v1653_v53  ;;  %v1947_v37 = vadd.f32 %v1911_v33, %v1652_v36  ;;  %v5318_v47 = vadd.f32 %v2500_v57, %v2241_v17  ;;  %v5320_v62 = vadd.f32 %v2499_v3, %v2240_v20  ;;  %v2389_v60 = vpop.permute.xlu1 %2388  ;;  %v2384_v55 = vpop.permute.xlu0 %2383  ;;  %v6244_v20 = vld [vmem:[#allocation149_spill] sm:$0xff] }
 0x2ac   : > { %v1629_v43 = vmul.f32 %v4754_v0, %v6240_v1  ;;  %v1628_v4 = vmul.f32 %v4754_v0, %v6241_v19  ;;  %v2209_v32 = vmul.f32 %v5183_v24, %v6242_v22  ;;  %v2208_v28 = vmul.f32 %v5183_v24, %v6243_v27  ;;  %v6245_v1 = vld [vmem:[#allocation175_spill] sm:$0xff]  ;;  %v6246_v22 = vld [vmem:[#allocation176_spill] sm:$0xff] }
 0x2ad   : > { %v2243_v53 = vadd.f32 %v2207_v7, %v1948_v61  ;;  %v2242_v36 = vadd.f32 %v2206_v54, %v1947_v37  ;;  %v2502_v33 = vmul.f32 %v5247_v16, %v2389_v60  ;;  %v2501_v23 = vmul.f32 %v5247_v16, %v2384_v55  ;;  %v6248_v60 = vld [vmem:[#allocation11_spill] sm:$0xff] }
 0x2ae   : > { %v5333_v17 = vadd.f32 %v1626_v41, %v5081_v48  ;;  %v1631_v57 = vmul.f32 %v4754_v0, %v6244_v20  ;;  %v1950_v3 = vadd.f32 %v1914_v59, %v5235_v45  ;;  %v1949_v10 = vadd.f32 %v1913_v58, %v5240_v50  ;;  %v6247_v58 = vld [vmem:[#allocation10_spill] sm:$0xff] }
 0x2af   : > { %v1916_v19 = vmul.f32 %v4985_v51, %v6245_v1  ;;  %v1915_v7 = vmul.f32 %v4985_v51, %v6246_v22  ;;  %v5343_v54 = vadd.f32 %v2502_v33, %v2243_v53  ;;  %v5345_v61 = vadd.f32 %v2501_v23, %v2242_v36  ;;  %v2399_v59 = vpop.permute.xlu1 %2398  ;;  %v2394_v50 = vpop.permute.xlu0 %2393  ;;  %v6252_v1 = vld [vmem:[#allocation151_spill] sm:$0xff] }
 0x2b0   : > { %v5348_v48 = vadd.f32 %v1629_v43, %v5088_v15  ;;  %v5351_v41 = vadd.f32 %v1628_v4, %v5091_v9  ;;  %v2245_v37 = vadd.f32 %v2209_v32, %v1950_v3  ;;  %v2244_v45 = vadd.f32 %v2208_v28, %v1949_v10  ;;  %v6249_v43 = vld [vmem:[#allocation150_spill] sm:$0xff]  ;;  %v6250_v4 = vld [vmem:[#allocation177_spill] sm:$0xff] }
 0x2b1   : > { %v2211_v27 = vmul.f32 %v5183_v24, %v6247_v58  ;;  %v2210_v55 = vmul.f32 %v5183_v24, %v6248_v60  ;;  %v2504_v53 = vmul.f32 %v5247_v16, %v2399_v59  ;;  %v2503_v36 = vmul.f32 %v5247_v16, %v2394_v50  ;;  %v6251_v28 = vld [vmem:[#allocation178_spill] sm:$0xff]  ;;  %v6255_v58 = vld [vmem:[#allocation19_spill] sm:$0xff] }
 0x2b2   : > { %v5360_v15 = vadd.f32 %v1631_v57, %v5098_v2  ;;  %v1630_v9 = vmul.f32 %v4754_v0, %v6249_v43  ;;  %v1918_v32 = vmul.f32 %v4985_v51, %v6250_v4  ;;  %v1917_v33 = vmul.f32 %v4985_v51, %v6251_v28  ;;  %v6253_v57 = vld [vmem:[#allocation152_spill] sm:$0xff]  ;;  %v6254_v59 = vld [vmem:[#allocation18_spill] sm:$0xff] }
 0x2b3   : > { %v1952_v23 = vadd.f32 %v1916_v19, %v5250_v39  ;;  %v1951_v20 = vadd.f32 %v1915_v7, %v5253_v31  ;;  %v5370_v3 = vadd.f32 %v2504_v53, %v2245_v37  ;;  %v5372_v10 = vadd.f32 %v2503_v36, %v2244_v45  ;;  %v2409_v43 = vpop.permute.xlu1 %2408  ;;  %v2404_v39 = vpop.permute.xlu0 %2403  ;;  %v6256_v53 = vld [vmem:[#allocation153_spill] sm:$0xff] }
 0x2b4   : > { %v1633_v2 = vmul.f32 %v4754_v0, %v6252_v1  ;;  %v1632_v22 = vmul.f32 %v4754_v0, %v6253_v57  ;;  %v2213_v50 = vmul.f32 %v5183_v24, %v6254_v59  ;;  %v2212_v60 = vmul.f32 %v5183_v24, %v6255_v58  ;;  %v6257_v1 = vld [vmem:[#allocation179_spill] sm:$0xff]  ;;  %v6258_v59 = vld [vmem:[#allocation180_spill] sm:$0xff] }
 0x2b5   : > { %v2247_v19 = vadd.f32 %v2211_v27, %v1952_v23  ;;  %v2246_v31 = vadd.f32 %v2210_v55, %v1951_v20  ;;  %v2506_v7 = vmul.f32 %v5247_v16, %v2409_v43  ;;  %v2505_v37 = vmul.f32 %v5247_v16, %v2404_v39  ;;  %v6260_v43 = vld [vmem:[#allocation13_spill] sm:$0xff] }
 0x2b6   : > { %v5385_v45 = vadd.f32 %v1630_v9, %v5101_v46  ;;  %v1635_v36 = vmul.f32 %v4754_v0, %v6256_v53  ;;  %v1954_v4 = vadd.f32 %v1918_v32, %v5262_v26  ;;  %v1953_v28 = vadd.f32 %v1917_v33, %v5285_v52  ;;  %v6259_v33 = vld [vmem:[#allocation12_spill] sm:$0xff] }
 0x2b7   : > { %v1920_v57 = vmul.f32 %v4985_v51, %v6257_v1  ;;  %v1919_v27 = vmul.f32 %v4985_v51, %v6258_v59  ;;  %v5395_v55 = vadd.f32 %v2506_v7, %v2247_v19  ;;  %v5397_v23 = vadd.f32 %v2505_v37, %v2246_v31  ;;  %v2419_v32 = vpop.permute.xlu1 %2418  ;;  %v2414_v52 = vpop.permute.xlu0 %2413  ;;  %v6264_v1 = vld [vmem:[#allocation155_spill] sm:$0xff]  ;;  %v6266_v59 = vld [vmem:[#allocation20_spill] sm:$0xff] }
 0x2b8   : > { %v5400_v46 = vadd.f32 %v1633_v2, %v5104_v21  ;;  %v5403_v9 = vadd.f32 %v1632_v22, %v5122_v35  ;;  %v2249_v20 = vadd.f32 %v2213_v50, %v1954_v4  ;;  %v2248_v26 = vadd.f32 %v2212_v60, %v1953_v28  ;;  %v6261_v2 = vld [vmem:[#allocation154_spill] sm:$0xff]  ;;  %v6262_v22 = vld [vmem:[#allocation181_spill] sm:$0xff] }
 0x2b9   : > { %v2215_v58 = vmul.f32 %v5183_v24, %v6259_v33  ;;  %v2214_v39 = vmul.f32 %v5183_v24, %v6260_v43  ;;  %v2508_v19 = vmul.f32 %v5247_v16, %v2419_v32  ;;  %v2507_v31 = vmul.f32 %v5247_v16, %v2414_v52  ;;  %v6263_v60 = vld [vmem:[#allocation182_spill] sm:$0xff]  ;;  %v6267_v52 = vld [vmem:[#allocation21_spill] sm:$0xff] }
 0x2ba   : > { %v5412_v21 = vadd.f32 %v1635_v36, %v5133_v40  ;;  %v1634_v35 = vmul.f32 %v4754_v0, %v6261_v2  ;;  %v1922_v50 = vmul.f32 %v4985_v51, %v6262_v22  ;;  %v1921_v7 = vmul.f32 %v4985_v51, %v6263_v60  ;;  %v6265_v36 = vld [vmem:[#allocation156_spill] sm:$0xff]  ;;  %v6269_v60 = vld [vmem:[#allocation183_spill] sm:$0xff] }
 0x2bb   : > { %v1956_v37 = vadd.f32 %v1920_v57, %v5298_v29  ;;  %v1955_v53 = vadd.f32 %v1919_v27, %v5301_v42  ;;  %v5422_v4 = vadd.f32 %v2508_v19, %v2249_v20  ;;  %v5424_v28 = vadd.f32 %v2507_v31, %v2248_v26  ;;  %v2429_v43 = vpop.permute.xlu1 %2428  ;;  %v2424_v29 = vpop.permute.xlu0 %2423  ;;  %v6268_v19 = vld [vmem:[#allocation157_spill] sm:$0xff] }
 0x2bc   : > { %v1896_v40 = vmul.f32 %v4985_v51, %v6264_v1  ;;  %v1895_v0 = vmul.f32 %v4985_v51, %v6265_v36  ;;  %v2217_v32 = vmul.f32 %v5183_v24, %v6266_v59  ;;  %v2216_v33 = vmul.f32 %v5183_v24, %v6267_v52  ;;  %v6270_v36 = vld [vmem:[#allocation184_spill] sm:$0xff]  ;;  %v6272_v52 = vld [vmem:[#allocation23_spill] sm:$0xff] }
 0x2bd   : > { %v2251_v57 = vadd.f32 %v2215_v58, %v1956_v37  ;;  %v2250_v42 = vadd.f32 %v2214_v39, %v1955_v53  ;;  %v2510_v27 = vmul.f32 %v5247_v16, %v2429_v43  ;;  %v2509_v20 = vmul.f32 %v5247_v16, %v2424_v29 }
 0x2be   : > { %v5437_v26 = vadd.f32 %v1634_v35, %v5136_v30  ;;  %v1898_v31 = vmul.f32 %v4985_v51, %v6268_v19  ;;  %v1958_v2 = vadd.f32 %v1922_v50, %v5310_v38  ;;  %v1957_v22 = vadd.f32 %v1921_v7, %v5333_v17  ;;  %v6271_v7 = vld [vmem:[#allocation22_spill] sm:$0xff] }
 0x2bf   : > { %v1924_v1 = vmul.f32 %v4985_v51, %v6269_v60  ;;  %v1923_v58 = vmul.f32 %v4985_v51, %v6270_v36  ;;  %v5447_v39 = vadd.f32 %v2510_v27, %v2251_v57  ;;  %v5449_v37 = vadd.f32 %v2509_v20, %v2250_v42  ;;  %v2439_v50 = vpop.permute.xlu1 %2438  ;;  %v2434_v17 = vpop.permute.xlu0 %2433  ;;  %v6278_v36 = vld [vmem:[#allocation24_spill] sm:$0xff] }
 0x2c0   : > { %v5452_v30 = vadd.f32 %v1896_v40, %v5141_v18  ;;  %v5455_v35 = vadd.f32 %v1895_v0, %v5154_v56  ;;  %v2253_v53 = vadd.f32 %v2217_v32, %v1958_v2  ;;  %v2252_v38 = vadd.f32 %v2216_v33, %v1957_v22  ;;  %v6273_v40 = vld [vmem:[#allocation158_spill] sm:$0xff]  ;;  %v6274_v0 = vld [vmem:[#allocation185_spill] sm:$0xff]  ;;  %v6276_v22 = vld [vmem:[#allocation159_spill] sm:$0xff] }
 0x2c1   : > { %v2219_v59 = vmul.f32 %v5183_v24, %v6271_v7  ;;  %v2218_v43 = vmul.f32 %v5183_v24, %v6272_v52  ;;  %v2512_v29 = vmul.f32 %v5247_v16, %v2439_v50  ;;  %v2511_v57 = vmul.f32 %v5247_v16, %v2434_v17  ;;  %v6275_v33 = vld [vmem:[#allocation186_spill] sm:$0xff]  ;;  %v6279_v17 = vld [vmem:[#allocation25_spill] sm:$0xff] }
 0x2c2   : > { %v5464_v18 = vadd.f32 %v1898_v31, %v5157_v11  ;;  %v1897_v56 = vmul.f32 %v4985_v51, %v6273_v40  ;;  %v1926_v32 = vmul.f32 %v4985_v51, %v6274_v0  ;;  %v1925_v42 = vmul.f32 %v4985_v51, %v6275_v33  ;;  %v6277_v31 = vld [vmem:[#allocation160_spill] sm:$0xff]  ;;  %v6281_v33 = vld [vmem:[#allocation187_spill] sm:$0xff] }
 0x2c3   : > { %v1960_v27 = vadd.f32 %v1924_v1, %v5348_v48  ;;  %v1959_v20 = vadd.f32 %v1923_v58, %v5351_v41  ;;  %v5474_v19 = vadd.f32 %v2512_v29, %v2253_v53  ;;  %v5476_v2 = vadd.f32 %v2511_v57, %v2252_v38  ;;  %v2449_v52 = vpop.permute.xlu1 %2448  ;;  %v2444_v48 = vpop.permute.xlu0 %2443  ;;  %v6280_v29 = vld [vmem:[#allocation161_spill] sm:$0xff] }
 0x2c4   : > { %v1900_v11 = vmul.f32 %v4985_v51, %v6276_v22  ;;  %v1899_v60 = vmul.f32 %v4985_v51, %v6277_v31  ;;  %v2221_v50 = vmul.f32 %v5183_v24, %v6278_v36  ;;  %v2220_v7 = vmul.f32 %v5183_v24, %v6279_v17  ;;  %v6282_v31 = vld [vmem:[#allocation188_spill] sm:$0xff]  ;;  %v6284_v17 = vld [vmem:[#allocation27_spill] sm:$0xff] }
 0x2c5   : > { %v2255_v1 = vadd.f32 %v2219_v59, %v1960_v27  ;;  %v2254_v41 = vadd.f32 %v2218_v43, %v1959_v20  ;;  %v2514_v58 = vmul.f32 %v5247_v16, %v2449_v52  ;;  %v2513_v53 = vmul.f32 %v5247_v16, %v2444_v48 }
 0x2c6   : > { %v5489_v38 = vadd.f32 %v1897_v56, %v5160_v12  ;;  %v1902_v57 = vmul.f32 %v4985_v51, %v6280_v29  ;;  %v1962_v40 = vadd.f32 %v1926_v32, %v5360_v15  ;;  %v1961_v0 = vadd.f32 %v1925_v42, %v5385_v45  ;;  %v6283_v42 = vld [vmem:[#allocation26_spill] sm:$0xff] }
 0x2c7   : > { %v1928_v22 = vmul.f32 %v4985_v51, %v6281_v33  ;;  %v1927_v59 = vmul.f32 %v4985_v51, %v6282_v31  ;;  %v5499_v43 = vadd.f32 %v2514_v58, %v2255_v1  ;;  %v5501_v27 = vadd.f32 %v2513_v53, %v2254_v41  ;;  %v2459_v32 = vpop.permute.xlu1 %2458  ;;  %v2454_v45 = vpop.permute.xlu0 %2453  ;;  %v6287_v41 = vld [vmem:[#allocation190_spill] sm:$0xff]  ;;  %v6288_v33 = vld [vmem:[#allocation191_spill] sm:$0xff] }
 0x2c8   : > { %v5504_v12 = vadd.f32 %v1900_v11, %v5163_v6  ;;  %v5507_v56 = vadd.f32 %v1899_v60, %v5166_v63  ;;  %v2257_v20 = vadd.f32 %v2221_v50, %v1962_v40  ;;  %v2256_v15 = vadd.f32 %v2220_v7, %v1961_v0  ;;  %v3224_v6 = vld [vmem:[%s5837_s1 + $0x8] sm:$0x1]  ;;  %v6285_v11 = vld [vmem:[#allocation162_spill] sm:$0xff]  ;;  %v6286_v50 = vld [vmem:[#allocation189_spill] sm:$0xff] }
 0x2c9   : > { %v2223_v36 = vmul.f32 %v5183_v24, %v6283_v42  ;;  %v2222_v52 = vmul.f32 %v5183_v24, %v6284_v17  ;;  %v2516_v48 = vmul.f32 %v5247_v16, %v2459_v32  ;;  %v2515_v1 = vmul.f32 %v5247_v16, %v2454_v45  ;;  %v6290_v32 = vld [vmem:[#allocation29_spill] sm:$0xff] }
 0x2ca   : > { %v1938_v63 = vadd.f32 %v1902_v57, %v5169_v5  ;;  %v1901_v60 = vmul.f32 %v4985_v51, %v6285_v11  ;;  %v1930_v7 = vmul.f32 %v4985_v51, %v6286_v50  ;;  %v1929_v58 = vmul.f32 %v4985_v51, %v6287_v41  ;;  %v6289_v57 = vld [vmem:[#allocation28_spill] sm:$0xff]  ;;  %v6292_v41 = vld [vmem:[#allocation163_spill] sm:$0xff] }
 0x2cb   : > { %v1964_v53 = vadd.f32 %v1928_v22, %v5400_v46  ;;  %v1963_v29 = vadd.f32 %v1927_v59, %v5403_v9  ;;  %v5527_v40 = vadd.f32 %v2516_v48, %v2257_v20  ;;  %v5529_v0 = vadd.f32 %v2515_v1, %v2256_v15  ;;  %v2469_v42 = vpop.permute.xlu1 %2468  ;;  %v2464_v17 = vpop.permute.xlu0 %2463  ;;  %v6291_v48 = vld [vmem:[#allocation192_spill] sm:$0xff] }
 0x2cc   : > { %v2191_v5 = vmul.f32 %v5183_v24, %v6288_v33  ;;  %v2225_v31 = vmul.f32 %v5183_v24, %v6289_v57  ;;  %v2224_v45 = vmul.f32 %v5183_v24, %v6290_v32  ;;  %v2595_v11 = vunpack.c.l.bf16 %v3224_v6  ;;  %v6293_v57 = vld [vmem:[#allocation164_spill] sm:$0xff] }
 0x2cd   : > { %v2259_v50 = vadd.f32 %v2223_v36, %v1964_v53  ;;  %v2258_v46 = vadd.f32 %v2222_v52, %v1963_v29  ;;  %v2518_v9 = vmul.f32 %v5247_v16, %v2469_v42  ;;  %v2517_v22 = vmul.f32 %v5247_v16, %v2464_v17  ;;  %v6294_v29 = vld [vmem:[#allocation30_spill] sm:$0xff] }
 0x2ce   : > { %v1937_v59 = vadd.f32 %v1901_v60, %v5176_v8  ;;  %v1966_v20 = vadd.f32 %v1930_v7, %v5412_v21  ;;  %v1965_v15 = vadd.f32 %v1929_v58, %v5437_v26  ;;  %v2190_v1 = vmul.f32 %v5183_v24, %v6291_v48 }
 0x2cf   : > { %v1904_v33 = vmul.f32 %v4985_v51, %v6292_v41  ;;  %v1903_v36 = vmul.f32 %v4985_v51, %v6293_v57  ;;  %v5548_v52 = vadd.f32 %v2518_v9, %v2259_v50  ;;  %v5550_v6 = vadd.f32 %v2517_v22, %v2258_v46  ;;  %v2479_v21 = vpop.permute.xlu1 %2478  ;;  %v2474_v7 = vpop.permute.xlu0 %2473  ;;  %v6298_v50 = vld [vmem:[#allocation196_spill] sm:$0xff]  ;;  %v6299_v46 = vld [vmem:[#allocation197_spill] sm:$0xff] }
 0x2d0   : > { %v2227_v53 = vadd.f32 %v2191_v5, %v5452_v30  ;;  %v2261_v8 = vadd.f32 %v2225_v31, %v1966_v20  ;;  %v2260_v60 = vadd.f32 %v2224_v45, %v1965_v15  ;;  %v5554_v26 = vrot.slane %v2595_v11, %v4289_v49  ;;  %v6295_v30 = vld [vmem:[#allocation193_spill] sm:$0xff]  ;;  %v6296_v31 = vld [vmem:[#allocation194_spill] sm:$0xff]  ;;  %v6297_v49 = vld [vmem:[#allocation195_spill] sm:$0xff] }
 0x2d1   : > { %v2486_v58 = vmul.f32 %v5247_v16, %v5061_v14  ;;  %v2485_v32 = vmul.f32 %v5247_v16, %v6294_v29  ;;  %v2520_v51 = vmul.f32 %v5247_v16, %v2479_v21  ;;  %v2519_v42 = vmul.f32 %v5247_v16, %v2474_v7  ;;  %v6300_v15 = vld [vmem:[#allocation35_spill] sm:$0xff]  ;;  %v6302_v57 = vld [vmem:[#allocation32_spill] sm:$0xff] }
 0x2d2   : > { %v2226_v17 = vadd.f32 %v2190_v1, %v5455_v35  ;;  %v2193_v5 = vmul.f32 %v5183_v24, %v6295_v30  ;;  %v2192_v45 = vmul.f32 %v5183_v24, %v6296_v31  ;;  %v2195_v11 = vmul.f32 %v5183_v24, %v6297_v49  ;;  %v6301_v1 = vld [vmem:[#allocation31_spill] sm:$0xff]  ;;  %v5597_v49 = vld [vmem:[%s5838_s2] ss:$0 sm:$0xff] }
 0x2d3   : > { %v2194_v14 = vmul.f32 %v5183_v24, %v6298_v50  ;;  %v2197_v9 = vmul.f32 %v5183_v24, %v6299_v46  ;;  %v5573_v22 = vadd.f32 %v2520_v51, %v2261_v8  ;;  %v5575_v20 = vadd.f32 %v2519_v42, %v2260_v60  ;;  %v2604_v7 = vpop.permute.xlu1 %2603  ;;  %v2599_v29 = vpop.permute.xlu0 %2598  ;;  %v6303_v51 = vld [vmem:[#allocation198_spill] sm:$0xff] }
 0x2d4   : > { %v5578_v35 = vadd.f32 %v1904_v33, %v5186_v44  ;;  %v5581_v48 = vadd.f32 %v1903_v36, %v6300_v15  ;;  %v2488_v41 = vmul.f32 %v5247_v16, %v6301_v1  ;;  %v2487_v21 = vmul.f32 %v5247_v16, %v6302_v57 }
 0x2d5   : > { %v2522_v30 = vadd.f32 %v2486_v58, %v2227_v53  ;;  %v2521_v31 = vadd.f32 %v2485_v32, %v2226_v17  ;;  %v2781_v8 = vmul.f32 %v5554_v26, %v2604_v7  ;;  %v2780_v60 = vmul.f32 %v5554_v26, %v2599_v29 }
 0x2d6   : > { %v2229_v44 = vadd.f32 %v2193_v5, %v5464_v18  ;;  %v2228_v33 = vadd.f32 %v2192_v45, %v5489_v38  ;;  %v2231_v36 = vadd.f32 %v2195_v11, %v5504_v12  ;;  %v2196_v42 = vmul.f32 %v5183_v24, %v6303_v51  ;;  %v6304_v5 = vld [vmem:[#allocation33_spill] sm:$0xff]  ;;  %v6305_v12 = vld [vmem:[#allocation34_spill] sm:$0xff] }
 0x2d7   : > { %v2230_v53 = vadd.f32 %v2194_v14, %v5507_v56  ;;  %v2233_v58 = vadd.f32 %v2197_v9, %v1938_v63  ;;  %v2817_v32 = vadd.f32 %v2781_v8, %v2522_v30  ;;  %v2816_v17 = vadd.f32 %v2780_v60, %v2521_v31  ;;  %v5607_v11 = vld [vmem:[%s5839_s3] ss:$0 sm:$0xff]  ;;  %v2614_v46 = vpop.permute.xlu1 %2613  ;;  %v2609_v15 = vpop.permute.xlu0 %2608 }
 0x2d8   : > { %v2524_v50 = vadd.f32 %v2488_v41, %v2229_v44  ;;  %v2523_v18 = vadd.f32 %v2487_v21, %v2228_v33  ;;  %v2490_v38 = vmul.f32 %v5247_v16, %v6304_v5  ;;  %v2489_v45 = vmul.f32 %v5247_v16, %v6305_v12  ;;  %v6306_v41 = vld [vmem:[#allocation36_spill] sm:$0xff]  ;;  %v6307_v21 = vld [vmem:[#allocation37_spill] sm:$0xff]  ;;  %v6308_v60 = vld [vmem:[#allocation2_spill] sm:$0xff] }
 0x2d9   : > { %v2860_v56 = vmul.f32 %v5597_v49, %v2817_v32  ;;  %v2859_v63 = vmul.f32 %v5597_v49, %v2816_v17  ;;  %v2783_v14 = vmul.f32 %v5554_v26, %v2614_v46  ;;  %v2782_v9 = vmul.f32 %v5554_v26, %v2609_v15  ;;  %v6309_v33 = vld [vmem:[#allocation3_spill] sm:$0xff] }
 0x2da   : > { %v2232_v1 = vadd.f32 %v2196_v42, %v1937_v59  ;;  %v2492_v57 = vmul.f32 %v5247_v16, %v6306_v41  ;;  %v2491_v7 = vmul.f32 %v5247_v16, %v6307_v21  ;;  %v2199_v44 = vmul.f32 %v5183_v24, %v6308_v60 }
 0x2db   : > { %v2903_v29 = vadd.f32 %v5607_v11, %v2860_v56  ;;  %v2902_v30 = vadd.f32 %v5607_v11, %v2859_v63  ;;  %v2819_v31 = vadd.f32 %v2783_v14, %v2524_v50  ;;  %v2818_v8 = vadd.f32 %v2782_v9, %v2523_v18  ;;  %v2624_v32 = vpop.permute.xlu1 %2623  ;;  %v2619_v17 = vpop.permute.xlu0 %2618  ;;  %v6311_v14 = vld [vmem:[#allocation39_spill] sm:$0xff] }
 0x2dc   : > { %v2198_v59 = vmul.f32 %v5183_v24, %v6309_v33  ;;  %v2526_v51 = vadd.f32 %v2490_v38, %v2231_v36  ;;  %v2525_v42 = vadd.f32 %v2489_v45, %v2230_v53  ;;  %v2528_v56 = vadd.f32 %v2492_v57, %v2233_v58  ;;  %v6310_v45 = vld [vmem:[#allocation38_spill] sm:$0xff] }
 0x2dd   : > { %v2939_v5 = vmax.f32 %v2903_v29, 0.0  ;;  %v2938_v12 = vmax.f32 %v2902_v30, 0.0  ;;  %v2862_v46 = vmul.f32 %v5597_v49, %v2819_v31  ;;  %v2861_v15 = vmul.f32 %v5597_v49, %v2818_v8 }
 0x2de   : > { %v2527_v63 = vadd.f32 %v2491_v7, %v2232_v1  ;;  %v2785_v24 = vmul.f32 %v5554_v26, %v2624_v32  ;;  %v2784_v36 = vmul.f32 %v5554_v26, %v2619_v17  ;;  %v2494_v58 = vmul.f32 %v5247_v16, %v6310_v45 }
 0x2df   : > { %v3266_v53 = vpack.c.bf16 %v2939_v5, %v2939_v5  ;;  %v3265_v50 = vpack.c.bf16 %v2938_v12, %v2938_v12  ;;  %v2905_v18 = vadd.f32 %v5607_v11, %v2862_v46  ;;  %v2904_v38 = vadd.f32 %v5607_v11, %v2861_v15  ;;  %v2634_v57 = vpop.permute.xlu1 %2633  ;;  %v2629_v21 = vpop.permute.xlu0 %2628 }
 0x2e0   : > { %v2493_v9 = vmul.f32 %v5247_v16, %v6311_v14  ;;  %v2821_v1 = vadd.f32 %v2785_v24, %v2526_v51  ;;  %v2820_v41 = vadd.f32 %v2784_v36, %v2525_v42  ;;  %v2787_v30 = vmul.f32 %v5554_v26, %v2634_v57 }
 0x2e1   : > { %3120 = vst.msk [vmem:[%s5629_s21 + $0x4] sm:$0xf] %vm3118_vm0, %v3266_v53  ;;  %3119 = vst.msk [vmem:[%s5629_s21] sm:$0xf] %vm3118_vm0, %v3265_v50  ;;  %v2941_v7 = vmax.f32 %v2905_v18, 0.0  ;;  %v2940_v29 = vmax.f32 %v2904_v38, 0.0  ;;  %v2786_v31 = vmul.f32 %v5554_v26, %v2629_v21  ;;  %v2235_v8 = vadd.f32 %v2199_v44, %v5578_v35 }
 0x2e2   : > { %v2234_v16 = vadd.f32 %v2198_v59, %v5581_v48  ;;  %v2864_v60 = vmul.f32 %v5597_v49, %v2821_v1  ;;  %v2863_v33 = vmul.f32 %v5597_v49, %v2820_v41  ;;  %v2823_v32 = vadd.f32 %v2787_v30, %v2528_v56 }
 0x2e3   : > { %v3268_v51 = vpack.c.bf16 %v2941_v7, %v2941_v7  ;;  %v3267_v42 = vpack.c.bf16 %v2940_v29, %v2940_v29  ;;  %v2822_v17 = vadd.f32 %v2786_v31, %v2527_v63  ;;  %v2530_v5 = vadd.f32 %v2494_v58, %v2235_v8  ;;  %v2644_v24 = vpop.permute.xlu1 %2643  ;;  %v2639_v36 = vpop.permute.xlu0 %2638 }
 0x2e4   : > { %v2529_v12 = vadd.f32 %v2493_v9, %v2234_v16  ;;  %v2907_v46 = vadd.f32 %v5607_v11, %v2864_v60  ;;  %v2906_v15 = vadd.f32 %v5607_v11, %v2863_v33  ;;  %v2866_v35 = vmul.f32 %v5597_v49, %v2823_v32  ;;  %v6312_v33 = vld [vmem:[#allocation40_spill] sm:$0xff] }
 0x2e5   : > { %3122 = vst.msk [vmem:[%s5629_s21 + $0xc] sm:$0xf] %vm3118_vm0, %v3268_v51  ;;  %3121 = vst.msk [vmem:[%s5629_s21 + $0x8] sm:$0xf] %vm3118_vm0, %v3267_v42  ;;  %v2865_v48 = vmul.f32 %v5597_v49, %v2822_v17  ;;  %v2789_v44 = vmul.f32 %v5554_v26, %v2644_v24  ;;  %v2788_v59 = vmul.f32 %v5554_v26, %v2639_v36 }
 0x2e6   : > { %v2943_v56 = vmax.f32 %v2907_v46, 0.0  ;;  %v2942_v63 = vmax.f32 %v2906_v15, 0.0  ;;  %v2909_v53 = vadd.f32 %v5607_v11, %v2866_v35 }
 0x2e7   : > { %v2908_v50 = vadd.f32 %v5607_v11, %v2865_v48  ;;  %v2825_v18 = vadd.f32 %v2789_v44, %v2530_v5  ;;  %v2824_v38 = vadd.f32 %v2788_v59, %v2529_v12  ;;  %v2654_v14 = vpop.permute.xlu1 %2653  ;;  %v2649_v9 = vpop.permute.xlu0 %2648 }
 0x2e8   : > { %v3270_v45 = vpack.c.bf16 %v2943_v56, %v2943_v56  ;;  %v3269_v58 = vpack.c.bf16 %v2942_v63, %v2942_v63  ;;  %v2945_v1 = vmax.f32 %v2909_v53, 0.0  ;;  %v2791_v7 = vmul.f32 %v5554_v26, %v2654_v14 }
 0x2e9   : > { %v2944_v41 = vmax.f32 %v2908_v50, 0.0  ;;  %v2868_v57 = vmul.f32 %v5597_v49, %v2825_v18  ;;  %v2867_v21 = vmul.f32 %v5597_v49, %v2824_v38  ;;  %v2790_v29 = vmul.f32 %v5554_v26, %v2649_v9 }
 0x2ea   : > { %3124 = vst.msk [vmem:[%s5629_s21 + $0x14] sm:$0xf] %vm3118_vm0, %v3270_v45  ;;  %3123 = vst.msk [vmem:[%s5629_s21 + $0x10] sm:$0xf] %vm3118_vm0, %v3269_v58  ;;  %v3272_v30 = vpack.c.bf16 %v2945_v1, %v2945_v1  ;;  %v2827_v60 = vadd.f32 %v2791_v7, %v5270_v34 }
 0x2eb   : > { %v3271_v31 = vpack.c.bf16 %v2944_v41, %v2944_v41  ;;  %v2911_v8 = vadd.f32 %v5607_v11, %v2868_v57  ;;  %v2910_v16 = vadd.f32 %v5607_v11, %v2867_v21  ;;  %v2826_v51 = vadd.f32 %v2790_v29, %v6312_v33  ;;  %v2664_v42 = vpop.permute.xlu1 %2663  ;;  %v2659_v32 = vpop.permute.xlu0 %2658 }
 0x2ec   : > { %3126 = vst.msk [vmem:[%s5629_s21 + $0x1c] sm:$0xf] %vm3118_vm0, %v3272_v30  ;;  %v2793_v12 = vmul.f32 %v5554_v26, %v2664_v42  ;;  %v2792_v46 = vmul.f32 %v5554_v26, %v2659_v32  ;;  %v2870_v15 = vmul.f32 %v5597_v49, %v2827_v60 }
 0x2ed   : > { %3125 = vst.msk [vmem:[%s5629_s21 + $0x18] sm:$0xf] %vm3118_vm0, %v3271_v31  ;;  %v2947_v17 = vmax.f32 %v2911_v8, 0.0  ;;  %v2946_v5 = vmax.f32 %v2910_v16, 0.0  ;;  %v2869_v34 = vmul.f32 %v5597_v49, %v2826_v51 }
 0x2ee   : > { %v2829_v35 = vadd.f32 %v2793_v12, %v5293_v13  ;;  %v2828_v48 = vadd.f32 %v2792_v46, %v5295_v25  ;;  %v2913_v44 = vadd.f32 %v5607_v11, %v2870_v15 }
 0x2ef   : > { %v3274_v24 = vpack.c.bf16 %v2947_v17, %v2947_v17  ;;  %v3273_v36 = vpack.c.bf16 %v2946_v5, %v2946_v5  ;;  %v2912_v59 = vadd.f32 %v5607_v11, %v2869_v34  ;;  %v2674_v56 = vpop.permute.xlu1 %2673  ;;  %v2669_v63 = vpop.permute.xlu0 %2668 }
 0x2f0   : > { %v2872_v53 = vmul.f32 %v5597_v49, %v2829_v35  ;;  %v2871_v50 = vmul.f32 %v5597_v49, %v2828_v48  ;;  %v2795_v18 = vmul.f32 %v5554_v26, %v2674_v56  ;;  %v2794_v13 = vmul.f32 %v5554_v26, %v2669_v63 }
 0x2f1   : > { %3128 = vst.msk [vmem:[%s5629_s21 + $0x24] sm:$0xf] %vm3118_vm0, %v3274_v24  ;;  %3127 = vst.msk [vmem:[%s5629_s21 + $0x20] sm:$0xf] %vm3118_vm0, %v3273_v36  ;;  %v2949_v25 = vmax.f32 %v2913_v44, 0.0  ;;  %v2948_v38 = vmax.f32 %v2912_v59, 0.0 }
 0x2f2   : > { %v2915_v45 = vadd.f32 %v5607_v11, %v2872_v53  ;;  %v2914_v58 = vadd.f32 %v5607_v11, %v2871_v50  ;;  %v2831_v14 = vadd.f32 %v2795_v18, %v5318_v47  ;;  %v2830_v9 = vadd.f32 %v2794_v13, %v5320_v62 }
 0x2f3   : > { %v3276_v1 = vpack.c.bf16 %v2949_v25, %v2949_v25  ;;  %v3275_v41 = vpack.c.bf16 %v2948_v38, %v2948_v38  ;;  %v2684_v57 = vpop.permute.xlu1 %2683  ;;  %v2679_v21 = vpop.permute.xlu0 %2678 }
 0x2f4   : > { %v2951_v7 = vmax.f32 %v2915_v45, 0.0  ;;  %v2950_v29 = vmax.f32 %v2914_v58, 0.0  ;;  %v2874_v30 = vmul.f32 %v5597_v49, %v2831_v14  ;;  %v2873_v31 = vmul.f32 %v5597_v49, %v2830_v9 }
 0x2f5   : > { %3130 = vst.msk [vmem:[%s5629_s21 + $0x2c] sm:$0xf] %vm3118_vm0, %v3276_v1  ;;  %3129 = vst.msk [vmem:[%s5629_s21 + $0x28] sm:$0xf] %vm3118_vm0, %v3275_v41  ;;  %v2797_v47 = vmul.f32 %v5554_v26, %v2684_v57  ;;  %v2796_v62 = vmul.f32 %v5554_v26, %v2679_v21 }
 0x2f6   : > { %v3278_v8 = vpack.c.bf16 %v2951_v7, %v2951_v7  ;;  %v3277_v16 = vpack.c.bf16 %v2950_v29, %v2950_v29  ;;  %v2917_v60 = vadd.f32 %v5607_v11, %v2874_v30  ;;  %v2916_v33 = vadd.f32 %v5607_v11, %v2873_v31 }
 0x2f7   : > { %v2833_v51 = vadd.f32 %v2797_v47, %v5343_v54  ;;  %v2832_v42 = vadd.f32 %v2796_v62, %v5345_v61  ;;  %v2694_v32 = vpop.permute.xlu1 %2693  ;;  %v2689_v17 = vpop.permute.xlu0 %2688 }
 0x2f8   : > { %3132 = vst.msk [vmem:[%s5629_s21 + $0x34] sm:$0xf] %vm3118_vm0, %v3278_v8  ;;  %3131 = vst.msk [vmem:[%s5629_s21 + $0x30] sm:$0xf] %vm3118_vm0, %v3277_v16  ;;  %v2953_v5 = vmax.f32 %v2917_v60, 0.0  ;;  %v2952_v12 = vmax.f32 %v2916_v33, 0.0  ;;  %v2799_v46 = vmul.f32 %v5554_v26, %v2694_v32  ;;  %v2798_v15 = vmul.f32 %v5554_v26, %v2689_v17 }
 0x2f9   : > { %v2876_v34 = vmul.f32 %v5597_v49, %v2833_v51  ;;  %v2875_v54 = vmul.f32 %v5597_v49, %v2832_v42 }
 0x2fa   : > { %v3280_v24 = vpack.c.bf16 %v2953_v5, %v2953_v5  ;;  %v3279_v61 = vpack.c.bf16 %v2952_v12, %v2952_v12  ;;  %v2835_v36 = vadd.f32 %v2799_v46, %v5370_v3  ;;  %v2834_v35 = vadd.f32 %v2798_v15, %v5372_v10 }
 0x2fb   : > { %v2919_v48 = vadd.f32 %v5607_v11, %v2876_v34  ;;  %v2918_v44 = vadd.f32 %v5607_v11, %v2875_v54  ;;  %v2704_v59 = vpop.permute.xlu1 %2703 }
 0x2fc   : > { %v2699_v56 = vpop.permute.xlu0 %2698  ;;  %3134 = vst.msk [vmem:[%s5629_s21 + $0x3c] sm:$0xf] %vm3118_vm0, %v3280_v24  ;;  %3133 = vst.msk [vmem:[%s5629_s21 + $0x38] sm:$0xf] %vm3118_vm0, %v3279_v61  ;;  %v2878_v63 = vmul.f32 %v5597_v49, %v2835_v36  ;;  %v2877_v53 = vmul.f32 %v5597_v49, %v2834_v35  ;;  %v2801_v50 = vmul.f32 %v5554_v26, %v2704_v59 }
 0x2fd   : > { %v2800_v3 = vmul.f32 %v5554_v26, %v2699_v56  ;;  %v2955_v10 = vmax.f32 %v2919_v48, 0.0  ;;  %v2954_v18 = vmax.f32 %v2918_v44, 0.0 }
 0x2fe   : > { %v2921_v13 = vadd.f32 %v5607_v11, %v2878_v63  ;;  %v2920_v25 = vadd.f32 %v5607_v11, %v2877_v53  ;;  %v2837_v38 = vadd.f32 %v2801_v50, %v5395_v55 }
 0x2ff   : > { %v2836_v45 = vadd.f32 %v2800_v3, %v5397_v23  ;;  %v3282_v58 = vpack.c.bf16 %v2955_v10, %v2955_v10  ;;  %v3281_v14 = vpack.c.bf16 %v2954_v18, %v2954_v18 }
 0x300   : > { %v2714_v9 = vpop.permute.xlu1 %2713  ;;  %v2709_v1 = vpop.permute.xlu0 %2708  ;;  %v2957_v41 = vmax.f32 %v2921_v13, 0.0  ;;  %v2956_v57 = vmax.f32 %v2920_v25, 0.0  ;;  %v2880_v21 = vmul.f32 %v5597_v49, %v2837_v38 }
 0x301   : > { %v2879_v7 = vmul.f32 %v5597_v49, %v2836_v45  ;;  %3136 = vst.msk [vmem:[%s5629_s21 + $0x44] sm:$0xf] %vm3118_vm0, %v3282_v58  ;;  %3135 = vst.msk [vmem:[%s5629_s21 + $0x40] sm:$0xf] %vm3118_vm0, %v3281_v14  ;;  %v2803_v55 = vmul.f32 %v5554_v26, %v2714_v9  ;;  %v2802_v23 = vmul.f32 %v5554_v26, %v2709_v1 }
 0x302   : > { %v3284_v29 = vpack.c.bf16 %v2957_v41, %v2957_v41  ;;  %v3283_v30 = vpack.c.bf16 %v2956_v57, %v2956_v57  ;;  %v2923_v31 = vadd.f32 %v5607_v11, %v2880_v21 }
 0x303   : > { %v2922_v47 = vadd.f32 %v5607_v11, %v2879_v7  ;;  %v2839_v62 = vadd.f32 %v2803_v55, %v5422_v4  ;;  %v2838_v8 = vadd.f32 %v2802_v23, %v5424_v28 }
 0x304   : > { %v2724_v16 = vpop.permute.xlu1 %2723  ;;  %v2719_v60 = vpop.permute.xlu0 %2718  ;;  %3138 = vst.msk [vmem:[%s5629_s21 + $0x4c] sm:$0xf] %vm3118_vm0, %v3284_v29  ;;  %3137 = vst.msk [vmem:[%s5629_s21 + $0x48] sm:$0xf] %vm3118_vm0, %v3283_v30  ;;  %v2959_v33 = vmax.f32 %v2923_v31, 0.0 }
 0x305   : > { %v2958_v51 = vmax.f32 %v2922_v47, 0.0  ;;  %v2805_v42 = vmul.f32 %v5554_v26, %v2724_v16  ;;  %v2804_v32 = vmul.f32 %v5554_v26, %v2719_v60  ;;  %v2882_v17 = vmul.f32 %v5597_v49, %v2839_v62 }
 0x306   : > { %v2881_v4 = vmul.f32 %v5597_v49, %v2838_v8  ;;  %v3286_v5 = vpack.c.bf16 %v2959_v33, %v2959_v33 }
 0x307   : > { %v3285_v28 = vpack.c.bf16 %v2958_v51, %v2958_v51  ;;  %v2841_v12 = vadd.f32 %v2805_v42, %v5447_v39  ;;  %v2840_v46 = vadd.f32 %v2804_v32, %v5449_v37  ;;  %v2925_v15 = vadd.f32 %v5607_v11, %v2882_v17 }
 0x308   : > { %v2924_v34 = vadd.f32 %v5607_v11, %v2881_v4  ;;  %v2734_v54 = vpop.permute.xlu1 %2733  ;;  %v2729_v24 = vpop.permute.xlu0 %2728  ;;  %3140 = vst.msk [vmem:[%s5629_s21 + $0x54] sm:$0xf] %vm3118_vm0, %v3286_v5 }
 0x309   : > { %3139 = vst.msk [vmem:[%s5629_s21 + $0x50] sm:$0xf] %vm3118_vm0, %v3285_v28  ;;  %v2884_v61 = vmul.f32 %v5597_v49, %v2841_v12  ;;  %v2883_v36 = vmul.f32 %v5597_v49, %v2840_v46  ;;  %v2807_v35 = vmul.f32 %v5554_v26, %v2734_v54  ;;  %v2806_v39 = vmul.f32 %v5554_v26, %v2729_v24 }
 0x30a   : > { %v2961_v37 = vmax.f32 %v2925_v15, 0.0  ;;  %v2960_v48 = vmax.f32 %v2924_v34, 0.0 }
 0x30b   : > { %v2927_v44 = vadd.f32 %v5607_v11, %v2884_v61  ;;  %v2926_v59 = vadd.f32 %v5607_v11, %v2883_v36  ;;  %v2843_v56 = vadd.f32 %v2807_v35, %v5474_v19  ;;  %v2842_v63 = vadd.f32 %v2806_v39, %v5476_v2 }
 0x30c   : > { %v3288_v53 = vpack.c.bf16 %v2961_v37, %v2961_v37  ;;  %v3287_v50 = vpack.c.bf16 %v2960_v48, %v2960_v48  ;;  %v2744_v3 = vpop.permute.xlu1 %2743  ;;  %v2739_v10 = vpop.permute.xlu0 %2738 }
 0x30d   : > { %v2963_v18 = vmax.f32 %v2927_v44, 0.0  ;;  %v2962_v13 = vmax.f32 %v2926_v59, 0.0  ;;  %v2886_v25 = vmul.f32 %v5597_v49, %v2843_v56  ;;  %v2885_v38 = vmul.f32 %v5597_v49, %v2842_v63 }
 0x30e   : > { %3142 = vst.msk [vmem:[%s5629_s21 + $0x5c] sm:$0xf] %vm3118_vm0, %v3288_v53  ;;  %3141 = vst.msk [vmem:[%s5629_s21 + $0x58] sm:$0xf] %vm3118_vm0, %v3287_v50  ;;  %v2809_v19 = vmul.f32 %v5554_v26, %v2744_v3  ;;  %v2808_v2 = vmul.f32 %v5554_v26, %v2739_v10 }
 0x30f   : > { %v3290_v45 = vpack.c.bf16 %v2963_v18, %v2963_v18  ;;  %v3289_v58 = vpack.c.bf16 %v2962_v13, %v2962_v13  ;;  %v2929_v14 = vadd.f32 %v5607_v11, %v2886_v25  ;;  %v2928_v9 = vadd.f32 %v5607_v11, %v2885_v38 }
 0x310   : > { %v2845_v1 = vadd.f32 %v2809_v19, %v5499_v43  ;;  %v2844_v41 = vadd.f32 %v2808_v2, %v5501_v27  ;;  %v2754_v57 = vpop.permute.xlu1 %2753  ;;  %v2749_v21 = vpop.permute.xlu0 %2748 }
 0x311   : > { %3144 = vst.msk [vmem:[%s5629_s21 + $0x64] sm:$0xf] %vm3118_vm0, %v3290_v45  ;;  %3143 = vst.msk [vmem:[%s5629_s21 + $0x60] sm:$0xf] %vm3118_vm0, %v3289_v58  ;;  %v2965_v7 = vmax.f32 %v2929_v14, 0.0  ;;  %v2964_v55 = vmax.f32 %v2928_v9, 0.0  ;;  %v2811_v23 = vmul.f32 %v5554_v26, %v2754_v57  ;;  %v2810_v29 = vmul.f32 %v5554_v26, %v2749_v21 }
 0x312   : > { %v2888_v30 = vmul.f32 %v5597_v49, %v2845_v1  ;;  %v2887_v43 = vmul.f32 %v5597_v49, %v2844_v41 }
 0x313   : > { %v3292_v31 = vpack.c.bf16 %v2965_v7, %v2965_v7  ;;  %v3291_v27 = vpack.c.bf16 %v2964_v55, %v2964_v55  ;;  %v2847_v47 = vadd.f32 %v2811_v23, %v5527_v40  ;;  %v2846_v62 = vadd.f32 %v2810_v29, %v5529_v0 }
 0x314   : > { %v2931_v8 = vadd.f32 %v5607_v11, %v2888_v30  ;;  %v2930_v16 = vadd.f32 %v5607_v11, %v2887_v43  ;;  %v2764_v60 = vpop.permute.xlu1 %2763 }
 0x315   : > { %v2759_v33 = vpop.permute.xlu0 %2758  ;;  %3146 = vst.msk [vmem:[%s5629_s21 + $0x6c] sm:$0xf] %vm3118_vm0, %v3292_v31  ;;  %3145 = vst.msk [vmem:[%s5629_s21 + $0x68] sm:$0xf] %vm3118_vm0, %v3291_v27  ;;  %v2890_v51 = vmul.f32 %v5597_v49, %v2847_v47  ;;  %v2889_v42 = vmul.f32 %v5597_v49, %v2846_v62  ;;  %v2813_v32 = vmul.f32 %v5554_v26, %v2764_v60 }
 0x316   : > { %v2812_v40 = vmul.f32 %v5554_v26, %v2759_v33  ;;  %v2967_v0 = vmax.f32 %v2931_v8, 0.0  ;;  %v2966_v17 = vmax.f32 %v2930_v16, 0.0 }
 0x317   : > { %v2933_v4 = vadd.f32 %v5607_v11, %v2890_v51  ;;  %v2932_v5 = vadd.f32 %v5607_v11, %v2889_v42  ;;  %v2849_v28 = vadd.f32 %v2813_v32, %v5548_v52 }
 0x318   : > { %v2848_v12 = vadd.f32 %v2812_v40, %v5550_v6  ;;  %v3294_v46 = vpack.c.bf16 %v2967_v0, %v2967_v0  ;;  %v3293_v15 = vpack.c.bf16 %v2966_v17, %v2966_v17  ;;  %v2774_v34 = vpop.permute.xlu1 %2773 }
 0x319   : > { %v2769_v54 = vpop.permute.xlu0 %2768  ;;  %v2969_v24 = vmax.f32 %v2933_v4, 0.0  ;;  %v2968_v61 = vmax.f32 %v2932_v5, 0.0  ;;  %v2892_v36 = vmul.f32 %v5597_v49, %v2849_v28  ;;  %v2815_v52 = vmul.f32 %v5554_v26, %v2774_v34 }
 0x31a   : > { %v2891_v35 = vmul.f32 %v5597_v49, %v2848_v12  ;;  %3148 = vst.msk [vmem:[%s5629_s21 + $0x74] sm:$0xf] %vm3118_vm0, %v3294_v46  ;;  %3147 = vst.msk [vmem:[%s5629_s21 + $0x70] sm:$0xf] %vm3118_vm0, %v3293_v15  ;;  %v2814_v6 = vmul.f32 %v5554_v26, %v2769_v54 }
 0x31b   : > { %v3296_v39 = vpack.c.bf16 %v2969_v24, %v2969_v24  ;;  %v3295_v37 = vpack.c.bf16 %v2968_v61, %v2968_v61  ;;  %v2935_v48 = vadd.f32 %v5607_v11, %v2892_v36  ;;  %v2851_v59 = vadd.f32 %v2815_v52, %v5573_v22 }
 0x31c   : > { %v2934_v44 = vadd.f32 %v5607_v11, %v2891_v35  ;;  %v2850_v56 = vadd.f32 %v2814_v6, %v5575_v20 }
 0x31d   : > { %3150 = vst.msk [vmem:[%s5629_s21 + $0x7c] sm:$0xf] %vm3118_vm0, %v3296_v39  ;;  %3149 = vst.msk [vmem:[%s5629_s21 + $0x78] sm:$0xf] %vm3118_vm0, %v3295_v37  ;;  %v2971_v63 = vmax.f32 %v2935_v48, 0.0  ;;  %v2894_v53 = vmul.f32 %v5597_v49, %v2851_v59 }
 0x31e   : > { %v2970_v26 = vmax.f32 %v2934_v44, 0.0  ;;  %v2893_v50 = vmul.f32 %v5597_v49, %v2850_v56 }
 0x31f   : > { %v3298_v3 = vpack.c.bf16 %v2971_v63, %v2971_v63  ;;  %v2937_v18 = vadd.f32 %v5607_v11, %v2894_v53 }
 0x320   : > { %v3297_v10 = vpack.c.bf16 %v2970_v26, %v2970_v26  ;;  %v2936_v22 = vadd.f32 %v5607_v11, %v2893_v50 }
 0x321   : > { %3152 = vst.msk [vmem:[%s5629_s21 + $0x84] sm:$0xf] %vm3118_vm0, %v3298_v3  ;;  %v2973_v20 = vmax.f32 %v2937_v18, 0.0 }
 0x322   : > { %3151 = vst.msk [vmem:[%s5629_s21 + $0x80] sm:$0xf] %vm3118_vm0, %v3297_v10  ;;  %v2972_v13 = vmax.f32 %v2936_v22, 0.0 }
 0x323   : > { %v3300_v25 = vpack.c.bf16 %v2973_v20, %v2973_v20 }
 0x324   : > { %v3299_v38 = vpack.c.bf16 %v2972_v13, %v2972_v13 }
 0x325   : > { %3154 = vst.msk [vmem:[%s5629_s21 + $0x8c] sm:$0xf] %vm3118_vm0, %v3300_v25 }
 0x326   : > { %3153 = vst.msk [vmem:[%s5629_s21 + $0x88] sm:$0xf] %vm3118_vm0, %v3299_v38 }
 0x327 PF: > { %s14_s15 = sadd.s32 1, %s3320_s15  }
 0x328   : > { %p11_p4 = scmp.ge.s32.totalorder %s14_s15, 4  }
 0x32a   :  { %13 = sbr.rel (!%p11_p4) target bundleno = 1 (0x1), region = 74 }

// kernel: policy_forward.5
= control target key start
LH: loop header
LB: loop body
LE: loop exit
PB: predicated region body
PF: predicated region fallthrough
CT: control target
= control target key end

     0   :  { %s1988_s15 = smov 0   ;;  %s2311_s0 = inlined_call_operand.vmem [shape: f32[2,110,16], index: 0, kind: input, shape index: {}]   ;;  %s2312_s1 = inlined_call_operand.vmem [shape: bf16[9,16,32], index: 1, kind: input, shape index: {}]   ;;  %s2313_s2 = inlined_call_operand.vmem [shape: f32[1,32], index: 2, kind: input, shape index: {}]   ;;  %s2314_s3 = inlined_call_operand.vmem [shape: f32[1,32], index: 3, kind: input, shape index: {}]   ;;  %s2315_s4 = inlined_call_operand.vmem [shape: bf16[2,80,32], index: 4, kind: output, shape index: {}]  }
   0x1 LB: > { %s1427_s16 = sadd.s32 4294967295, %s1959_s15   ;;  %p1431_p0 = scmp.ge.s32.totalorder %s1959_s15, 1  ;;  %s1959_s15 = sphi %s1988_s15, %s14_s15  }
   0x2   : > { %p162_p1 = scmp.lt.s32.totalorder %s1959_s15, 3 }
   0x4   : > { %p163_p2 = pnand %p1431_p0, %p162_p1 }
   0x5   : > { %v1999_v0 = vld [vmem:[%s2312_s1 + $0x20] sm:$0xff] (!%p163_p2)   ;;  %v1961_v1 = vmov (!%p163_p2), 0.0   ;;  %v1945_v2 = vld [vmem:[%s2312_s1 + $0x8] sm:$0xff] (!%p163_p2)   ;;  %vm1962_vm0 = vmmov (!%p163_p2), 0   ;;  %p188_p3 = scmp.lt.s32.totalorder (!%p163_p2), %s1427_s16, 1  ;;  %vm240_vm1 = vcmask (!%p163_p2), 130048  }
   0x6   : > { %166 = sbr.rel (%p163_p2) target bundleno = 422 (0x1a6), region = 36  ;;  %1670 = vmatprep.subr.bf16.mxu0 (!%p163_p2), %v1961_v1  ;;  %1582 = vmatprep.subr.bf16.mxu1 (!%p163_p2), %v1961_v1  ;;  %v1946_v8 = vld [vmem:[%s2312_s1 + $0x28] sm:$0xff] (!%p163_p2)   ;;  %v1947_v10 = vld [vmem:[%s2312_s1] sm:$0xff] (!%p163_p2)   ;;  %v1948_v29 = vld [vmem:[%s2312_s1 + $0x30] sm:$0xff] (!%p163_p2)   ;;  %vm1361_vm2 = vcmask (!%p163_p2), 257024  }
   0x7   : > { %1671 = vmatpush3.bf16.msra.mxu0 (!%p163_p2), %v1999_v0  ;;  %1584 = vmatprep.mubr.msk.bf16.mxu1 (!%p163_p2), %vm1962_vm0, %v1961_v1  ;;  %v1949_v42 = vld [vmem:[%s2312_s1 + $0x10] sm:$0xff] (!%p163_p2)   ;;  %v1950_v59 = vld [vmem:[%s2312_s1 + $0x38] sm:$0xff] (!%p163_p2)  }
   0x8   : > { %1583 = vmatpush3.bf16.msra.mxu1 (!%p163_p2), %v1945_v2  ;;  %1672 = vmatprep.mubr.msk.bf16.mxu0 (!%p163_p2), %vm1962_vm0, %v1961_v1 }
   0x9   : > { %1692 = vmatprep.subr.bf16.mxu0 (!%p163_p2), %v1961_v1  ;;  %1604 = vmatprep.subr.bf16.mxu1 (!%p163_p2), %v1961_v1 }
   0xd   : > { %s2317_s16 = smov (!%p188_p3, %s1427_s16), 1 }
   0xe   : > { %s1932_s21 = smul.u32 112, %s2317_s16 }
   0xf   : > { %s1933_s19 = smul.u32 40, %s2317_s16 }
  0x10   : > { %s2019_s24 = scalar_lea.vmem %s2311_s0, %s1932_s21 }
  0x11   : > { %v216_v3 = vld [vmem:[%s2019_s24 + $0x1] sm:$0xff]  ;;  %v217_v4 = vld [vmem:[%s2019_s24 + $0x9] sm:$0xff]  ;;  %v668_v7 = vld [vmem:[%s2019_s24 + $0x13] sm:$0xff]  ;;  %s2270_s22 = scalar_lea.vmem %s2315_s4, %s1933_s19 }
  0x12   : > { %v667_v5 = vld [vmem:[%s2019_s24 + $0xb] sm:$0xff]  ;;  %v226_v6 = vpack.c.bf16 %v217_v4, %v216_v3  ;;  %v219_v12 = vld [vmem:[%s2019_s24 + $0x19] sm:$0xff]  ;;  %v670_v14 = vld [vmem:[%s2019_s24 + $0x23] sm:$0xff] }
  0x13   : > { %v677_v9 = vpack.c.bf16 %v668_v7, %v667_v5  ;;  %v218_v11 = vld [vmem:[%s2019_s24 + $0x11] sm:$0xff]  ;;  %v669_v13 = vld [vmem:[%s2019_s24 + $0x1b] sm:$0xff]  ;;  %v221_v18 = vld [vmem:[%s2019_s24 + $0x29] sm:$0xff] }
  0x14   : > { %1585 = vmatmul.mubr.msk.bf16.vlgmr.msra.gmra.mrb[0].mxu1 %vm240_vm1, %v226_v6  ;;  %v227_v15 = vpack.c.bf16 %v219_v12, %v218_v11  ;;  %v678_v16 = vpack.c.bf16 %v670_v14, %v669_v13  ;;  %v220_v17 = vld [vmem:[%s2019_s24 + $0x21] sm:$0xff]  ;;  %v671_v19 = vld [vmem:[%s2019_s24 + $0x2b] sm:$0xff]  ;;  %v672_v20 = vld [vmem:[%s2019_s24 + $0x33] sm:$0xff] }
  0x15   : > { %1673 = vmatmul.mubr.msk.bf16.vlgmr.msra.gmra.mrb[0].mxu0 %vm240_vm1, %v677_v9  ;;  %1588 = vmatprep.mubr.msk.bf16.mxu1 %vm1962_vm0, %v1961_v1  ;;  %v228_v21 = vpack.c.bf16 %v221_v18, %v220_v17  ;;  %v679_v22 = vpack.c.bf16 %v672_v20, %v671_v19  ;;  %v222_v23 = vld [vmem:[%s2019_s24 + $0x31] sm:$0xff]  ;;  %v223_v24 = vld [vmem:[%s2019_s24 + $0x39] sm:$0xff]  ;;  %v224_v30 = vld [vmem:[%s2019_s24 + $0x41] sm:$0xff] }
  0x16   : > { %1693 = vmatpush3.bf16.msra.mxu0 %v1946_v8  ;;  %1676 = vmatprep.mubr.msk.bf16.mxu0 %vm1962_vm0, %v1961_v1  ;;  %v789_v25 = vld [vmem:[%s2019_s24 + $0xc] sm:$0xff]  ;;  %v790_v26 = vld [vmem:[%s2019_s24 + $0x14] sm:$0xff]  ;;  %v229_v27 = vpack.c.bf16 %v223_v24, %v222_v23  ;;  %v791_v32 = vld [vmem:[%s2019_s24 + $0x1c] sm:$0xff] }
  0x17   : > { %1605 = vmatpush3.bf16.msra.mxu1 %v1947_v10  ;;  %1714 = vmatprep.subr.bf16.mxu0 %v1961_v1  ;;  %v799_v28 = vpack.c.bf16 %v790_v26, %v789_v25  ;;  %v225_v31 = vld [vmem:[%s2019_s24 + $0x49] sm:$0xff]  ;;  %v199_v36 = vld [vmem:[%s2019_s24] sm:$0xff]  ;;  %v794_v39 = vld [vmem:[%s2019_s24 + $0x34] sm:$0xff]  ;;  %v921_v58 = vpack.c.bf16 %v791_v32, %v790_v26 }
  0x18   : > { %1626 = vmatprep.subr.bf16.mxu1 %v1961_v1  ;;  %v792_v33 = vld [vmem:[%s2019_s24 + $0x24] sm:$0xff]  ;;  %v230_v34 = vpack.c.bf16 %v225_v31, %v224_v30  ;;  %v793_v38 = vld [vmem:[%s2019_s24 + $0x2c] sm:$0xff]  ;;  %v202_v44 = vld [vmem:[%s2019_s24 + $0x18] sm:$0xff] }
  0x19   : > { %v800_v35 = vpack.c.bf16 %v792_v33, %v791_v32  ;;  %v200_v37 = vld [vmem:[%s2019_s24 + $0x8] sm:$0xff]  ;;  %v801_v41 = vpack.c.bf16 %v794_v39, %v793_v38  ;;  %v201_v43 = vld [vmem:[%s2019_s24 + $0x10] sm:$0xff]  ;;  %v795_v45 = vld [vmem:[%s2019_s24 + $0x3c] sm:$0xff]  ;;  %v922_v63 = vpack.c.bf16 %v793_v38, %v792_v33 }
  0x1a   : > { %v209_v40 = vpack.c.bf16 %v200_v37, %v199_v36  ;;  %v796_v46 = vld [vmem:[%s2019_s24 + $0x44] sm:$0xff]  ;;  %v210_v47 = vpack.c.bf16 %v202_v44, %v201_v43  ;;  %v797_v51 = vld [vmem:[%s2019_s24 + $0x4c] sm:$0xff]  ;;  %v798_v52 = vld [vmem:[%s2019_s24 + $0x54] sm:$0xff]  ;;  %v923_v5 = vpack.c.bf16 %v795_v45, %v794_v39 }
  0x1b   : > { %v802_v48 = vpack.c.bf16 %v796_v46, %v795_v45  ;;  %v203_v49 = vld [vmem:[%s2019_s24 + $0x20] sm:$0xff]  ;;  %v204_v50 = vld [vmem:[%s2019_s24 + $0x28] sm:$0xff]  ;;  %v803_v54 = vpack.c.bf16 %v798_v52, %v797_v51  ;;  %v205_v55 = vld [vmem:[%s2019_s24 + $0x30] sm:$0xff]  ;;  %v924_v10 = vpack.c.bf16 %v797_v51, %v796_v46 }
  0x1c   : > { %1589 = vmatmul.mubr.msk.bf16.gmra.mrb[4].mxu1 %vm240_vm1, %v227_v15  ;;  %v211_v53 = vpack.c.bf16 %v204_v50, %v203_v49  ;;  %v206_v56 = vld [vmem:[%s2019_s24 + $0x38] sm:$0xff]  ;;  %v207_v60 = vld [vmem:[%s2019_s24 + $0x40] sm:$0xff]  ;;  %v208_v61 = vld [vmem:[%s2019_s24 + $0x48] sm:$0xff] }
  0x1d   : > { %1677 = vmatmul.mubr.msk.bf16.gmra.mrb[4].mxu0 %vm240_vm1, %v678_v16  ;;  %1592 = vmatprep.mubr.msk.bf16.mxu1 %vm1962_vm0, %v1961_v1  ;;  %v212_v57 = vpack.c.bf16 %v206_v56, %v205_v55  ;;  %v213_v62 = vpack.c.bf16 %v208_v61, %v207_v60  ;;  %v423_v2 = vld [vmem:[%s2019_s24 + $0x2] sm:$0xff]  ;;  %v424_v3 = vld [vmem:[%s2019_s24 + $0xa] sm:$0xff]  ;;  %v1951_v6 = vld [vmem:[%s2312_s1 + $0x18] sm:$0xff]  }
  0x1e   : > { %1680 = vmatprep.mubr.msk.bf16.mxu0 %vm1962_vm0, %v1961_v1  ;;  %v433_v4 = vpack.c.bf16 %v424_v3, %v423_v2  ;;  %v425_v7 = vld [vmem:[%s2019_s24 + $0x12] sm:$0xff]  ;;  %v426_v8 = vld [vmem:[%s2019_s24 + $0x1a] sm:$0xff]  ;;  %v427_v11 = vld [vmem:[%s2019_s24 + $0x22] sm:$0xff] }
  0x1f   : > { %v434_v9 = vpack.c.bf16 %v426_v8, %v425_v7  ;;  %v428_v12 = vld [vmem:[%s2019_s24 + $0x2a] sm:$0xff]  ;;  %v920_v13 = vld [vmem:[%s2019_s24 + $0x5c] sm:$0xff]  ;;  %v429_v16 = vld [vmem:[%s2019_s24 + $0x32] sm:$0xff]  ;;  %v555_v31 = vpack.c.bf16 %v425_v7, %v424_v3 }
  0x20   : > { %v435_v14 = vpack.c.bf16 %v428_v12, %v427_v11  ;;  %v925_v15 = vpack.c.bf16 %v920_v13, %v798_v52  ;;  %v430_v17 = vld [vmem:[%s2019_s24 + $0x3a] sm:$0xff]  ;;  %v431_v23 = vld [vmem:[%s2019_s24 + $0x42] sm:$0xff]  ;;  %v432_v24 = vld [vmem:[%s2019_s24 + $0x4a] sm:$0xff] }
  0x21   : > { %v1033_v18 = vld [vmem:[%s2019_s24 + $0x15] sm:$0xff]  ;;  %v1034_v19 = vld [vmem:[%s2019_s24 + $0x1d] sm:$0xff]  ;;  %v436_v20 = vpack.c.bf16 %v430_v17, %v429_v16  ;;  %v1035_v25 = vld [vmem:[%s2019_s24 + $0x25] sm:$0xff] }
  0x22   : > { %v1036_v26 = vld [vmem:[%s2019_s24 + $0x2d] sm:$0xff]  ;;  %v1038_v30 = vld [vmem:[%s2019_s24 + $0x3d] sm:$0xff]  ;;  %v1039_v33 = vld [vmem:[%s2019_s24 + $0x45] sm:$0xff] }
  0x23   : > { %v1041_v37 = vld [vmem:[%s2019_s24 + $0x55] sm:$0xff]  ;;  %v1042_v38 = vld [vmem:[%s2019_s24 + $0x5d] sm:$0xff]  ;;  %v1157_v45 = vld [vmem:[%s2019_s24 + $0x26] sm:$0xff] }
  0x24   : > { %1593 = vmatmul.mubr.msk.bf16.gmra.mrb[8].mxu1 %vm240_vm1, %v228_v21  ;;  %v1043_v21 = vpack.c.bf16 %v1034_v19, %v1033_v18  ;;  %v1047_v39 = vpack.c.bf16 %v1042_v38, %v1041_v37  ;;  %v554_v44 = vld [vmem:[%s2019_s24 + $0x52] sm:$0xff]  ;;  %v673_v49 = vld [vmem:[%s2019_s24 + $0x3b] sm:$0xff]  ;;  %v674_v50 = vld [vmem:[%s2019_s24 + $0x43] sm:$0xff] }
  0x25   : > { %1681 = vmatmul.mubr.msk.bf16.gmra.mrb[8].mxu0 %vm240_vm1, %v679_v22  ;;  %1596 = vmatprep.mubr.msk.bf16.mxu1 %vm1962_vm0, %v1961_v1  ;;  %v1952_v22 = vld [vmem:[%s2312_s1 + $0x40] sm:$0xff]   ;;  %v1158_v46 = vld [vmem:[%s2019_s24 + $0x2e] sm:$0xff]  ;;  %v1159_v51 = vld [vmem:[%s2019_s24 + $0x36] sm:$0xff] }
  0x26   : > { %1694 = vmatprep.mubr.msk.bf16.mxu0 %vm1962_vm0, %v1961_v1  ;;  %v1160_v52 = vld [vmem:[%s2019_s24 + $0x3e] sm:$0xff]  ;;  %v675_v55 = vld [vmem:[%s2019_s24 + $0x4b] sm:$0xff]  ;;  %v676_v56 = vld [vmem:[%s2019_s24 + $0x53] sm:$0xff] }
  0x27   : > { %v1163_v61 = vld [vmem:[%s2019_s24 + $0x56] sm:$0xff] }
  0x2c   : > { %1597 = vmatmul.mubr.msk.bf16.gmra.mrb[12].mxu1 %vm240_vm1, %v229_v27  ;;  %v437_v27 = vpack.c.bf16 %v432_v24, %v431_v23 }
  0x2d   : > { %1695 = vmatmul.mubr.msk.bf16.vlgmr.msra.gmra.mrb[0].mxu0 %vm240_vm1, %v799_v28  ;;  %1600 = vmatprep.mubr.msk.bf16.mxu1 %vm1962_vm0, %v1961_v1  ;;  %v1044_v28 = vpack.c.bf16 %v1036_v26, %v1035_v25 }
  0x2e   : > { %1715 = vmatpush3.bf16.msra.mxu0 %v1948_v29  ;;  %1698 = vmatprep.mubr.msk.bf16.mxu0 %vm1962_vm0, %v1961_v1  ;;  %v1037_v29 = vld [vmem:[%s2019_s24 + $0x35] sm:$0xff] }
  0x2f   : > { %1736 = vmatprep.subr.bf16.mxu0 %v1961_v1  ;;  %v1045_v32 = vpack.c.bf16 %v1038_v30, %v1037_v29 }
  0x34   : > { %1601 = vmatmul.mubr.msk.bf16.gmra.mrb[16].mxu1 %vm240_vm1, %v230_v34  ;;  %v1040_v34 = vld [vmem:[%s2019_s24 + $0x4d] sm:$0xff] }
  0x35   : > { %1699 = vmatmul.mubr.msk.bf16.gmra.mrb[4].mxu0 %vm240_vm1, %v800_v35  ;;  %1606 = vmatprep.mubr.msk.bf16.mxu1 %vm1962_vm0, %v1961_v1  ;;  %v556_v35 = vpack.c.bf16 %v427_v11, %v426_v8  ;;  %v1046_v36 = vpack.c.bf16 %v1040_v34, %v1039_v33 }
  0x36   : > { %1702 = vmatprep.mubr.msk.bf16.mxu0 %vm1962_vm0, %v1961_v1 }
  0x3c   : > { %1607 = vmatmul.mubr.msk.bf16.vlgmr.msra.gmra.mrb[0].mxu1 %vm240_vm1, %v209_v40  ;;  %v1155_v40 = vld [vmem:[%s2019_s24 + $0x16] sm:$0xff] }
  0x3d   : > { %1703 = vmatmul.mubr.msk.bf16.gmra.mrb[8].mxu0 %vm240_vm1, %v801_v41  ;;  %1610 = vmatprep.mubr.msk.bf16.mxu1 %vm1962_vm0, %v1961_v1  ;;  %v1156_v41 = vld [vmem:[%s2019_s24 + $0x1e] sm:$0xff] }
  0x3e   : > { %1706 = vmatprep.mubr.msk.bf16.mxu0 %vm1962_vm0, %v1961_v1  ;;  %1627 = vmatpush3.bf16.msra.mxu1 %v1949_v42  ;;  %v558_v42 = vpack.c.bf16 %v431_v23, %v430_v17  ;;  %v1165_v43 = vpack.c.bf16 %v1156_v41, %v1155_v40  ;;  %v2260_v17 = vld [vmem:[%s2314_s3] ss:$0 sm:$0xff] }
  0x3f   : > { %1648 = vmatprep.subr.bf16.mxu1 %v1961_v1 }
  0x44   : > { %1611 = vmatmul.mubr.msk.bf16.gmra.mrb[4].mxu1 %vm240_vm1, %v210_v47  ;;  %v559_v47 = vpack.c.bf16 %v554_v44, %v432_v24 }
  0x45   : > { %1707 = vmatmul.mubr.msk.bf16.gmra.mrb[12].mxu0 %vm240_vm1, %v802_v48  ;;  %1614 = vmatprep.mubr.msk.bf16.mxu1 %vm1962_vm0, %v1961_v1  ;;  %v1166_v48 = vpack.c.bf16 %v1158_v46, %v1157_v45 }
  0x46   : > { %1710 = vmatprep.mubr.msk.bf16.mxu0 %vm1962_vm0, %v1961_v1 }
  0x4c   : > { %1615 = vmatmul.mubr.msk.bf16.gmra.mrb[8].mxu1 %vm240_vm1, %v211_v53  ;;  %v680_v53 = vpack.c.bf16 %v674_v50, %v673_v49 }
  0x4d   : > { %1711 = vmatmul.mubr.msk.bf16.gmra.mrb[16].mxu0 %vm240_vm1, %v803_v54  ;;  %1618 = vmatprep.mubr.msk.bf16.mxu1 %vm1962_vm0, %v1961_v1  ;;  %v1167_v54 = vpack.c.bf16 %v1160_v52, %v1159_v51 }
  0x4e   : > { %1716 = vmatprep.mubr.msk.bf16.mxu0 %vm1962_vm0, %v1961_v1 }
  0x54   : > { %1619 = vmatmul.mubr.msk.bf16.gmra.mrb[12].mxu1 %vm240_vm1, %v212_v57  ;;  %v1161_v57 = vld [vmem:[%s2019_s24 + $0x46] sm:$0xff] }
  0x55   : > { %1717 = vmatmul.mubr.msk.bf16.vlgmr.msra.gmra.mrb[0].mxu0 %vm240_vm1, %v921_v58  ;;  %1622 = vmatprep.mubr.msk.bf16.mxu1 %vm1962_vm0, %v1961_v1  ;;  %v1162_v58 = vld [vmem:[%s2019_s24 + $0x4e] sm:$0xff] }
  0x56   : > { %1737 = vmatpush3.bf16.msra.mxu0 %v1950_v59  ;;  %1720 = vmatprep.mubr.msk.bf16.mxu0 %vm1962_vm0, %v1961_v1  ;;  %v681_v59 = vpack.c.bf16 %v676_v56, %v675_v55  ;;  %v1168_v60 = vpack.c.bf16 %v1162_v58, %v1161_v57 }
  0x57   : > { %1758 = vmatprep.subr.bf16.mxu0 %v1961_v1 }
  0x5c   : > { %1623 = vmatmul.mubr.msk.bf16.gmra.mrb[16].mxu1 %vm240_vm1, %v213_v62  ;;  %v1164_v62 = vld [vmem:[%s2019_s24 + $0x5e] sm:$0xff] }
  0x5d   : > { %1721 = vmatmul.mubr.msk.bf16.gmra.mrb[4].mxu0 %vm240_vm1, %v922_v63  ;;  %1628 = vmatprep.mubr.msk.bf16.mxu1 %vm1962_vm0, %v1961_v1  ;;  %v1169_v63 = vpack.c.bf16 %v1164_v62, %v1163_v61 }
  0x5e   : > { %1724 = vmatprep.mubr.msk.bf16.mxu0 %vm1962_vm0, %v1961_v1 }
  0x64   : > { %1629 = vmatmul.mubr.msk.bf16.vlgmr.msra.gmra.mrb[0].mxu1 %vm240_vm1, %v433_v4 }
  0x65   : > { %1725 = vmatmul.mubr.msk.bf16.gmra.mrb[8].mxu0 %vm240_vm1, %v923_v5  ;;  %1632 = vmatprep.mubr.msk.bf16.mxu1 %vm1962_vm0, %v1961_v1 }
  0x66   : > { %1728 = vmatprep.mubr.msk.bf16.mxu0 %vm1962_vm0, %v1961_v1  ;;  %1649 = vmatpush3.bf16.msra.mxu1 %v1951_v6 }
  0x67   : > { %1780 = vmatprep.subr.bf16.mxu1 %v1961_v1 }
  0x6c   : > { %1633 = vmatmul.mubr.msk.bf16.gmra.mrb[4].mxu1 %vm240_vm1, %v434_v9 }
  0x6d   : > { %1729 = vmatmul.mubr.msk.bf16.gmra.mrb[12].mxu0 %vm240_vm1, %v924_v10  ;;  %1636 = vmatprep.mubr.msk.bf16.mxu1 %vm1962_vm0, %v1961_v1 }
  0x6e   : > { %1732 = vmatprep.mubr.msk.bf16.mxu0 %vm1962_vm0, %v1961_v1 }
  0x74   : > { %1637 = vmatmul.mubr.msk.bf16.gmra.mrb[8].mxu1 %vm240_vm1, %v435_v14 }
  0x75   : > { %1733 = vmatmul.mubr.msk.bf16.gmra.mrb[16].mxu0 %vm240_vm1, %v925_v15  ;;  %1640 = vmatprep.mubr.msk.bf16.mxu1 %vm1962_vm0, %v1961_v1 }
  0x76   : > { %1738 = vmatprep.mubr.msk.bf16.mxu0 %vm1962_vm0, %v1961_v1 }
  0x7c   : > { %1641 = vmatmul.mubr.msk.bf16.gmra.mrb[12].mxu1 %vm240_vm1, %v436_v20 }
  0x7d   : > { %1739 = vmatmul.mubr.msk.bf16.vlgmr.msra.gmra.mrb[0].mxu0 %vm240_vm1, %v1043_v21  ;;  %1644 = vmatprep.mubr.msk.bf16.mxu1 %vm1962_vm0, %v1961_v1 }
  0x7e   : > { %1759 = vmatpush3.bf16.msra.mxu0 %v1952_v22  ;;  %1742 = vmatprep.mubr.msk.bf16.mxu0 %vm1962_vm0, %v1961_v1 }
  0x84   : > { %1645 = vmatmul.mubr.msk.bf16.gmra.mrb[16].mxu1 %vm240_vm1, %v437_v27 }
  0x85   : > { %1743 = vmatmul.mubr.msk.bf16.gmra.mrb[4].mxu0 %vm240_vm1, %v1044_v28  ;;  %1650 = vmatprep.mubr.msk.bf16.mxu1 %vm1962_vm0, %v1961_v1 }
  0x86   : > { %1746 = vmatprep.mubr.msk.bf16.mxu0 %vm1962_vm0, %v1961_v1 }
  0x8c   : > { %1651 = vmatmul.mubr.msk.bf16.vlgmr.msra.gmra.mrb[0].mxu1 %vm240_vm1, %v555_v31 }
  0x8d   : > { %1747 = vmatmul.mubr.msk.bf16.gmra.mrb[8].mxu0 %vm240_vm1, %v1045_v32  ;;  %1654 = vmatprep.mubr.msk.bf16.mxu1 %vm1962_vm0, %v1961_v1 }
  0x8e   : > { %1750 = vmatprep.mubr.msk.bf16.mxu0 %vm1962_vm0, %v1961_v1  ;;  %1781 = vmatpush3.bf16.msra.mxu1 %v1999_v0  ;;  %v557_v0 = vpack.c.bf16 %v429_v16, %v428_v12 }
  0x94   : > { %1655 = vmatmul.mubr.msk.bf16.gmra.mrb[4].mxu1 %vm240_vm1, %v556_v35 }
  0x95   : > { %1751 = vmatmul.mubr.msk.bf16.gmra.mrb[12].mxu0 %vm240_vm1, %v1046_v36  ;;  %1658 = vmatprep.mubr.msk.bf16.mxu1 %vm1962_vm0, %v1961_v1 }
  0x96   : > { %1754 = vmatprep.mubr.msk.bf16.mxu0 %vm1962_vm0, %v1961_v1 }
  0x9c   : > { %1659 = vmatmul.mubr.msk.bf16.gmra.mrb[8].mxu1 %vm240_vm1, %v557_v0 }
  0x9d   : > { %1755 = vmatmul.mubr.msk.bf16.gmra.mrb[16].mxu0 %vm240_vm1, %v1047_v39  ;;  %1662 = vmatprep.mubr.msk.bf16.mxu1 %vm1962_vm0, %v1961_v1 }
  0x9e   : > { %1760 = vmatprep.mubr.msk.bf16.mxu0 %vm1962_vm0, %v1961_v1 }
  0xa4   : > { %1663 = vmatmul.mubr.msk.bf16.gmra.mrb[12].mxu1 %vm240_vm1, %v558_v42 }
  0xa5   : > { %1761 = vmatmul.mubr.msk.bf16.vlgmr.msra.gmra.mrb[0].mxu0 %vm240_vm1, %v1165_v43  ;;  %1666 = vmatprep.mubr.msk.bf16.mxu1 %vm1962_vm0, %v1961_v1 }
  0xa6   : > { %1764 = vmatprep.mubr.msk.bf16.mxu0 %vm1962_vm0, %v1961_v1 }
  0xac   : > { %1667 = vmatmul.mubr.msk.bf16.gmra.mrb[16].mxu1 %vm240_vm1, %v559_v47 }
  0xad   : > { %1765 = vmatmul.mubr.msk.bf16.gmra.mrb[4].mxu0 %vm240_vm1, %v1166_v48  ;;  %1684 = vmatprep.mubr.msk.bf16.mxu1 %vm1962_vm0, %v1961_v1 }
  0xae   : > { %1768 = vmatprep.mubr.msk.bf16.mxu0 %vm1962_vm0, %v1961_v1 }
  0xb4   : > { %1685 = vmatmul.mubr.msk.bf16.vlgmr.msra.gmra.mrb[12].mxu1 %vm240_vm1, %v680_v53 }
  0xb5   : > { %1769 = vmatmul.mubr.msk.bf16.gmra.mrb[8].mxu0 %vm240_vm1, %v1167_v54  ;;  %1688 = vmatprep.mubr.msk.bf16.mxu1 %vm1962_vm0, %v1961_v1 }
  0xb6   : > { %1772 = vmatprep.mubr.msk.bf16.mxu0 %vm1962_vm0, %v1961_v1 }
  0xbc   : > { %1689 = vmatmul.mubr.msk.bf16.gmra.mrb[16].mxu1 %vm240_vm1, %v681_v59 }
  0xbd   : > { %1773 = vmatmul.mubr.msk.bf16.gmra.mrb[12].mxu0 %vm240_vm1, %v1168_v60 }
  0xbe   : > { %1776 = vmatprep.mubr.msk.bf16.mxu0 %vm1962_vm0, %v1961_v1  ;;  %v2255_v1 = vld [vmem:[%s2313_s2] ss:$0 sm:$0xff] }
  0xc5   : > { %1777 = vmatmul.mubr.msk.bf16.gmra.mrb[16].mxu0 %vm240_vm1, %v1169_v63 }
 0x15f   : > { %v618_v2 = vpop.f32.mrb[0].mxu1 }
 0x160   : > { %v1652_v3 = vpop.f32.mrb[1].mxu1 }
 0x161   : > { %v621_v4 = vpop.f32.mrb[2].mxu1 }
 0x162   : > { %v1653_v5 = vpop.f32.mrb[3].mxu1 }
 0x167   : > { %v626_v6 = vpop.f32.mrb[4].mxu1 }
 0x168   : > { %v1656_v7 = vpop.f32.mrb[5].mxu1 }
 0x169   : > { %v629_v8 = vpop.f32.mrb[6].mxu1 }
 0x16a   : > { %v1657_v9 = vpop.f32.mrb[7].mxu1 }
 0x16f   : > { %v634_v10 = vpop.f32.mrb[8].mxu1 }
 0x170   : > { %v1660_v11 = vpop.f32.mrb[9].mxu1 }
 0x171   : > { %v637_v12 = vpop.f32.mrb[10].mxu1 }
 0x172   : > { %v1661_v13 = vpop.f32.mrb[11].mxu1 }
 0x178   : > { %v1228_v14 = vpop.f32.mrb[0].mxu0 }
 0x179   : > { %v1782_v15 = vadd.f32 %v1228_v14, %v618_v2  ;;  %v1762_v16 = vpop.f32.mrb[1].mxu0 }
 0x17a   : > { %v1231_v18 = vpop.f32.mrb[2].mxu0 }
 0x17b   : > { %v1284_v19 = vmul.f32 %v1782_v15, %v2255_v1  ;;  %v1783_v20 = vadd.f32 %v1231_v18, %v621_v4  ;;  %v1763_v21 = vpop.f32.mrb[3].mxu0 }
 0x17d   : > { %v1301_v22 = vadd.f32 %v2260_v17, %v1284_v19  ;;  %v1285_v23 = vmul.f32 %v1783_v20, %v2255_v1 }
 0x17f   : > { %v1311_v24 = vmax.f32 %v1301_v22, 0.0  ;;  %v1302_v25 = vadd.f32 %v2260_v17, %v1285_v23 }
 0x180   : > { %v1236_v26 = vpop.f32.mrb[4].mxu0 }
 0x181   : > { %v1518_v27 = vpack.c.bf16 %v1311_v24, %v1311_v24  ;;  %v1312_v28 = vmax.f32 %v1302_v25, 0.0  ;;  %v1784_v29 = vadd.f32 %v1236_v26, %v626_v6  ;;  %v1766_v30 = vpop.f32.mrb[5].mxu0 }
 0x182   : > { %v1239_v31 = vpop.f32.mrb[6].mxu0 }
 0x183   : > { %1362 = vst.msk [vmem:[%s2270_s22] sm:$0xf] %vm1361_vm2, %v1518_v27  ;;  %v1519_v32 = vpack.c.bf16 %v1312_v28, %v1312_v28  ;;  %v1286_v33 = vmul.f32 %v1784_v29, %v2255_v1  ;;  %v1785_v34 = vadd.f32 %v1239_v31, %v629_v8  ;;  %v1767_v35 = vpop.f32.mrb[7].mxu0 }
 0x185   : > { %1363 = vst.msk [vmem:[%s2270_s22 + $0x4] sm:$0xf] %vm1361_vm2, %v1519_v32  ;;  %v1303_v36 = vadd.f32 %v2260_v17, %v1286_v33  ;;  %v1287_v37 = vmul.f32 %v1785_v34, %v2255_v1 }
 0x187   : > { %v1313_v38 = vmax.f32 %v1303_v36, 0.0  ;;  %v1304_v0 = vadd.f32 %v2260_v17, %v1287_v37  ;;  %v764_v39 = vpop.f32.mrb[12].mxu1 }
 0x188   : > { %v1244_v40 = vpop.f32.mrb[8].mxu0  ;;  %v1686_v41 = vpop.f32.mrb[13].mxu1 }
 0x189   : > { %v1520_v42 = vpack.c.bf16 %v1313_v38, %v1313_v38  ;;  %v1314_v43 = vmax.f32 %v1304_v0, 0.0  ;;  %v1786_v44 = vadd.f32 %v1244_v40, %v634_v10  ;;  %v1770_v45 = vpop.f32.mrb[9].mxu0  ;;  %v767_v46 = vpop.f32.mrb[14].mxu1 }
 0x18a   : > { %v1247_v47 = vpop.f32.mrb[10].mxu0  ;;  %v1687_v48 = vpop.f32.mrb[15].mxu1 }
 0x18b   : > { %1364 = vst.msk [vmem:[%s2270_s22 + $0x8] sm:$0xf] %vm1361_vm2, %v1520_v42  ;;  %v1521_v49 = vpack.c.bf16 %v1314_v43, %v1314_v43  ;;  %v1288_v50 = vmul.f32 %v1786_v44, %v2255_v1  ;;  %v1787_v51 = vadd.f32 %v1247_v47, %v637_v12  ;;  %v1771_v52 = vpop.f32.mrb[11].mxu0 }
 0x18d   : > { %1365 = vst.msk [vmem:[%s2270_s22 + $0xc] sm:$0xf] %vm1361_vm2, %v1521_v49  ;;  %v1305_v53 = vadd.f32 %v2260_v17, %v1288_v50  ;;  %v1289_v54 = vmul.f32 %v1787_v51, %v2255_v1 }
 0x18f   : > { %v1315_v55 = vmax.f32 %v1305_v53, 0.0  ;;  %v1306_v56 = vadd.f32 %v2260_v17, %v1289_v54  ;;  %v772_v57 = vpop.f32.mrb[16].mxu1 }
 0x190   : > { %v1252_v58 = vpop.f32.mrb[12].mxu0  ;;  %v1690_v59 = vpop.f32.mrb[17].mxu1 }
 0x191   : > { %v1522_v60 = vpack.c.bf16 %v1315_v55, %v1315_v55  ;;  %v1316_v61 = vmax.f32 %v1306_v56, 0.0  ;;  %v1788_v62 = vadd.f32 %v1252_v58, %v764_v39  ;;  %v1774_v63 = vpop.f32.mrb[13].mxu0  ;;  %v775_v2 = vpop.f32.mrb[18].mxu1 }
 0x192   : > { %v1255_v3 = vpop.f32.mrb[14].mxu0  ;;  %v1691_v4 = vpop.f32.mrb[19].mxu1 }
 0x193   : > { %1366 = vst.msk [vmem:[%s2270_s22 + $0x10] sm:$0xf] %vm1361_vm2, %v1522_v60  ;;  %v1523_v5 = vpack.c.bf16 %v1316_v61, %v1316_v61  ;;  %v1290_v6 = vmul.f32 %v1788_v62, %v2255_v1  ;;  %v1789_v7 = vadd.f32 %v1255_v3, %v767_v46  ;;  %v1775_v8 = vpop.f32.mrb[15].mxu0 }
 0x195   : > { %1367 = vst.msk [vmem:[%s2270_s22 + $0x14] sm:$0xf] %vm1361_vm2, %v1523_v5  ;;  %v1307_v9 = vadd.f32 %v2260_v17, %v1290_v6  ;;  %v1291_v10 = vmul.f32 %v1789_v7, %v2255_v1 }
 0x197   : > { %v1317_v11 = vmax.f32 %v1307_v9, 0.0  ;;  %v1308_v12 = vadd.f32 %v2260_v17, %v1291_v10 }
 0x198   : > { %v1260_v13 = vpop.f32.mrb[16].mxu0 }
 0x199   : > { %v1524_v14 = vpack.c.bf16 %v1317_v11, %v1317_v11  ;;  %v1318_v15 = vmax.f32 %v1308_v12, 0.0  ;;  %v1790_v16 = vadd.f32 %v1260_v13, %v772_v57  ;;  %v1778_v18 = vpop.f32.mrb[17].mxu0 }
 0x19a   : > { %v1263_v19 = vpop.f32.mrb[18].mxu0 }
 0x19b   : > { %1368 = vst.msk [vmem:[%s2270_s22 + $0x18] sm:$0xf] %vm1361_vm2, %v1524_v14  ;;  %v1525_v20 = vpack.c.bf16 %v1318_v15, %v1318_v15  ;;  %v1292_v21 = vmul.f32 %v1790_v16, %v2255_v1  ;;  %v1791_v22 = vadd.f32 %v1263_v19, %v775_v2  ;;  %v1779_v23 = vpop.f32.mrb[19].mxu0 }
 0x19d   : > { %1369 = vst.msk [vmem:[%s2270_s22 + $0x1c] sm:$0xf] %vm1361_vm2, %v1525_v20  ;;  %v1309_v24 = vadd.f32 %v2260_v17, %v1292_v21  ;;  %v1293_v25 = vmul.f32 %v1791_v22, %v2255_v1 }
 0x19f   : > { %v1319_v26 = vmax.f32 %v1309_v24, 0.0  ;;  %v1310_v27 = vadd.f32 %v2260_v17, %v1293_v25 }
 0x1a1   : > { %v1526_v28 = vpack.c.bf16 %v1319_v26, %v1319_v26  ;;  %v1320_v29 = vmax.f32 %v1310_v27, 0.0 }
 0x1a3   : > { %1370 = vst.msk [vmem:[%s2270_s22 + $0x20] sm:$0xf] %vm1361_vm2, %v1526_v28  ;;  %v1527_v30 = vpack.c.bf16 %v1320_v29, %v1320_v29 }
 0x1a5   : > { %1371 = vst.msk [vmem:[%s2270_s22 + $0x24] sm:$0xf] %vm1361_vm2, %v1527_v30 }
 0x1a6 PF: > { %s14_s15 = sadd.s32 1, %s1959_s15  }
 0x1a7   : > { %p11_p4 = scmp.ge.s32.totalorder %s14_s15, 4  }
 0x1a9   :  { %13 = sbr.rel (!%p11_p4) target bundleno = 1 (0x1), region = 74 }

// kernel: policy_forward.6
= control target key start
LH: loop header
LB: loop body
LE: loop exit
PB: predicated region body
PF: predicated region fallthrough
CT: control target
= control target key end

     0   :  { %s1284_s15 = smov 0   ;;  %s1408_s0 = inlined_call_operand.vmem [shape: f32[2,42,32], index: 0, kind: input, shape index: {}]   ;;  %s1409_s1 = inlined_call_operand.vmem [shape: bf16[9,32,48], index: 1, kind: input, shape index: {}]   ;;  %s1410_s2 = inlined_call_operand.vmem [shape: f32[1,48], index: 2, kind: input, shape index: {}]   ;;  %s1411_s3 = inlined_call_operand.vmem [shape: f32[1,48], index: 3, kind: input, shape index: {}]   ;;  %s1412_s4 = inlined_call_operand.vmem [shape: bf16[2,24,48], index: 4, kind: output, shape index: {}]  }
   0x1 LB: > { %s999_s16 = sadd.s32 4294967295, %s1257_s15   ;;  %p1003_p0 = scmp.ge.s32.totalorder %s1257_s15, 1  ;;  %s1257_s15 = sphi %s1284_s15, %s14_s15  }
   0x2   : > { %p162_p1 = scmp.lt.s32.totalorder %s1257_s15, 3 }
   0x4   : > { %p163_p2 = pnand %p1003_p0, %p162_p1 }
   0x5   : > { %v1233_v0 = vld [vmem:[%s1409_s1 + $0x10] sm:$0xff] (!%p163_p2)   ;;  %p188_p3 = scmp.lt.s32.totalorder (!%p163_p2), %s999_s16, 1  ;;  %v1234_v1 = vld [vmem:[%s1409_s1 + $0x40] sm:$0xff] (!%p163_p2)   ;;  %v1235_v2 = vld [vmem:[%s1409_s1 + $0x18] sm:$0xff] (!%p163_p2)   ;;  %vm230_vm0 = vcmask (!%p163_p2), 261120   ;;  %vm940_vm1 = vcmask (!%p163_p2), 388096  }
   0x6   : > { %166 = sbr.rel (%p163_p2) target bundleno = 296 (0x128), region = 36  ;;  %1120 = vmatprep.subr.bf16.mxu1 (!%p163_p2), %v1233_v0  ;;  %1152 = vmatprep.subr.bf16.mxu0 (!%p163_p2), %v1234_v1  ;;  %v1236_v3 = vld [vmem:[%s1409_s1 + $0x48] sm:$0xff] (!%p163_p2)   ;;  %v1237_v4 = vld [vmem:[%s1409_s1 + $0x50] sm:$0xff] (!%p163_p2)   ;;  %v1238_v5 = vld [vmem:[%s1409_s1] sm:$0xff] (!%p163_p2)  }
   0x7   : > { %1121 = vmatpush3.bf16.msra.mxu1 (!%p163_p2), %v1233_v0  ;;  %1153 = vmatpush3.bf16.msra.mxu0 (!%p163_p2), %v1234_v1  ;;  %v1239_v13 = vld [vmem:[%s1409_s1 + $0x58] sm:$0xff] (!%p163_p2)   ;;  %v1240_v17 = vld [vmem:[%s1409_s1 + $0x8] sm:$0xff] (!%p163_p2)   ;;  %v1242_v23 = vld [vmem:[%s1409_s1 + $0x20] sm:$0xff] (!%p163_p2)  }
   0x8   : > { %1122 = vmatprep.subr.bf16.mxu1 (!%p163_p2), %v1235_v2  ;;  %1154 = vmatprep.subr.bf16.mxu0 (!%p163_p2), %v1236_v3  ;;  %v1241_v24 = vld [vmem:[%s1409_s1 + $0x60] sm:$0xff] (!%p163_p2)   ;;  %v1244_v32 = vld [vmem:[%s1409_s1 + $0x28] sm:$0xff] (!%p163_p2)   ;;  %v1246_v36 = vld [vmem:[%s1409_s1 + $0x30] sm:$0xff] (!%p163_p2)  }
   0x9   : > { %v1243_v33 = vld [vmem:[%s1409_s1 + $0x68] sm:$0xff] (!%p163_p2)   ;;  %v1245_v37 = vld [vmem:[%s1409_s1 + $0x70] sm:$0xff] (!%p163_p2)   ;;  %v1248_v46 = vld [vmem:[%s1409_s1 + $0x38] sm:$0xff] (!%p163_p2)  }
   0xa   : > { %v1247_v47 = vld [vmem:[%s1409_s1 + $0x78] sm:$0xff] (!%p163_p2)   ;;  %v1249_v50 = vld [vmem:[%s1409_s1 + $0x80] sm:$0xff] (!%p163_p2)   ;;  %v1250_v56 = vld [vmem:[%s1409_s1 + $0x88] sm:$0xff] (!%p163_p2)  }
   0xb   : > { %1123 = vmatpush3.bf16.msra.mxu1 (!%p163_p2), %v1235_v2  ;;  %1155 = vmatpush3.bf16.msra.mxu0 (!%p163_p2), %v1236_v3  ;;  %v1074_v0 = vld [vmem:[%s1410_s2] ss:$0 sm:$0xff] (!%p163_p2) }
   0xc   : > { %1128 = vmatprep.subr.bf16.mxu1 (!%p163_p2), %v1238_v5  ;;  %1160 = vmatprep.subr.bf16.mxu0 (!%p163_p2), %v1237_v4  ;;  %v1075_v3 = vld [vmem:[%s1411_s3] ss:$0 sm:$0xff] (!%p163_p2) }
   0xd   : > { %s1414_s16 = smov (!%p188_p3, %s999_s16), 1 }
   0xe   : > { %s1223_s25 = smul.u32 48, %s1414_s16 }
  0x10   : > { %s1316_s6 = scalar_lea.vmem %s1408_s0, %s1223_s25 }
  0x11   : > { %v208_v6 = vld [vmem:[%s1316_s6 + $0x1] sm:$0xff]  ;;  %v209_v7 = vld [vmem:[%s1316_s6 + $0x9] sm:$0xff]  ;;  %v210_v11 = vld [vmem:[%s1316_s6 + $0x11] sm:$0xff] }
  0x12   : > { %v509_v8 = vld [vmem:[%s1316_s6 + $0x7] sm:$0xff]  ;;  %v211_v9 = vpack.c.bf16 %v209_v7, %v208_v6  ;;  %v510_v10 = vld [vmem:[%s1316_s6 + $0xf] sm:$0xff]  ;;  %v511_v12 = vld [vmem:[%s1316_s6 + $0x17] sm:$0xff]  ;;  %v212_v15 = vpack.c.bf16 %v210_v11, %v210_v11 }
  0x13   : > { %v512_v14 = vpack.c.bf16 %v510_v10, %v509_v8  ;;  %v513_v16 = vpack.c.bf16 %v511_v12, %v511_v12  ;;  %v199_v18 = vld [vmem:[%s1316_s6] sm:$0xff]  ;;  %v200_v19 = vld [vmem:[%s1316_s6 + $0x8] sm:$0xff]  ;;  %v589_v20 = vld [vmem:[%s1316_s6 + $0x10] sm:$0xff] }
  0x14   : > { %1124 = vmatprep.mubr.msk.bf16.mxu1 %vm230_vm0, %v211_v9  ;;  %v202_v21 = vpack.c.bf16 %v200_v19, %v199_v18  ;;  %v591_v22 = vpack.c.bf16 %v589_v20, %v200_v19  ;;  %v590_v25 = vld [vmem:[%s1316_s6 + $0x18] sm:$0xff]  ;;  %v351_v26 = vld [vmem:[%s1316_s6 + $0x2] sm:$0xff]  ;;  %v352_v27 = vld [vmem:[%s1316_s6 + $0xa] sm:$0xff]  ;;  %v203_v28 = vpack.c.bf16 %v589_v20, %v589_v20 }
  0x15   : > { %1156 = vmatprep.mubr.msk.bf16.mxu0 %vm230_vm0, %v512_v14  ;;  %1125 = vmatmul.mubr.msk.bf16.vlgmr.msra.gmra.mrb[0].mxu1 %vm230_vm0, %v212_v15  ;;  %v667_v29 = vld [vmem:[%s1316_s6 + $0xc] sm:$0xff]  ;;  %v592_v30 = vpack.c.bf16 %v590_v25, %v590_v25  ;;  %v668_v31 = vld [vmem:[%s1316_s6 + $0x14] sm:$0xff]  ;;  %v354_v34 = vpack.c.bf16 %v352_v27, %v351_v26  ;;  %v669_v39 = vld [vmem:[%s1316_s6 + $0x1c] sm:$0xff] }
  0x16   : > { %1157 = vmatmul.mubr.msk.bf16.vlgmr.msra.gmra.mrb[0].mxu0 %vm230_vm0, %v513_v16  ;;  %1129 = vmatpush3.bf16.msra.mxu1 %v1238_v5  ;;  %v670_v35 = vpack.c.bf16 %v668_v31, %v667_v29  ;;  %v353_v38 = vld [vmem:[%s1316_s6 + $0x12] sm:$0xff]  ;;  %v430_v41 = vld [vmem:[%s1316_s6 + $0x6] sm:$0xff]  ;;  %v671_v43 = vpack.c.bf16 %v669_v39, %v669_v39  ;;  %v748_v52 = vld [vmem:[%s1316_s6 + $0x1d] sm:$0xff] }
  0x17   : > { %1161 = vmatpush3.bf16.msra.mxu0 %v1237_v4  ;;  %1130 = vmatprep.subr.bf16.mxu1 %v1240_v17  ;;  %v355_v40 = vpack.c.bf16 %v353_v38, %v353_v38  ;;  %v431_v42 = vld [vmem:[%s1316_s6 + $0xe] sm:$0xff]  ;;  %v432_v51 = vld [vmem:[%s1316_s6 + $0x16] sm:$0xff]  ;;  %v750_v54 = vpack.c.bf16 %v748_v52, %v748_v52  ;;  %v827_v57 = vld [vmem:[%s1316_s6 + $0x1e] sm:$0xff] }
  0x18   : > { %1162 = vmatprep.subr.bf16.mxu0 %v1239_v13  ;;  %1132 = vmatprep.mubr.msk.bf16.mxu1 %vm230_vm0, %v202_v21  ;;  %v746_v44 = vld [vmem:[%s1316_s6 + $0xd] sm:$0xff]  ;;  %v747_v45 = vld [vmem:[%s1316_s6 + $0x15] sm:$0xff]  ;;  %v433_v48 = vpack.c.bf16 %v431_v42, %v430_v41  ;;  %v434_v53 = vpack.c.bf16 %v432_v51, %v432_v51  ;;  %v828_v55 = vpack.c.bf16 %v432_v51, %v431_v42  ;;  %s1224_s6 = smul.u32 12, %s1414_s16 }
  0x19   : > { %1164 = vmatprep.mubr.msk.bf16.mxu0 %vm230_vm0, %v591_v22  ;;  %v749_v49 = vpack.c.bf16 %v747_v45, %v746_v44  ;;  %v829_v58 = vpack.c.bf16 %v827_v57, %v827_v57 }
  0x1a   : > { %1131 = vmatpush3.bf16.msra.mxu1 %v1240_v17  ;;  %s197_s14 = scalar_lea.vmem %s1412_s4, %s1224_s6 }
  0x1b   : > { %1163 = vmatpush3.bf16.msra.mxu0 %v1239_v13  ;;  %1136 = vmatprep.subr.bf16.mxu1 %v1242_v23 }
  0x1c   : > { %1168 = vmatprep.subr.bf16.mxu0 %v1241_v24 }
  0x21   : > { %1133 = vmatmul.mubr.msk.bf16.vlgmr.msra.gmra.mrb[0].mxu1 %vm230_vm0, %v203_v28 }
  0x22   : > { %1165 = vmatmul.mubr.msk.bf16.vlgmr.msra.gmra.mrb[0].mxu0 %vm230_vm0, %v592_v30  ;;  %1137 = vmatpush3.bf16.msra.mxu1 %v1242_v23 }
  0x23   : > { %1169 = vmatpush3.bf16.msra.mxu0 %v1241_v24  ;;  %1138 = vmatprep.subr.bf16.mxu1 %v1244_v32 }
  0x24   : > { %1170 = vmatprep.subr.bf16.mxu0 %v1243_v33  ;;  %1140 = vmatprep.mubr.msk.bf16.mxu1 %vm230_vm0, %v354_v34 }
  0x25   : > { %1172 = vmatprep.mubr.msk.bf16.mxu0 %vm230_vm0, %v670_v35 }
  0x26   : > { %1139 = vmatpush3.bf16.msra.mxu1 %v1244_v32 }
  0x27   : > { %1171 = vmatpush3.bf16.msra.mxu0 %v1243_v33  ;;  %1144 = vmatprep.subr.bf16.mxu1 %v1246_v36 }
  0x28   : > { %1176 = vmatprep.subr.bf16.mxu0 %v1245_v37 }
  0x2d   : > { %1141 = vmatmul.mubr.msk.bf16.vlgmr.msra.gmra.mrb[0].mxu1 %vm230_vm0, %v355_v40 }
  0x2e   : > { %1173 = vmatmul.mubr.msk.bf16.vlgmr.msra.gmra.mrb[0].mxu0 %vm230_vm0, %v671_v43  ;;  %1145 = vmatpush3.bf16.msra.mxu1 %v1246_v36 }
  0x2f   : > { %1177 = vmatpush3.bf16.msra.mxu0 %v1245_v37  ;;  %1146 = vmatprep.subr.bf16.mxu1 %v1248_v46 }
  0x30   : > { %1178 = vmatprep.subr.bf16.mxu0 %v1247_v47  ;;  %1148 = vmatprep.mubr.msk.bf16.mxu1 %vm230_vm0, %v433_v48 }
  0x31   : > { %1180 = vmatprep.mubr.msk.bf16.mxu0 %vm230_vm0, %v749_v49 }
  0x32   : > { %1147 = vmatpush3.bf16.msra.mxu1 %v1248_v46 }
  0x33   : > { %1179 = vmatpush3.bf16.msra.mxu0 %v1247_v47 }
  0x34   : > { %1184 = vmatprep.subr.bf16.mxu0 %v1249_v50 }
  0x39   : > { %1149 = vmatmul.mubr.msk.bf16.vlgmr.msra.gmra.mrb[0].mxu1 %vm230_vm0, %v434_v53 }
  0x3a   : > { %1181 = vmatmul.mubr.msk.bf16.vlgmr.msra.gmra.mrb[0].mxu0 %vm230_vm0, %v750_v54 }
  0x3b   : > { %1185 = vmatpush3.bf16.msra.mxu0 %v1249_v50  ;;  %1188 = vmatprep.mubr.msk.bf16.mxu0 %vm230_vm0, %v828_v55 }
  0x3c   : > { %1186 = vmatprep.subr.bf16.mxu0 %v1250_v56 }
  0x3f   : > { %1187 = vmatpush3.bf16.msra.mxu0 %v1250_v56 }
  0x46   : > { %1189 = vmatmul.mubr.msk.bf16.vlgmr.msra.gmra.mrb[0].mxu0 %vm230_vm0, %v829_v58 }
 0x10c   : > { %v1150_v59 = vpop.f32.mrb[0].mxu1 }
 0x10d   : > { %v492_v60 = vpop.f32.mrb[1].mxu1 }
 0x10e   : > { %v1151_v61 = vpop.f32.mrb[2].mxu1 }
 0x10f   : > { %v495_v62 = vpop.f32.mrb[3].mxu1 }
 0x119   : > { %v1190_v63 = vpop.f32.mrb[0].mxu0 }
 0x11a   : > { %v1192_v1 = vadd.f32 %v1190_v63, %v1150_v59  ;;  %v887_v2 = vpop.f32.mrb[1].mxu0 }
 0x11b   : > { %v1193_v4 = vadd.f32 %v887_v2, %v492_v60  ;;  %v1191_v5 = vpop.f32.mrb[2].mxu0 }
 0x11c   : > { %v913_v6 = vmul.f32 %v1192_v1, %v1074_v0  ;;  %v890_v7 = vpop.f32.mrb[3].mxu0 }
 0x11d   : > { %v911_v8 = vmul.f32 %v1193_v4, %v1074_v0  ;;  %v1194_v9 = vadd.f32 %v890_v7, %v495_v62 }
 0x11e   : > { %v923_v10 = vadd.f32 %v1075_v3, %v913_v6 }
 0x11f   : > { %v921_v11 = vadd.f32 %v1075_v3, %v911_v8  ;;  %v912_v12 = vmul.f32 %v1194_v9, %v1074_v0 }
 0x120   : > { %v926_v13 = vmax.f32 %v923_v10, 0.0 }
 0x121   : > { %v924_v14 = vmax.f32 %v921_v11, 0.0  ;;  %v922_v15 = vadd.f32 %v1075_v3, %v912_v12 }
 0x122   : > { %v1083_v16 = vpack.c.bf16 %v926_v13, %v926_v13 }
 0x123   : > { %v1081_v17 = vpack.c.bf16 %v924_v14, %v924_v14  ;;  %v925_v18 = vmax.f32 %v922_v15, 0.0 }
 0x124   : > { %943 = vst.msk [vmem:[%s197_s14 + $0x8] sm:$0xf] %vm940_vm1, %v1083_v16 }
 0x125   : > { %941 = vst.msk [vmem:[%s197_s14] sm:$0xf] %vm940_vm1, %v1081_v17  ;;  %v1082_v19 = vpack.c.bf16 %v925_v18, %v925_v18 }
 0x127   : > { %942 = vst.msk [vmem:[%s197_s14 + $0x4] sm:$0xf] %vm940_vm1, %v1082_v19 }
 0x128 PF: > { %s14_s15 = sadd.s32 1, %s1257_s15  }
 0x129   : > { %p11_p4 = scmp.ge.s32.totalorder %s14_s15, 4  }
 0x12b   :  { %13 = sbr.rel (!%p11_p4) target bundleno = 1 (0x1), region = 74 }

// kernel: policy_forward.7
= control target key start
LH: loop header
LB: loop body
LE: loop exit
PB: predicated region body
PF: predicated region fallthrough
CT: control target
= control target key end

     0   :  { %v1490_v8 = vmov 1966171168   ;;  %v135_v10 = vlaneseq  ;;  %vm1493_vm0 = vmmov 0   ;;  %vm1132_vm2 = vcmask 25600   ;;  %s1948_s1 = inlined_call_operand.vmem [shape: bf16[768,256], index: 1, kind: input, shape index: {}]   ;;  %s1949_s0 = inlined_call_operand.vmem [shape: bf16[2,768], index: 0, kind: input, shape index: {}]   ;;  %s1950_s3 = inlined_call_operand.vmem [shape: bf16[256,128], index: 3, kind: input, shape index: {}]   ;;  %s1951_s5 = inlined_call_operand.vmem [shape: bf16[128,4], index: 5, kind: input, shape index: {}]   ;;  %s1952_s2 = inlined_call_operand.vmem [shape: f32[1,256], index: 2, kind: input, shape index: {}]   ;;  %s1953_s4 = inlined_call_operand.vmem [shape: f32[1,128], index: 4, kind: input, shape index: {}]   ;;  %s1954_s6 = inlined_call_operand.vmem [shape: f32[1,4], index: 6, kind: input, shape index: {}]   ;;  %s1955_s7 = inlined_call_operand.vmem [shape: f32[2,4], index: 7, kind: output, shape index: {}]  }
   0x1   :  { %v1321_v0 = vld [vmem:[%s1948_s1 + $0x104] ss:$8 sps:$4 sm:$0xff]   ;;  %v1323_v1 = vld [vmem:[%s1948_s1 + $0x100] ss:$8 sps:$4 sm:$0xff]   ;;  %v1324_v2 = vld [vmem:[%s1948_s1 + $0x114] ss:$8 sps:$4 sm:$0xff]   ;;  %v133_v9 = vunpack.c.l.s4 %v1490_v8 }
   0x2   :  { %705 = vmatprep.subr.bf16.mxu0 %v1321_v0  ;;  %v1326_v3 = vld [vmem:[%s1948_s1 + $0x110] ss:$8 sps:$4 sm:$0xff]   ;;  %v1327_v4 = vld [vmem:[%s1948_s1 + $0x124] ss:$8 sps:$4 sm:$0xff]   ;;  %v1329_v5 = vld [vmem:[%s1948_s1 + $0x120] ss:$8 sps:$4 sm:$0xff]  }
   0x3   :  { %706 = vmatpush1.bf16.msra.mxu0 %v1323_v1  ;;  %v1330_v6 = vld [vmem:[%s1948_s1 + $0x134] ss:$8 sps:$4 sm:$0xff]   ;;  %v1332_v7 = vld [vmem:[%s1948_s1 + $0x130] ss:$8 sps:$4 sm:$0xff]   ;;  %v1333_v11 = vld [vmem:[%s1948_s1 + $0x144] ss:$8 sps:$4 sm:$0xff]   ;;  %v134_v13 = vunpack.c.0.s8 %v133_v9 }
   0x4   :  { %707 = vmatprep.subr.bf16.mxu0 %v1324_v2  ;;  %v1335_v12 = vld [vmem:[%s1948_s1 + $0x140] ss:$8 sps:$4 sm:$0xff]   ;;  %v1565_v14 = vshrl.u32 %v135_v10, 7  ;;  %v1336_v15 = vld [vmem:[%s1948_s1 + $0x154] ss:$8 sps:$4 sm:$0xff]  }
   0x5   :  { %v1338_v16 = vld [vmem:[%s1948_s1 + $0x150] ss:$8 sps:$4 sm:$0xff]   ;;  %v1339_v18 = vld [vmem:[%s1948_s1 + $0x164] ss:$8 sps:$4 sm:$0xff]   ;;  %v1371_v20 = vld [vmem:[%s1948_s1] ss:$8 sps:$4 sm:$0xff]  }
   0x6   :  { %v1574_v17 = vsub.s32 %v134_v13, %v1565_v14  ;;  %v1368_v19 = vld [vmem:[%s1948_s1 + $0x4] ss:$8 sps:$4 sm:$0xff]   ;;  %v1341_v22 = vld [vmem:[%s1948_s1 + $0x160] ss:$8 sps:$4 sm:$0xff]   ;;  %v1342_v25 = vld [vmem:[%s1948_s1 + $0x174] ss:$8 sps:$4 sm:$0xff]  }
   0x7   :  { %708 = vmatpush1.bf16.msra.mxu0 %v1326_v3  ;;  %v33_v21 = vld [vmem:[%s1949_s0] sm:$0x3f]  ;;  %664 = vmatprep.subr.bf16.mxu1 %v1368_v19  ;;  %v1376_v27 = vld [vmem:[%s1948_s1 + $0x14] ss:$8 sps:$4 sm:$0xff]   ;;  %v1378_v28 = vld [vmem:[%s1948_s1 + $0x10] ss:$8 sps:$4 sm:$0xff]  }
   0x8   :  { %709 = vmatprep.subr.bf16.mxu0 %v1327_v4  ;;  %v131_v23 = vcombine.high %v33_v21, %v33_v21  ;;  %v1592_v24 = vrot.slane %v33_v21, %v1574_v17  ;;  %665 = vmatpush1.bf16.msra.mxu1 %v1371_v20  ;;  %v1344_v29 = vld [vmem:[%s1948_s1 + $0x170] ss:$8 sps:$4 sm:$0xff]   ;;  %v1345_v30 = vld [vmem:[%s1948_s1 + $0x184] ss:$8 sps:$4 sm:$0xff]   ;;  %v1384_v34 = vld [vmem:[%s1948_s1 + $0x20] ss:$8 sps:$4 sm:$0xff]  }
   0x9   :  { %666 = vmatprep.subr.bf16.mxu1 %v1376_v27  ;;  %v1382_v33 = vld [vmem:[%s1948_s1 + $0x24] ss:$8 sps:$4 sm:$0xff]   ;;  %v1347_v37 = vld [vmem:[%s1948_s1 + $0x180] ss:$8 sps:$4 sm:$0xff]   ;;  %v1388_v38 = vld [vmem:[%s1948_s1 + $0x34] ss:$8 sps:$4 sm:$0xff]  }
   0xa   :  { %v146_v26 = vcombine.high %v1592_v24, %v1592_v24  ;;  %v1612_v31 = vrot.slane %v131_v23, %v1574_v17  ;;  %v1348_v39 = vld [vmem:[%s1948_s1 + $0x194] ss:$8 sps:$4 sm:$0xff]   ;;  %v1390_v40 = vld [vmem:[%s1948_s1 + $0x30] ss:$8 sps:$4 sm:$0xff]   ;;  %v1394_v41 = vld [vmem:[%s1948_s1 + $0x44] ss:$8 sps:$4 sm:$0xff]   ;;  %v154_v3 = vrot.slane %v1592_v24, %v1574_v17 }
   0xb   :  { %710 = vmatpush1.bf16.msra.mxu0 %v1329_v5  ;;  %v1350_v42 = vld [vmem:[%s1948_s1 + $0x190] ss:$8 sps:$4 sm:$0xff]   ;;  %v1351_v43 = vld [vmem:[%s1948_s1 + $0x1a4] ss:$8 sps:$4 sm:$0xff]   ;;  %v1396_v44 = vld [vmem:[%s1948_s1 + $0x40] ss:$8 sps:$4 sm:$0xff]  }
   0xc   :  { %711 = vmatprep.subr.bf16.mxu0 %v1330_v6  ;;  %v168_v32 = vrot.slane %v146_v26, %v1574_v17  ;;  %667 = vmatpush1.bf16.msra.mxu1 %v1378_v28  ;;  %v161_v35 = vrot.slane %v1612_v31, %v1574_v17  ;;  %v1400_v45 = vld [vmem:[%s1948_s1 + $0x54] ss:$8 sps:$4 sm:$0xff]   ;;  %v1353_v46 = vld [vmem:[%s1948_s1 + $0x1a0] ss:$8 sps:$4 sm:$0xff]   ;;  %v1402_v48 = vld [vmem:[%s1948_s1 + $0x50] ss:$8 sps:$4 sm:$0xff]   ;;  %v147_v5 = vcombine.high %v1612_v31, %v1612_v31 }
   0xd   :  { %668 = vmatprep.subr.bf16.mxu1 %v1382_v33  ;;  %v1354_v47 = vld [vmem:[%s1948_s1 + $0x1b4] ss:$8 sps:$4 sm:$0xff]   ;;  %v1406_v49 = vld [vmem:[%s1948_s1 + $0x64] ss:$8 sps:$4 sm:$0xff]   ;;  %v1356_v50 = vld [vmem:[%s1948_s1 + $0x1b0] ss:$8 sps:$4 sm:$0xff]   ;;  %v176_v8 = vcombine.high %v154_v3, %v154_v3 }
   0xe   :  { %v177_v36 = vcombine.high %v168_v32, %v168_v32  ;;  %696 = vmatprep.mubr.bf16.mxu1 %v168_v32  ;;  %v1357_v51 = vld [vmem:[%s1948_s1 + $0x1c4] ss:$8 sps:$4 sm:$0xff]   ;;  %v1408_v52 = vld [vmem:[%s1948_s1 + $0x60] ss:$8 sps:$4 sm:$0xff]   ;;  %v1412_v53 = vld [vmem:[%s1948_s1 + $0x74] ss:$8 sps:$4 sm:$0xff]  }
   0xf   :  { %712 = vmatpush1.bf16.msra.mxu0 %v1332_v7  ;;  %v1359_v54 = vld [vmem:[%s1948_s1 + $0x1c0] ss:$8 sps:$4 sm:$0xff]   ;;  %v1360_v55 = vld [vmem:[%s1948_s1 + $0x1d4] ss:$8 sps:$4 sm:$0xff]   ;;  %v1414_v56 = vld [vmem:[%s1948_s1 + $0x70] ss:$8 sps:$4 sm:$0xff]  }
  0x10   :  { %713 = vmatprep.subr.bf16.mxu0 %v1333_v11  ;;  %737 = vmatprep.mubr.bf16.mxu0 %v177_v36  ;;  %v1418_v57 = vld [vmem:[%s1948_s1 + $0x84] ss:$8 sps:$4 sm:$0xff]   ;;  %v1362_v58 = vld [vmem:[%s1948_s1 + $0x1d0] ss:$8 sps:$4 sm:$0xff]   ;;  %v1420_v60 = vld [vmem:[%s1948_s1 + $0x80] ss:$8 sps:$4 sm:$0xff]   ;;  %v175_v11 = vrot.slane %v147_v5, %v1574_v17 }
  0x11   :  { %669 = vmatpush1.bf16.msra.mxu1 %v1384_v34  ;;  %v1363_v59 = vld [vmem:[%s1948_s1 + $0x1e4] ss:$8 sps:$4 sm:$0xff]   ;;  %v1424_v61 = vld [vmem:[%s1948_s1 + $0x94] ss:$8 sps:$4 sm:$0xff]   ;;  %v1365_v62 = vld [vmem:[%s1948_s1 + $0x1e0] ss:$8 sps:$4 sm:$0xff]  }
  0x12   :  { %670 = vmatprep.subr.bf16.mxu1 %v1388_v38  ;;  %v1366_v63 = vld [vmem:[%s1948_s1 + $0x1f4] ss:$8 sps:$4 sm:$0xff]   ;;  %v1426_v0 = vld [vmem:[%s1948_s1 + $0x90] ss:$8 sps:$4 sm:$0xff]   ;;  %v1430_v1 = vld [vmem:[%s1948_s1 + $0xa4] ss:$8 sps:$4 sm:$0xff]  }
  0x13   :  { %714 = vmatpush1.bf16.msra.mxu0 %v1335_v12  ;;  %v1370_v2 = vld [vmem:[%s1948_s1 + $0x1f0] ss:$8 sps:$4 sm:$0xff]   ;;  %v1375_v4 = vld [vmem:[%s1948_s1 + $0x204] ss:$8 sps:$4 sm:$0xff]   ;;  %v1432_v6 = vld [vmem:[%s1948_s1 + $0xa0] ss:$8 sps:$4 sm:$0xff]  }
  0x14   :  { %715 = vmatprep.subr.bf16.mxu0 %v1336_v15  ;;  %v1436_v7 = vld [vmem:[%s1948_s1 + $0xb4] ss:$8 sps:$4 sm:$0xff]   ;;  %v1373_v9 = vld [vmem:[%s1948_s1 + $0x200] ss:$8 sps:$4 sm:$0xff]   ;;  %v1438_v13 = vld [vmem:[%s1948_s1 + $0xb0] ss:$8 sps:$4 sm:$0xff]  }
  0x15   :  { %671 = vmatpush1.bf16.msra.mxu1 %v1390_v40  ;;  %v1381_v12 = vld [vmem:[%s1948_s1 + $0x214] ss:$8 sps:$4 sm:$0xff]   ;;  %v1442_v15 = vld [vmem:[%s1948_s1 + $0xc4] ss:$8 sps:$4 sm:$0xff]   ;;  %v1444_v19 = vld [vmem:[%s1948_s1 + $0xc0] ss:$8 sps:$4 sm:$0xff]  }
  0x16   :  { %672 = vmatprep.subr.bf16.mxu1 %v1394_v41  ;;  %v1448_v20 = vld [vmem:[%s1948_s1 + $0xd4] ss:$8 sps:$4 sm:$0xff]   ;;  %v1385_v21 = vld [vmem:[%s1948_s1 + $0x220] ss:$8 sps:$4 sm:$0xff]   ;;  %v1450_v23 = vld [vmem:[%s1948_s1 + $0xd0] ss:$8 sps:$4 sm:$0xff]  }
  0x17   :  { %716 = vmatpush1.bf16.msra.mxu0 %v1338_v16  ;;  %v1379_v16 = vld [vmem:[%s1948_s1 + $0x210] ss:$8 sps:$4 sm:$0xff]   ;;  %v1454_v24 = vld [vmem:[%s1948_s1 + $0xe4] ss:$8 sps:$4 sm:$0xff]   ;;  %v1456_v27 = vld [vmem:[%s1948_s1 + $0xe0] ss:$8 sps:$4 sm:$0xff]  }
  0x18   :  { %717 = vmatprep.subr.bf16.mxu0 %v1339_v18  ;;  %v1387_v18 = vld [vmem:[%s1948_s1 + $0x224] ss:$8 sps:$4 sm:$0xff]   ;;  %v1460_v28 = vld [vmem:[%s1948_s1 + $0xf4] ss:$8 sps:$4 sm:$0xff]   ;;  %v1462_v32 = vld [vmem:[%s1948_s1 + $0xf0] ss:$8 sps:$4 sm:$0xff]  }
  0x19   :  { %673 = vmatpush1.bf16.msra.mxu1 %v1396_v44  ;;  %v1399_v26 = vld [vmem:[%s1948_s1 + $0x244] ss:$8 sps:$4 sm:$0xff]   ;;  %v1403_v33 = vld [vmem:[%s1948_s1 + $0x250] ss:$8 sps:$4 sm:$0xff]   ;;  %v1409_v36 = vld [vmem:[%s1948_s1 + $0x260] ss:$8 sps:$4 sm:$0xff]  }
  0x1a   :  { %674 = vmatprep.subr.bf16.mxu1 %v1400_v45  ;;  %v1411_v34 = vld [vmem:[%s1948_s1 + $0x264] ss:$8 sps:$4 sm:$0xff]   ;;  %v1415_v38 = vld [vmem:[%s1948_s1 + $0x270] ss:$8 sps:$4 sm:$0xff]   ;;  %v1421_v40 = vld [vmem:[%s1948_s1 + $0x280] ss:$8 sps:$4 sm:$0xff]  }
  0x1b   :  { %718 = vmatpush1.bf16.msra.mxu0 %v1341_v22  ;;  %v1393_v22 = vld [vmem:[%s1948_s1 + $0x234] ss:$8 sps:$4 sm:$0xff]   ;;  %v1433_v44 = vld [vmem:[%s1948_s1 + $0x2a0] ss:$8 sps:$4 sm:$0xff]  }
  0x1c   :  { %719 = vmatprep.subr.bf16.mxu0 %v1342_v25  ;;  %v1391_v25 = vld [vmem:[%s1948_s1 + $0x230] ss:$8 sps:$4 sm:$0xff]   ;;  %v1429_v41 = vld [vmem:[%s1948_s1 + $0x294] ss:$8 sps:$4 sm:$0xff]   ;;  %v1469_v17 = vld [vmem:[%s1950_s3 + $0x8] sm:$0xff]  }
  0x1d   :  { %675 = vmatpush1.bf16.msra.mxu1 %v1402_v48  ;;  %v1441_v45 = vld [vmem:[%s1948_s1 + $0x2b4] ss:$8 sps:$4 sm:$0xff]   ;;  %v1445_v48 = vld [vmem:[%s1948_s1 + $0x2c0] ss:$8 sps:$4 sm:$0xff]  }
  0x1e   :  { %676 = vmatprep.subr.bf16.mxu1 %v1406_v49  ;;  %v1453_v49 = vld [vmem:[%s1948_s1 + $0x2d4] ss:$8 sps:$4 sm:$0xff]  }
  0x1f   :  { %720 = vmatpush1.bf16.msra.mxu0 %v1344_v29  ;;  %v1397_v29 = vld [vmem:[%s1948_s1 + $0x240] ss:$8 sps:$4 sm:$0xff]   ;;  %v1470_v31 = vld [vmem:[%s1950_s3 + $0x50] sm:$0xff]  }
  0x20   :  { %721 = vmatprep.subr.bf16.mxu0 %v1345_v30  ;;  %v1405_v30 = vld [vmem:[%s1948_s1 + $0x254] ss:$8 sps:$4 sm:$0xff]  }
  0x21   :  { %677 = vmatpush1.bf16.msra.mxu1 %v1408_v52  ;;  %v1457_v52 = vld [vmem:[%s1948_s1 + $0x2e0] ss:$8 sps:$4 sm:$0xff]  }
  0x22   :  { %678 = vmatprep.subr.bf16.mxu1 %v1412_v53  ;;  %v1465_v53 = vld [vmem:[%s1948_s1 + $0x2f4] ss:$8 sps:$4 sm:$0xff]  }
  0x23   :  { %722 = vmatpush1.bf16.msra.mxu0 %v1347_v37  ;;  %v1417_v37 = vld [vmem:[%s1948_s1 + $0x274] ss:$8 sps:$4 sm:$0xff]  }
  0x24   :  { %723 = vmatprep.subr.bf16.mxu0 %v1348_v39  ;;  %v1423_v39 = vld [vmem:[%s1948_s1 + $0x284] ss:$8 sps:$4 sm:$0xff]  }
  0x25   :  { %679 = vmatpush1.bf16.msra.mxu1 %v1414_v56  ;;  %v1467_v56 = vld [vmem:[%s1950_s3] sm:$0xff]  }
  0x26   :  { %680 = vmatprep.subr.bf16.mxu1 %v1418_v57  ;;  %v1468_v57 = vld [vmem:[%s1950_s3 + $0x48] sm:$0xff]  }
  0x27   :  { %724 = vmatpush1.bf16.msra.mxu0 %v1350_v42  ;;  %v1427_v42 = vld [vmem:[%s1948_s1 + $0x290] ss:$8 sps:$4 sm:$0xff]  }
  0x28   :  { %725 = vmatprep.subr.bf16.mxu0 %v1351_v43  ;;  %v1435_v43 = vld [vmem:[%s1948_s1 + $0x2a4] ss:$8 sps:$4 sm:$0xff]  }
  0x29   :  { %681 = vmatpush1.bf16.msra.mxu1 %v1420_v60  ;;  %v1473_v60 = vld [vmem:[%s1950_s3 + $0x18] sm:$0xff]  }
  0x2a   :  { %682 = vmatprep.subr.bf16.mxu1 %v1424_v61  ;;  %v1474_v61 = vld [vmem:[%s1950_s3 + $0x60] sm:$0xff]  }
  0x2b   :  { %726 = vmatpush1.bf16.msra.mxu0 %v1353_v46  ;;  %v1439_v46 = vld [vmem:[%s1948_s1 + $0x2b0] ss:$8 sps:$4 sm:$0xff]  }
  0x2c   :  { %727 = vmatprep.subr.bf16.mxu0 %v1354_v47  ;;  %v1447_v47 = vld [vmem:[%s1948_s1 + $0x2c4] ss:$8 sps:$4 sm:$0xff]  }
  0x2d   :  { %683 = vmatpush1.bf16.msra.mxu1 %v1426_v0  ;;  %v1477_v0 = vld [vmem:[%s1950_s3 + $0x28] sm:$0xff]  }
  0x2e   :  { %684 = vmatprep.subr.bf16.mxu1 %v1430_v1  ;;  %v1478_v1 = vld [vmem:[%s1950_s3 + $0x70] sm:$0xff]  }
  0x2f   :  { %728 = vmatpush1.bf16.msra.mxu0 %v1356_v50  ;;  %v1451_v50 = vld [vmem:[%s1948_s1 + $0x2d0] ss:$8 sps:$4 sm:$0xff]  }
  0x30   :  { %729 = vmatprep.subr.bf16.mxu0 %v1357_v51  ;;  %v1459_v51 = vld [vmem:[%s1948_s1 + $0x2e4] ss:$8 sps:$4 sm:$0xff]  }
  0x31   :  { %685 = vmatpush1.bf16.msra.mxu1 %v1432_v6 }
  0x32   :  { %686 = vmatprep.subr.bf16.mxu1 %v1436_v7 }
  0x33   :  { %730 = vmatpush1.bf16.msra.mxu0 %v1359_v54  ;;  %v1463_v54 = vld [vmem:[%s1948_s1 + $0x2f0] ss:$8 sps:$4 sm:$0xff]  }
  0x34   :  { %731 = vmatprep.subr.bf16.mxu0 %v1360_v55  ;;  %v1466_v55 = vld [vmem:[%s1950_s3 + $0x40] sm:$0xff]  }
  0x35   :  { %687 = vmatpush1.bf16.msra.mxu1 %v1438_v13 }
  0x36   :  { %688 = vmatprep.subr.bf16.mxu1 %v1442_v15 }
  0x37   :  { %732 = vmatpush1.bf16.msra.mxu0 %v1362_v58  ;;  %v1491_v58 = vmov 0.0  }
  0x38   :  { %733 = vmatprep.subr.bf16.mxu0 %v1363_v59  ;;  %31 = vst [vmem:[#allocation2] sm:$0xf] %v1491_v58  ;;  %v1472_v59 = vld [vmem:[%s1950_s3 + $0x58] sm:$0xff]  }
  0x39   :  { %689 = vmatpush1.bf16.msra.mxu1 %v1444_v19 }
  0x3a   :  { %690 = vmatprep.subr.bf16.mxu1 %v1448_v20 }
  0x3b   :  { %734 = vmatpush1.bf16.msra.mxu0 %v1365_v62  ;;  %v1475_v62 = vld [vmem:[%s1950_s3 + $0x20] sm:$0xff]  }
  0x3c   :  { %735 = vmatprep.subr.bf16.mxu0 %v1366_v63  ;;  %v1476_v63 = vld [vmem:[%s1950_s3 + $0x68] sm:$0xff]  }
  0x3d   :  { %691 = vmatpush1.bf16.msra.mxu1 %v1450_v23 }
  0x3e   :  { %692 = vmatprep.subr.bf16.mxu1 %v1454_v24  ;;  %v804_v24 = vld [vmem:[%s1952_s2] sm:$0x3] }
  0x3f   :  { %736 = vmatpush1.bf16.msra.mxu0 %v1370_v2  ;;  %v1479_v2 = vld [vmem:[%s1950_s3 + $0x30] sm:$0xff]  }
  0x40   :  { %746 = vmatprep.subr.bf16.mxu0 %v1375_v4  ;;  %v1481_v4 = vld [vmem:[%s1950_s3 + $0x38] sm:$0xff]  }
  0x41   :  { %693 = vmatpush1.bf16.msra.mxu1 %v1456_v27 }
  0x42   :  { %738 = vmatmul.mubr.bf16.vlgmr.msra.gmra.mrb[0].mxu0 %v176_v8  ;;  %694 = vmatprep.subr.bf16.mxu1 %v1460_v28 }
  0x43   :  { %747 = vmatpush1.bf16.msra.mxu0 %v1373_v9  ;;  %778 = vmatprep.mubr.bf16.mxu0 %v175_v11  ;;  %v1492_v9 = vmov 1983009808  }
  0x44   :  { %748 = vmatprep.subr.bf16.mxu0 %v1381_v12  ;;  %v791_v11 = vunpack.c.l.s4 %v1492_v9 }
  0x45   :  { %695 = vmatpush1.bf16.msra.mxu1 %v1462_v32 }
  0x46   :  { %1260 = vmatprep.subr.bf16.mxu1 %v1466_v55  ;;  %v792_v12 = vunpack.c.0.s8 %v791_v11 }
  0x47   :  { %749 = vmatpush1.bf16.msra.mxu0 %v1379_v16 }
  0x48   :  { %750 = vmatprep.subr.bf16.mxu0 %v1387_v18  ;;  %697 = vmatmul.mubr.bf16.vlgmr.msra.gmra.mrb[0].mxu1 %v154_v3  ;;  %v1480_v3 = vld [vmem:[%s1950_s3 + $0x78] sm:$0xff]   ;;  %v795_v19 = vsub.s32 %v792_v12, %v1565_v14 }
  0x49   :  { %1261 = vmatpush3.bf16.msra.mxu1 %v1467_v56 }
  0x4a   :  { %1262 = vmatprep.subr.bf16.mxu1 %v1468_v57 }
  0x4b   :  { %751 = vmatpush1.bf16.msra.mxu0 %v1385_v21  ;;  %v808_v21 = vsub.s32 0, %v1565_v14 }
  0x4c   :  { %752 = vmatprep.subr.bf16.mxu0 %v1393_v22  ;;  %v812_v22 = vsub.s32 1, %v1565_v14 }
  0x4d   :  { %1263 = vmatpush3.bf16.msra.mxu1 %v1469_v17  ;;  %v809_v28 = vrot.slane %v804_v24, %v808_v21  ;;  %v1251_v17 = vld [vmem:[%s1954_s6] ss:$0 sm:$0xff] }
  0x4e   :  { %1264 = vmatprep.subr.bf16.mxu1 %v1470_v31 }
  0x4f   :  { %753 = vmatpush1.bf16.msra.mxu0 %v1391_v25 }
  0x50   :  { %754 = vmatprep.subr.bf16.mxu0 %v1399_v26  ;;  %v32_v26 = vld [vmem:[#allocation2] sm:$0xf] }
  0x53   :  { %755 = vmatpush1.bf16.msra.mxu0 %v1397_v29  ;;  %v813_v29 = vrot.slane %v804_v24, %v812_v22 }
  0x54   :  { %756 = vmatprep.subr.bf16.mxu0 %v1405_v30 }
  0x55   :  { %v814_v32 = vcombine.low %v809_v28, %v813_v29 }
  0x57   :  { %757 = vmatpush1.bf16.msra.mxu0 %v1403_v33  ;;  %v821_v33 = vrot.slane %v814_v32, %v795_v19 }
  0x58   :  { %758 = vmatprep.subr.bf16.mxu0 %v1411_v34 }
  0x5b   :  { %759 = vmatpush1.bf16.msra.mxu0 %v1409_v36 }
  0x5c   :  { %760 = vmatprep.subr.bf16.mxu0 %v1417_v37 }
  0x5f   :  { %761 = vmatpush1.bf16.msra.mxu0 %v1415_v38 }
  0x60   :  { %762 = vmatprep.subr.bf16.mxu0 %v1423_v39 }
  0x63   :  { %763 = vmatpush1.bf16.msra.mxu0 %v1421_v40  ;;  %v1482_v40 = vld [vmem:[%s1951_s5] sm:$0xff]  }
  0x64   :  { %764 = vmatprep.subr.bf16.mxu0 %v1429_v41 }
  0x67   :  { %765 = vmatpush1.bf16.msra.mxu0 %v1427_v42  ;;  %v1483_v42 = vld [vmem:[%s1951_s5 + $0x8] sm:$0xff]  }
  0x68   :  { %766 = vmatprep.subr.bf16.mxu0 %v1435_v43  ;;  %v1484_v43 = vld [vmem:[%s1951_s5 + $0x10] sm:$0xff]  }
  0x6b   :  { %767 = vmatpush1.bf16.msra.mxu0 %v1433_v44  ;;  %v1485_v44 = vld [vmem:[%s1951_s5 + $0x18] sm:$0xff]  }
  0x6c   :  { %768 = vmatprep.subr.bf16.mxu0 %v1441_v45  ;;  %v1486_v45 = vld [vmem:[%s1951_s5 + $0x20] sm:$0xff]  }
  0x6f   :  { %769 = vmatpush1.bf16.msra.mxu0 %v1439_v46  ;;  %v1487_v46 = vld [vmem:[%s1951_s5 + $0x28] sm:$0xff]  }
  0x70   :  { %770 = vmatprep.subr.bf16.mxu0 %v1447_v47  ;;  %v1488_v47 = vld [vmem:[%s1951_s5 + $0x30] sm:$0xff]  }
  0x73   :  { %771 = vmatpush1.bf16.msra.mxu0 %v1445_v48  ;;  %v1489_v48 = vld [vmem:[%s1951_s5 + $0x38] sm:$0xff]  }
  0x74   :  { %772 = vmatprep.subr.bf16.mxu0 %v1453_v49 }
  0x77   :  { %773 = vmatpush1.bf16.msra.mxu0 %v1451_v50  ;;  %v1234_v50 = vld [vmem:[%s1953_s4] ss:$0 sm:$0xff] }
  0x78   :  { %774 = vmatprep.subr.bf16.mxu0 %v1459_v51 }
  0x7b   :  { %775 = vmatpush1.bf16.msra.mxu0 %v1457_v52 }
  0x7c   :  { %776 = vmatprep.subr.bf16.mxu0 %v1465_v53 }
  0x7f   :  { %777 = vmatpush1.bf16.msra.mxu0 %v1463_v54 }
  0x82   :  { %779 = vmatmul.mubr.bf16.vlgmr.msra.gmra.mrb[0].mxu0 %v161_v35  ;;  %v1471_v35 = vld [vmem:[%s1950_s3 + $0x10] sm:$0xff]  }
  0x83   :  { %1265 = vmatpush3.bf16.msra.mxu1 %v1471_v35 }
  0x84   :  { %1266 = vmatprep.subr.bf16.mxu1 %v1472_v59 }
  0x87   :  { %1267 = vmatpush3.bf16.msra.mxu1 %v1473_v60 }
  0x88   :  { %1268 = vmatprep.subr.bf16.mxu1 %v1474_v61 }
  0x8b   :  { %1269 = vmatpush3.bf16.msra.mxu1 %v1475_v62 }
  0x8c   :  { %1270 = vmatprep.subr.bf16.mxu1 %v1476_v63 }
  0x8f   :  { %1271 = vmatpush3.bf16.msra.mxu1 %v1477_v0 }
  0x90   :  { %1272 = vmatprep.subr.bf16.mxu1 %v1478_v1 }
  0x93   :  { %1273 = vmatpush3.bf16.msra.mxu1 %v1479_v2 }
  0x94   :  { %1274 = vmatprep.subr.bf16.mxu1 %v1480_v3 }
  0x97   :  { %1275 = vmatpush3.bf16.msra.mxu1 %v1481_v4 }
  0x98   :  { %1291 = vmatprep.subr.bf16.mxu1 %v1491_v58 }
 0x11b   :  { %v698_v5 = vpop.f32.mrb[0].mxu1 }
 0x11c   :  { %v700_v6 = vpop.f32.mrb[1].mxu1 }
 0x11d   :  { %v702_v7 = vpop.f32.mrb[2].mxu1 }
 0x11e   :  { %v703_v8 = vpop.f32.mrb[3].mxu1 }
 0x155   :  { %v780_v13 = vpop.f32.mrb[0].mxu0 }
 0x156   :  { %v1311_v15 = vadd.f32 %v780_v13, %v698_v5  ;;  %v782_v16 = vpop.f32.mrb[1].mxu0 }
 0x157   :  { %v1312_v18 = vadd.f32 %v782_v16, %v700_v6  ;;  %v784_v20 = vpop.f32.mrb[2].mxu0 }
 0x158   :  { %v785_v23 = vpop.f32.mrb[3].mxu0 }
 0x159   :  { %v789_v25 = vcombine.low %v1311_v15, %v1312_v18 }
 0x15b   :  { %v796_v27 = vrot.slane %v789_v25, %v795_v19 }
 0x15d   :  { %v798_v30 = vadd.f32 %v796_v27, %v32_v26 }
 0x15f   :  { %799 = vst [vmem:[#allocation2] sm:$0xf] %v798_v30 }
 0x166   :  { %v803_v34 = vld [vmem:[#allocation2] sm:$0xf] }
 0x167   :  { %v823_v36 = vadd.f32 %v821_v33, %v803_v34 }
 0x169   :  { %v824_v37 = vmax.f32 %v823_v36, 0.0 }
 0x16b   :  { %v832_v38 = vrot.slane %v824_v37, %v795_v19 }
 0x16d   :  { %v833_v39 = vcombine.high %v832_v38, %v832_v38  ;;  %v836_v41 = vpack.c.bf16 %v832_v38, %v832_v38 }
 0x16f   :  { %v837_v14 = vpack.c.bf16 %v833_v39, %v833_v39 }
 0x171   :  { %1005 = vmatprep.mubr.bf16.mxu1 %v837_v14 }
 0x172   :  { %1006 = vmatmul.mubr.bf16.vlgmr.msra.gmra.mrb[4].mxu1 %v836_v41 }
 0x173   :  { %1292 = vmatpush3.bf16.msra.mxu1 %v1482_v40  ;;  %1307 = vmatprep.mubr.msk.bf16.mxu1 %vm1493_vm0, %v1491_v58 }
 0x174   :  { %1293 = vmatprep.subr.bf16.mxu1 %v1491_v58 }
 0x177   :  { %1294 = vmatpush3.bf16.msra.mxu1 %v1483_v42 }
 0x178   :  { %1295 = vmatprep.subr.bf16.mxu1 %v1491_v58 }
 0x17b   :  { %1296 = vmatpush3.bf16.msra.mxu1 %v1484_v43 }
 0x17c   :  { %1297 = vmatprep.subr.bf16.mxu1 %v1491_v58 }
 0x17f   :  { %1298 = vmatpush3.bf16.msra.mxu1 %v1485_v44 }
 0x180   :  { %1299 = vmatprep.subr.bf16.mxu1 %v1491_v58 }
 0x183   :  { %1300 = vmatpush3.bf16.msra.mxu1 %v1486_v45 }
 0x184   :  { %1301 = vmatprep.subr.bf16.mxu1 %v1491_v58 }
 0x187   :  { %1302 = vmatpush3.bf16.msra.mxu1 %v1487_v46 }
 0x188   :  { %1303 = vmatprep.subr.bf16.mxu1 %v1491_v58 }
 0x18b   :  { %1304 = vmatpush3.bf16.msra.mxu1 %v1488_v47 }
 0x18c   :  { %1305 = vmatprep.subr.bf16.mxu1 %v1491_v58  ;;  %v1127_v58 = vand.u32 127, %v135_v10 }
 0x18e   :  { %vm1128_vm1 = vcmp.ge.s32.totalorder %v1127_v58, 2 }
 0x18f   :  { %1306 = vmatpush3.bf16.msra.mxu1 %v1489_v48 }
 0x245   :  { %v1276_v49 = vpop.f32.mrb[4].mxu1 }
 0x246   :  { %v1277_v51 = vpop.f32.mrb[5].mxu1 }
 0x247   :  { %v1278_v52 = vadd.f32 %v1277_v51, %v1276_v49  ;;  %v1279_v53 = vpop.f32.mrb[6].mxu1 }
 0x248   :  { %v1280_v54 = vpop.f32.mrb[7].mxu1 }
 0x249   :  { %v1008_v55 = vadd.f32 %v1278_v52, %v1234_v50 }
 0x24b   :  { %v1013_v56 = vmax.f32 %v1008_v55, 0.0 }
 0x24d   :  { %v1014_v57 = vpack.c.bf16 %v1013_v56, %v1013_v56 }
 0x24f   :  { %1308 = vmatmul.mubr.bf16.vlgmr.msra.gmra.mrb[8].mxu1 %v1014_v57 }
 0x322   :  { %v1120_v31 = vpop.f32.mrb[8].mxu1 }
 0x323   :  { %v1121_v35 = vadd.f32 %v1251_v17, %v1120_v31  ;;  %v1309_v59 = vpop.f32.mrb[9].mxu1 }
 0x324   :  { %v1123_v60 = vpop.f32.mrb[10].mxu1 }
 0x325   :  { %v1129_v61 = vmax.f32 %v1121_v35, -10.0  ;;  %v1310_v62 = vpop.f32.mrb[11].mxu1 }
 0x327   :  { %v1130_v63 = vmin.f32 %v1129_v61, -0.5 }
 0x329   :  { %v1131_v0 = vsel %vm1128_vm1, %v1130_v63, %v1121_v35 }
 0x32a   :  { %1133 = vst.msk [vmem:[%s1955_s7] sm:$0x3] %vm1132_vm2, %v1131_v0 }

</bundles_post_ra>
